<compile_context>
chip_gen: v7x
topology: tpu7x:2x2x1
jax: 0.10.0
libtpu: 0.0.40
codegen_flags: <defaults>
</compile_context>

<pallas_src>
import functools

import jax
import jax.numpy as jnp
from jax.experimental import pallas as pl
from jax.experimental.pallas import tpu as pltpu


_LANE = 128          # f32 lane width
_MAX_TILE = 8192     # positions (lanes) per grid step for large N


def _ceil_to(x, m):
    return ((x + m - 1) // m) * m


def _rvq_kernel(neg2e_ref, e_ref, esq_ref, kiota_ref, xt_ref,
                qout_ref, idx_ref, sqerr_ref):
    """Quantize a (D, L) tile of positions through all Q residual stages.

    neg2e_ref : (Q, D, K, 1) f32  -- -2 * codebook, lane-broadcastable columns
    e_ref     : (Q, D, K, 1) f32  -- codebook
    esq_ref   : (Q, K, 1)    f32  -- per-code squared norms ||e_k||^2
    kiota_ref : (K, 1)       f32  -- 0..K-1
    xt_ref    : (D, L)            -- input positions (channels on sublanes)
    qout_ref  : (D, L)            -- sum of quantized vectors over stages
    idx_ref   : (Q, L) int32      -- argmin code index per stage
    sqerr_ref : (Q, L) f32        -- per-position squared error per stage
    """
    D, L = xt_ref.shape
    Q = idx_ref.shape[0]
    K = kiota_ref.shape[0]
    kcol = kiota_ref[...]                                       # (K, 1)

    # Residual and quantized-sum accumulator as (1, L) rows (D is tiny).
    r = [xt_ref[d:d + 1, :].astype(jnp.float32) for d in range(D)]
    acc = [jnp.zeros((1, L), jnp.float32) for _ in range(D)]

    for qi in range(Q):                     # unrolled: Q is small & static
        # dist[k, n] = ||e_k||^2 - 2 e_k . r_n   (common +||r_n||^2 dropped:
        # it does not change the argmin).  (K,1)*(1,L) -> (K,L): K codes on
        # sublanes, positions on lanes -> full-width VPU work.
        dist = esq_ref[qi] + neg2e_ref[qi, 0] * r[0]
        for d in range(1, D):
            dist = dist + neg2e_ref[qi, d] * r[d]

        best = jnp.min(dist, axis=0, keepdims=True)              # (1, L)
        hit = dist <= best                                       # (K, L)
        # First-index argmin (same tie-breaking as torch.argmin / jnp.argmin),
        # done in f32 so only float sublane reductions are needed.
        idx_f = jnp.min(jnp.where(hit, kcol, float(K)),
                        axis=0, keepdims=True)                   # (1, L)
        onehot = kcol == idx_f                # (K, L): exactly one True per col
        idx_ref[qi:qi + 1, :] = idx_f.astype(jnp.int32)

        sqe = jnp.zeros((1, L), jnp.float32)
        for d in range(D):
            # Codebook "gather" via one-hot select + sublane sum (no MXU).
            qd = jnp.sum(jnp.where(onehot, e_ref[qi, d], 0.0),
                         axis=0, keepdims=True)                  # (1, L)
            diff = r[d] - qd
            sqe = sqe + diff * diff
            acc[d] = acc[d] + qd
            r[d] = diff                       # residual = residual - quantized
        sqerr_ref[qi:qi + 1, :] = sqe

    for d in range(D):
        qout_ref[d:d + 1, :] = acc[d].astype(qout_ref.dtype)


@functools.partial(jax.jit, static_argnames=("commitment_cost",))
def residual_vq_forward(x, codebooks, commitment_cost=0.25):
    """Forward pass of ResidualVectorQuantizer.

    x         : (B, C, H, W) float32  (NCHW, like the PyTorch module)
    codebooks : (Q, K, D) float32 with D == C
    Returns (quantized NCHW, total_loss scalar, indices (Q, B, H, W) int32).
    """
    B, C, H, W = x.shape
    Q, K, D = codebooks.shape
    assert C == D
    N = B * H * W

    # Positions on the lane axis, padded to a multiple of 128 so every block
    # is lane-dense.  Single step for small N; otherwise >= 2 steps of
    # _MAX_TILE positions (shardable across v7x's two TensorCores).
    n_pad = _ceil_to(N, _LANE)
    if n_pad <= _MAX_TILE:
        tile = n_pad
    else:
        tile = _MAX_TILE
        n_pad = _ceil_to(n_pad, tile)
    grid = n_pad // tile

    # (B, C, H, W) -> (D, N): channels on sublanes, positions on lanes.
    # These small layout shuffles are left to XLA (trivial at these sizes);
    # for huge tensors they could be folded away by blocking NCHW directly.
    xt = jnp.transpose(x, (1, 0, 2, 3)).reshape(D, N)
    xt = jnp.pad(xt, ((0, 0), (0, n_pad - N)))

    cb = codebooks.astype(jnp.float32)                        # (Q, K, D)
    e_cols = jnp.transpose(cb, (0, 2, 1))[..., None]          # (Q, D, K, 1)
    neg2e = -2.0 * e_cols                                     # precomputed -2E
    esq = jnp.sum(cb * cb, axis=-1)[..., None]                # (Q, K, 1)
    kiota = jnp.arange(K, dtype=jnp.float32)[:, None]         # (K, 1)

    quant_p, idx_p, sqerr_p = pl.pallas_call(
        _rvq_kernel,
        out_shape=(
            jax.ShapeDtypeStruct((D, n_pad), x.dtype),
            jax.ShapeDtypeStruct((Q, n_pad), jnp.int32),
            jax.ShapeDtypeStruct((Q, n_pad), jnp.float32),
        ),
        grid=(grid,),
        in_specs=[
            pl.BlockSpec((Q, D, K, 1), lambda i: (0, 0, 0, 0)),   # -2E
            pl.BlockSpec((Q, D, K, 1), lambda i: (0, 0, 0, 0)),   # E
            pl.BlockSpec((Q, K, 1), lambda i: (0, 0, 0)),         # ||E||^2
            pl.BlockSpec((K, 1), lambda i: (0, 0)),               # 0..K-1
            pl.BlockSpec((D, tile), lambda i: (0, i)),            # x (packed)
        ],
        out_specs=(
            pl.BlockSpec((D, tile), lambda i: (0, i)),
            pl.BlockSpec((Q, tile), lambda i: (0, i)),
            pl.BlockSpec((Q, tile), lambda i: (0, i)),
        ),
        # No grid-resident accumulator -> the position axis is embarrassingly
        # parallel (megacore sharding on v7x; harmless on v5e/v6e).
        compiler_params=pltpu.CompilerParams(
            dimension_semantics=("parallel",)),
    )(neg2e, e_cols, esq, kiota, xt)

    # Per-stage loss: q_latent_loss + commitment_cost * e_latent_loss; both
    # equal MSE(quantized, residual) in the forward pass.  Padded positions
    # are sliced off before the reduction.
    per_stage_mse = jnp.sum(sqerr_p[:, :N], axis=1) / jnp.float32(N * D)
    total_loss = jnp.sum((1.0 + commitment_cost) * per_stage_mse)

    quantized = jnp.transpose(quant_p[:, :N].reshape(C, B, H, W), (1, 0, 2, 3))
    indices = idx_p[:, :N].reshape(Q, B, H, W)
    # TODO(synk): PyTorch argmin returns int64 indices; int32 is used here.
    # TODO(synk): forward-only -- no custom VJP for the straight-through /
    # commitment-loss backward of the PyTorch module.
    return quantized, total_loss, indices


def _reference_forward(x, codebooks, commitment_cost=0.25):
    """Pure-JAX reference mirroring the PyTorch forward semantics.

    Distances drop the per-position ||r||^2 term (constant over codes, so
    argmin-invariant) and accumulate channels in the same order as the
    kernel, keeping the self-check numerically robust.
    """
    B, C, H, W = x.shape
    Q, K, D = codebooks.shape
    flat = jnp.transpose(x, (0, 2, 3, 1)).reshape(-1, D)
    residual = flat
    quant_acc = jnp.zeros_like(flat)
    total = jnp.float32(0.0)
    idxs = []
    for qi in range(Q):
        E = codebooks[qi].astype(jnp.float32)
        negE = -2.0 * E
        esq = jnp.sum(E * E, axis=1)
        dist = esq[None, :] + negE[:, 0][None, :] * residual[:, 0:1]
        for d in range(1, D):
            dist = dist + negE[:, d][None, :] * residual[:, d:d + 1]
        idx = jnp.argmin(dist, axis=1)
        quant = E[idx]
        mse = jnp.mean((quant - residual) ** 2)
        total = total + (1.0 + commitment_cost) * mse
        quant_acc = quant_acc + quant
        residual = residual - quant
        idxs.append(idx.reshape(B, H, W).astype(jnp.int32))
    quantized = jnp.transpose(quant_acc.reshape(B, H, W, D), (0, 3, 1, 2))
    return quantized.astype(x.dtype), total, jnp.stack(idxs)


if __name__ == "__main__":
    # Module config: num_embeddings=16, embedding_dim=4, num_quantizers=4
    B, C, H, W = 2, 4, 16, 16
    Q, K = 4, 16

    key = jax.random.PRNGKey(0)
    kx, ke = jax.random.split(key)
    x = jax.random.normal(kx, (B, C, H, W), dtype=jnp.float32)
    # nn.Embedding.weight.data.uniform_(-1/K, 1/K) per quantizer
    codebooks = jax.random.uniform(ke, (Q, K, C), dtype=jnp.float32,
                                   minval=-1.0 / K, maxval=1.0 / K)

    quantized, total_loss, indices = residual_vq_forward(x, codebooks)
    jax.block_until_ready((quantized, total_loss, indices))

    # Lightweight correctness check against a pure-JAX reference.
    q_ref, l_ref, i_ref = _reference_forward(x, codebooks)
    assert quantized.shape == (B, C, H, W)
    assert jnp.allclose(quantized, q_ref, atol=1e-5), "quantized mismatch"
    assert jnp.allclose(total_loss, l_ref, rtol=1e-5, atol=1e-6), "loss mismatch"
    assert jnp.array_equal(indices, i_ref), "indices mismatch"

    print("KERNEL_OK")
</pallas_src>

<mosaic_0001>
module attributes {stable_mosaic.version = 11 : i64} {
  func.func @_rvq_kernel(%arg0: i32, %arg1: memref<4x4x16x1xf32, #tpu.memory_space<vmem>>, %arg2: memref<4x4x16x1xf32, #tpu.memory_space<vmem>>, %arg3: memref<4x16x1xf32, #tpu.memory_space<vmem>>, %arg4: memref<16x1xf32, #tpu.memory_space<vmem>>, %arg5: memref<4x512xf32, #tpu.memory_space<vmem>>, %arg6: memref<4x512xf32, #tpu.memory_space<vmem>>, %arg7: memref<4x512xi32, #tpu.memory_space<vmem>>, %arg8: memref<4x512xf32, #tpu.memory_space<vmem>>) attributes {dimension_semantics = [#tpu.dimension_semantics<parallel>], iteration_bounds = array<i64: 1>, scalar_prefetch = 0 : i64, scratch_operands = 0 : i64, tpu.core_type = #tpu.core_type<tc>, window_params = [{pipeline_mode = #tpu.pipeline_mode<synchronous>, transform_indices = @transform_0, window_bounds = array<i64: 4, 4, 16, 1>}, {pipeline_mode = #tpu.pipeline_mode<synchronous>, transform_indices = @transform_1, window_bounds = array<i64: 4, 4, 16, 1>}, {pipeline_mode = #tpu.pipeline_mode<synchronous>, transform_indices = @transform_2, window_bounds = array<i64: 4, 16, 1>}, {pipeline_mode = #tpu.pipeline_mode<synchronous>, transform_indices = @transform_3, window_bounds = array<i64: 16, 1>}, {transform_indices = @transform_4, window_bounds = array<i64: 4, 512>}, {transform_indices = @transform_5, window_bounds = array<i64: 4, 512>}, {transform_indices = @transform_6, window_bounds = array<i64: 4, 512>}, {transform_indices = @transform_7, window_bounds = array<i64: 4, 512>}]} {
    %c0 = arith.constant 0 : index
    %c0_0 = arith.constant 0 : index
    %0 = vector.load %arg4[%c0, %c0_0] : memref<16x1xf32, #tpu.memory_space<vmem>>, vector<16x1xf32>
    %c0_1 = arith.constant 0 : index
    %c0_2 = arith.constant 0 : index
    %1 = vector.load %arg5[%c0_1, %c0_2] : memref<4x512xf32, #tpu.memory_space<vmem>>, vector<1x512xf32>
    %c1 = arith.constant 1 : index
    %c0_3 = arith.constant 0 : index
    %2 = vector.load %arg5[%c1, %c0_3] : memref<4x512xf32, #tpu.memory_space<vmem>>, vector<1x512xf32>
    %c2 = arith.constant 2 : index
    %c0_4 = arith.constant 0 : index
    %3 = vector.load %arg5[%c2, %c0_4] : memref<4x512xf32, #tpu.memory_space<vmem>>, vector<1x512xf32>
    %c3 = arith.constant 3 : index
    %c0_5 = arith.constant 0 : index
    %4 = vector.load %arg5[%c3, %c0_5] : memref<4x512xf32, #tpu.memory_space<vmem>>, vector<1x512xf32>
    %cst = arith.constant 0.000000e+00 : f32
    %5 = vector.broadcast %cst : f32 to vector<1x512xf32>
    %cst_6 = arith.constant 0.000000e+00 : f32
    %6 = vector.broadcast %cst_6 : f32 to vector<1x512xf32>
    %cst_7 = arith.constant 0.000000e+00 : f32
    %7 = vector.broadcast %cst_7 : f32 to vector<1x512xf32>
    %cst_8 = arith.constant 0.000000e+00 : f32
    %8 = vector.broadcast %cst_8 : f32 to vector<1x512xf32>
    %c0_9 = arith.constant 0 : index
    %c0_10 = arith.constant 0 : index
    %c0_11 = arith.constant 0 : index
    %9 = vector.load %arg3[%c0_9, %c0_10, %c0_11] : memref<4x16x1xf32, #tpu.memory_space<vmem>>, vector<1x16x1xf32>
    %10 = vector.shape_cast %9 : vector<1x16x1xf32> to vector<16x1xf32>
    %c0_12 = arith.constant 0 : index
    %c0_13 = arith.constant 0 : index
    %c0_14 = arith.constant 0 : index
    %c0_15 = arith.constant 0 : index
    %11 = vector.load %arg1[%c0_12, %c0_13, %c0_14, %c0_15] : memref<4x4x16x1xf32, #tpu.memory_space<vmem>>, vector<1x1x16x1xf32>
    %12 = vector.shape_cast %11 : vector<1x1x16x1xf32> to vector<16x1xf32>
    %13 = vector.broadcast %12 : vector<16x1xf32> to vector<16x512xf32>
    %14 = vector.broadcast %1 : vector<1x512xf32> to vector<16x512xf32>
    %15 = arith.mulf %13, %14 : vector<16x512xf32>
    %16 = vector.broadcast %10 : vector<16x1xf32> to vector<16x512xf32>
    %17 = arith.addf %16, %15 : vector<16x512xf32>
    %c0_16 = arith.constant 0 : index
    %c1_17 = arith.constant 1 : index
    %c0_18 = arith.constant 0 : index
    %c0_19 = arith.constant 0 : index
    %18 = vector.load %arg1[%c0_16, %c1_17, %c0_18, %c0_19] : memref<4x4x16x1xf32, #tpu.memory_space<vmem>>, vector<1x1x16x1xf32>
    %19 = vector.shape_cast %18 : vector<1x1x16x1xf32> to vector<16x1xf32>
    %20 = vector.broadcast %19 : vector<16x1xf32> to vector<16x512xf32>
    %21 = vector.broadcast %2 : vector<1x512xf32> to vector<16x512xf32>
    %22 = arith.mulf %20, %21 : vector<16x512xf32>
    %23 = arith.addf %17, %22 : vector<16x512xf32>
    %c0_20 = arith.constant 0 : index
    %c2_21 = arith.constant 2 : index
    %c0_22 = arith.constant 0 : index
    %c0_23 = arith.constant 0 : index
    %24 = vector.load %arg1[%c0_20, %c2_21, %c0_22, %c0_23] : memref<4x4x16x1xf32, #tpu.memory_space<vmem>>, vector<1x1x16x1xf32>
    %25 = vector.shape_cast %24 : vector<1x1x16x1xf32> to vector<16x1xf32>
    %26 = vector.broadcast %25 : vector<16x1xf32> to vector<16x512xf32>
    %27 = vector.broadcast %3 : vector<1x512xf32> to vector<16x512xf32>
    %28 = arith.mulf %26, %27 : vector<16x512xf32>
    %29 = arith.addf %23, %28 : vector<16x512xf32>
    %c0_24 = arith.constant 0 : index
    %c3_25 = arith.constant 3 : index
    %c0_26 = arith.constant 0 : index
    %c0_27 = arith.constant 0 : index
    %30 = vector.load %arg1[%c0_24, %c3_25, %c0_26, %c0_27] : memref<4x4x16x1xf32, #tpu.memory_space<vmem>>, vector<1x1x16x1xf32>
    %31 = vector.shape_cast %30 : vector<1x1x16x1xf32> to vector<16x1xf32>
    %32 = vector.broadcast %31 : vector<16x1xf32> to vector<16x512xf32>
    %33 = vector.broadcast %4 : vector<1x512xf32> to vector<16x512xf32>
    %34 = arith.mulf %32, %33 : vector<16x512xf32>
    %35 = arith.addf %29, %34 : vector<16x512xf32>
    %cst_28 = arith.constant dense<0x7F800000> : vector<512xf32>
    %36 = vector.multi_reduction <minimumf>, %35, %cst_28 [0] : vector<16x512xf32> to vector<512xf32>
    %37 = vector.shape_cast %36 : vector<512xf32> to vector<1x512xf32>
    %38 = vector.broadcast %37 : vector<1x512xf32> to vector<16x512xf32>
    %39 = arith.cmpf ole, %35, %38 : vector<16x512xf32>
    %cst_29 = arith.constant 1.600000e+01 : f32
    %40 = vector.shape_cast %0 : vector<16x1xf32> to vector<16x1xf32>
    %41 = vector.broadcast %40 : vector<16x1xf32> to vector<16x512xf32>
    %42 = vector.broadcast %cst_29 : f32 to vector<16x512xf32>
    %43 = arith.select %39, %41, %42 : vector<16x512xi1>, vector<16x512xf32>
    %cst_30 = arith.constant dense<0x7F800000> : vector<512xf32>
    %44 = vector.multi_reduction <minimumf>, %43, %cst_30 [0] : vector<16x512xf32> to vector<512xf32>
    %45 = vector.shape_cast %44 : vector<512xf32> to vector<1x512xf32>
    %46 = vector.broadcast %0 : vector<16x1xf32> to vector<16x512xf32>
    %47 = vector.broadcast %45 : vector<1x512xf32> to vector<16x512xf32>
    %48 = arith.cmpf oeq, %46, %47 : vector<16x512xf32>
    %49 = arith.fptosi %45 : vector<1x512xf32> to vector<1x512xi32>
    %c0_31 = arith.constant 0 : index
    %c0_32 = arith.constant 0 : index
    %50 = vector.load %arg7[%c0_31, %c0_32] : memref<4x512xi32, #tpu.memory_space<vmem>>, vector<1x512xi32>
    tpu.vector_store %arg7[%c0_31, %c0_32], %49 {strides = array<i32>} : memref<4x512xi32, #tpu.memory_space<vmem>>, vector<1x512xi32>,
    %cst_33 = arith.constant 0.000000e+00 : f32
    %51 = vector.broadcast %cst_33 : f32 to vector<1x512xf32>
    %c0_34 = arith.constant 0 : index
    %c0_35 = arith.constant 0 : index
    %c0_36 = arith.constant 0 : index
    %c0_37 = arith.constant 0 : index
    %52 = vector.load %arg2[%c0_34, %c0_35, %c0_36, %c0_37] : memref<4x4x16x1xf32, #tpu.memory_space<vmem>>, vector<1x1x16x1xf32>
    %53 = vector.shape_cast %52 : vector<1x1x16x1xf32> to vector<16x1xf32>
    %cst_38 = arith.constant 0.000000e+00 : f32
    %54 = vector.shape_cast %53 : vector<16x1xf32> to vector<16x1xf32>
    %55 = vector.broadcast %54 : vector<16x1xf32> to vector<16x512xf32>
    %56 = vector.broadcast %cst_38 : f32 to vector<16x512xf32>
    %57 = arith.select %48, %55, %56 : vector<16x512xi1>, vector<16x512xf32>
    %cst_39 = arith.constant dense<0.000000e+00> : vector<512xf32>
    %58 = vector.multi_reduction <add>, %57, %cst_39 [0] : vector<16x512xf32> to vector<512xf32>
    %59 = vector.shape_cast %58 : vector<512xf32> to vector<1x512xf32>
    %60 = arith.subf %1, %59 : vector<1x512xf32>
    %61 = arith.mulf %60, %60 : vector<1x512xf32>
    %62 = arith.addf %51, %61 : vector<1x512xf32>
    %63 = arith.addf %5, %59 : vector<1x512xf32>
    %c0_40 = arith.constant 0 : index
    %c1_41 = arith.constant 1 : index
    %c0_42 = arith.constant 0 : index
    %c0_43 = arith.constant 0 : index
    %64 = vector.load %arg2[%c0_40, %c1_41, %c0_42, %c0_43] : memref<4x4x16x1xf32, #tpu.memory_space<vmem>>, vector<1x1x16x1xf32>
    %65 = vector.shape_cast %64 : vector<1x1x16x1xf32> to vector<16x1xf32>
    %cst_44 = arith.constant 0.000000e+00 : f32
    %66 = vector.shape_cast %65 : vector<16x1xf32> to vector<16x1xf32>
    %67 = vector.broadcast %66 : vector<16x1xf32> to vector<16x512xf32>
    %68 = vector.broadcast %cst_44 : f32 to vector<16x512xf32>
    %69 = arith.select %48, %67, %68 : vector<16x512xi1>, vector<16x512xf32>
    %cst_45 = arith.constant dense<0.000000e+00> : vector<512xf32>
    %70 = vector.multi_reduction <add>, %69, %cst_45 [0] : vector<16x512xf32> to vector<512xf32>
    %71 = vector.shape_cast %70 : vector<512xf32> to vector<1x512xf32>
    %72 = arith.subf %2, %71 : vector<1x512xf32>
    %73 = arith.mulf %72, %72 : vector<1x512xf32>
    %74 = arith.addf %62, %73 : vector<1x512xf32>
    %75 = arith.addf %6, %71 : vector<1x512xf32>
    %c0_46 = arith.constant 0 : index
    %c2_47 = arith.constant 2 : index
    %c0_48 = arith.constant 0 : index
    %c0_49 = arith.constant 0 : index
    %76 = vector.load %arg2[%c0_46, %c2_47, %c0_48, %c0_49] : memref<4x4x16x1xf32, #tpu.memory_space<vmem>>, vector<1x1x16x1xf32>
    %77 = vector.shape_cast %76 : vector<1x1x16x1xf32> to vector<16x1xf32>
    %cst_50 = arith.constant 0.000000e+00 : f32
    %78 = vector.shape_cast %77 : vector<16x1xf32> to vector<16x1xf32>
    %79 = vector.broadcast %78 : vector<16x1xf32> to vector<16x512xf32>
    %80 = vector.broadcast %cst_50 : f32 to vector<16x512xf32>
    %81 = arith.select %48, %79, %80 : vector<16x512xi1>, vector<16x512xf32>
    %cst_51 = arith.constant dense<0.000000e+00> : vector<512xf32>
    %82 = vector.multi_reduction <add>, %81, %cst_51 [0] : vector<16x512xf32> to vector<512xf32>
    %83 = vector.shape_cast %82 : vector<512xf32> to vector<1x512xf32>
    %84 = arith.subf %3, %83 : vector<1x512xf32>
    %85 = arith.mulf %84, %84 : vector<1x512xf32>
    %86 = arith.addf %74, %85 : vector<1x512xf32>
    %87 = arith.addf %7, %83 : vector<1x512xf32>
    %c0_52 = arith.constant 0 : index
    %c3_53 = arith.constant 3 : index
    %c0_54 = arith.constant 0 : index
    %c0_55 = arith.constant 0 : index
    %88 = vector.load %arg2[%c0_52, %c3_53, %c0_54, %c0_55] : memref<4x4x16x1xf32, #tpu.memory_space<vmem>>, vector<1x1x16x1xf32>
    %89 = vector.shape_cast %88 : vector<1x1x16x1xf32> to vector<16x1xf32>
    %cst_56 = arith.constant 0.000000e+00 : f32
    %90 = vector.shape_cast %89 : vector<16x1xf32> to vector<16x1xf32>
    %91 = vector.broadcast %90 : vector<16x1xf32> to vector<16x512xf32>
    %92 = vector.broadcast %cst_56 : f32 to vector<16x512xf32>
    %93 = arith.select %48, %91, %92 : vector<16x512xi1>, vector<16x512xf32>
    %cst_57 = arith.constant dense<0.000000e+00> : vector<512xf32>
    %94 = vector.multi_reduction <add>, %93, %cst_57 [0] : vector<16x512xf32> to vector<512xf32>
    %95 = vector.shape_cast %94 : vector<512xf32> to vector<1x512xf32>
    %96 = arith.subf %4, %95 : vector<1x512xf32>
    %97 = arith.mulf %96, %96 : vector<1x512xf32>
    %98 = arith.addf %86, %97 : vector<1x512xf32>
    %99 = arith.addf %8, %95 : vector<1x512xf32>
    %c0_58 = arith.constant 0 : index
    %c0_59 = arith.constant 0 : index
    %100 = vector.load %arg8[%c0_58, %c0_59] : memref<4x512xf32, #tpu.memory_space<vmem>>, vector<1x512xf32>
    tpu.vector_store %arg8[%c0_58, %c0_59], %98 {strides = array<i32>} : memref<4x512xf32, #tpu.memory_space<vmem>>, vector<1x512xf32>,
    %c1_60 = arith.constant 1 : index
    %c0_61 = arith.constant 0 : index
    %c0_62 = arith.constant 0 : index
    %101 = vector.load %arg3[%c1_60, %c0_61, %c0_62] : memref<4x16x1xf32, #tpu.memory_space<vmem>>, vector<1x16x1xf32>
    %102 = vector.shape_cast %101 : vector<1x16x1xf32> to vector<16x1xf32>
    %c1_63 = arith.constant 1 : index
    %c0_64 = arith.constant 0 : index
    %c0_65 = arith.constant 0 : index
    %c0_66 = arith.constant 0 : index
    %103 = vector.load %arg1[%c1_63, %c0_64, %c0_65, %c0_66] : memref<4x4x16x1xf32, #tpu.memory_space<vmem>>, vector<1x1x16x1xf32>
    %104 = vector.shape_cast %103 : vector<1x1x16x1xf32> to vector<16x1xf32>
    %105 = vector.broadcast %104 : vector<16x1xf32> to vector<16x512xf32>
    %106 = vector.broadcast %60 : vector<1x512xf32> to vector<16x512xf32>
    %107 = arith.mulf %105, %106 : vector<16x512xf32>
    %108 = vector.broadcast %102 : vector<16x1xf32> to vector<16x512xf32>
    %109 = arith.addf %108, %107 : vector<16x512xf32>
    %c1_67 = arith.constant 1 : index
    %c1_68 = arith.constant 1 : index
    %c0_69 = arith.constant 0 : index
    %c0_70 = arith.constant 0 : index
    %110 = vector.load %arg1[%c1_67, %c1_68, %c0_69, %c0_70] : memref<4x4x16x1xf32, #tpu.memory_space<vmem>>, vector<1x1x16x1xf32>
    %111 = vector.shape_cast %110 : vector<1x1x16x1xf32> to vector<16x1xf32>
    %112 = vector.broadcast %111 : vector<16x1xf32> to vector<16x512xf32>
    %113 = vector.broadcast %72 : vector<1x512xf32> to vector<16x512xf32>
    %114 = arith.mulf %112, %113 : vector<16x512xf32>
    %115 = arith.addf %109, %114 : vector<16x512xf32>
    %c1_71 = arith.constant 1 : index
    %c2_72 = arith.constant 2 : index
    %c0_73 = arith.constant 0 : index
    %c0_74 = arith.constant 0 : index
    %116 = vector.load %arg1[%c1_71, %c2_72, %c0_73, %c0_74] : memref<4x4x16x1xf32, #tpu.memory_space<vmem>>, vector<1x1x16x1xf32>
    %117 = vector.shape_cast %116 : vector<1x1x16x1xf32> to vector<16x1xf32>
    %118 = vector.broadcast %117 : vector<16x1xf32> to vector<16x512xf32>
    %119 = vector.broadcast %84 : vector<1x512xf32> to vector<16x512xf32>
    %120 = arith.mulf %118, %119 : vector<16x512xf32>
    %121 = arith.addf %115, %120 : vector<16x512xf32>
    %c1_75 = arith.constant 1 : index
    %c3_76 = arith.constant 3 : index
    %c0_77 = arith.constant 0 : index
    %c0_78 = arith.constant 0 : index
    %122 = vector.load %arg1[%c1_75, %c3_76, %c0_77, %c0_78] : memref<4x4x16x1xf32, #tpu.memory_space<vmem>>, vector<1x1x16x1xf32>
    %123 = vector.shape_cast %122 : vector<1x1x16x1xf32> to vector<16x1xf32>
    %124 = vector.broadcast %123 : vector<16x1xf32> to vector<16x512xf32>
    %125 = vector.broadcast %96 : vector<1x512xf32> to vector<16x512xf32>
    %126 = arith.mulf %124, %125 : vector<16x512xf32>
    %127 = arith.addf %121, %126 : vector<16x512xf32>
    %cst_79 = arith.constant dense<0x7F800000> : vector<512xf32>
    %128 = vector.multi_reduction <minimumf>, %127, %cst_79 [0] : vector<16x512xf32> to vector<512xf32>
    %129 = vector.shape_cast %128 : vector<512xf32> to vector<1x512xf32>
    %130 = vector.broadcast %129 : vector<1x512xf32> to vector<16x512xf32>
    %131 = arith.cmpf ole, %127, %130 : vector<16x512xf32>
    %cst_80 = arith.constant 1.600000e+01 : f32
    %132 = vector.shape_cast %0 : vector<16x1xf32> to vector<16x1xf32>
    %133 = vector.broadcast %132 : vector<16x1xf32> to vector<16x512xf32>
    %134 = vector.broadcast %cst_80 : f32 to vector<16x512xf32>
    %135 = arith.select %131, %133, %134 : vector<16x512xi1>, vector<16x512xf32>
    %cst_81 = arith.constant dense<0x7F800000> : vector<512xf32>
    %136 = vector.multi_reduction <minimumf>, %135, %cst_81 [0] : vector<16x512xf32> to vector<512xf32>
    %137 = vector.shape_cast %136 : vector<512xf32> to vector<1x512xf32>
    %138 = vector.broadcast %0 : vector<16x1xf32> to vector<16x512xf32>
    %139 = vector.broadcast %137 : vector<1x512xf32> to vector<16x512xf32>
    %140 = arith.cmpf oeq, %138, %139 : vector<16x512xf32>
    %141 = arith.fptosi %137 : vector<1x512xf32> to vector<1x512xi32>
    %c1_82 = arith.constant 1 : index
    %c0_83 = arith.constant 0 : index
    %142 = vector.load %arg7[%c1_82, %c0_83] : memref<4x512xi32, #tpu.memory_space<vmem>>, vector<1x512xi32>
    tpu.vector_store %arg7[%c1_82, %c0_83], %141 {strides = array<i32>} : memref<4x512xi32, #tpu.memory_space<vmem>>, vector<1x512xi32>,
    %cst_84 = arith.constant 0.000000e+00 : f32
    %143 = vector.broadcast %cst_84 : f32 to vector<1x512xf32>
    %c1_85 = arith.constant 1 : index
    %c0_86 = arith.constant 0 : index
    %c0_87 = arith.constant 0 : index
    %c0_88 = arith.constant 0 : index
    %144 = vector.load %arg2[%c1_85, %c0_86, %c0_87, %c0_88] : memref<4x4x16x1xf32, #tpu.memory_space<vmem>>, vector<1x1x16x1xf32>
    %145 = vector.shape_cast %144 : vector<1x1x16x1xf32> to vector<16x1xf32>
    %cst_89 = arith.constant 0.000000e+00 : f32
    %146 = vector.shape_cast %145 : vector<16x1xf32> to vector<16x1xf32>
    %147 = vector.broadcast %146 : vector<16x1xf32> to vector<16x512xf32>
    %148 = vector.broadcast %cst_89 : f32 to vector<16x512xf32>
    %149 = arith.select %140, %147, %148 : vector<16x512xi1>, vector<16x512xf32>
    %cst_90 = arith.constant dense<0.000000e+00> : vector<512xf32>
    %150 = vector.multi_reduction <add>, %149, %cst_90 [0] : vector<16x512xf32> to vector<512xf32>
    %151 = vector.shape_cast %150 : vector<512xf32> to vector<1x512xf32>
    %152 = arith.subf %60, %151 : vector<1x512xf32>
    %153 = arith.mulf %152, %152 : vector<1x512xf32>
    %154 = arith.addf %143, %153 : vector<1x512xf32>
    %155 = arith.addf %63, %151 : vector<1x512xf32>
    %c1_91 = arith.constant 1 : index
    %c1_92 = arith.constant 1 : index
    %c0_93 = arith.constant 0 : index
    %c0_94 = arith.constant 0 : index
    %156 = vector.load %arg2[%c1_91, %c1_92, %c0_93, %c0_94] : memref<4x4x16x1xf32, #tpu.memory_space<vmem>>, vector<1x1x16x1xf32>
    %157 = vector.shape_cast %156 : vector<1x1x16x1xf32> to vector<16x1xf32>
    %cst_95 = arith.constant 0.000000e+00 : f32
    %158 = vector.shape_cast %157 : vector<16x1xf32> to vector<16x1xf32>
    %159 = vector.broadcast %158 : vector<16x1xf32> to vector<16x512xf32>
    %160 = vector.broadcast %cst_95 : f32 to vector<16x512xf32>
    %161 = arith.select %140, %159, %160 : vector<16x512xi1>, vector<16x512xf32>
    %cst_96 = arith.constant dense<0.000000e+00> : vector<512xf32>
    %162 = vector.multi_reduction <add>, %161, %cst_96 [0] : vector<16x512xf32> to vector<512xf32>
    %163 = vector.shape_cast %162 : vector<512xf32> to vector<1x512xf32>
    %164 = arith.subf %72, %163 : vector<1x512xf32>
    %165 = arith.mulf %164, %164 : vector<1x512xf32>
    %166 = arith.addf %154, %165 : vector<1x512xf32>
    %167 = arith.addf %75, %163 : vector<1x512xf32>
    %c1_97 = arith.constant 1 : index
    %c2_98 = arith.constant 2 : index
    %c0_99 = arith.constant 0 : index
    %c0_100 = arith.constant 0 : index
    %168 = vector.load %arg2[%c1_97, %c2_98, %c0_99, %c0_100] : memref<4x4x16x1xf32, #tpu.memory_space<vmem>>, vector<1x1x16x1xf32>
    %169 = vector.shape_cast %168 : vector<1x1x16x1xf32> to vector<16x1xf32>
    %cst_101 = arith.constant 0.000000e+00 : f32
    %170 = vector.shape_cast %169 : vector<16x1xf32> to vector<16x1xf32>
    %171 = vector.broadcast %170 : vector<16x1xf32> to vector<16x512xf32>
    %172 = vector.broadcast %cst_101 : f32 to vector<16x512xf32>
    %173 = arith.select %140, %171, %172 : vector<16x512xi1>, vector<16x512xf32>
    %cst_102 = arith.constant dense<0.000000e+00> : vector<512xf32>
    %174 = vector.multi_reduction <add>, %173, %cst_102 [0] : vector<16x512xf32> to vector<512xf32>
    %175 = vector.shape_cast %174 : vector<512xf32> to vector<1x512xf32>
    %176 = arith.subf %84, %175 : vector<1x512xf32>
    %177 = arith.mulf %176, %176 : vector<1x512xf32>
    %178 = arith.addf %166, %177 : vector<1x512xf32>
    %179 = arith.addf %87, %175 : vector<1x512xf32>
    %c1_103 = arith.constant 1 : index
    %c3_104 = arith.constant 3 : index
    %c0_105 = arith.constant 0 : index
    %c0_106 = arith.constant 0 : index
    %180 = vector.load %arg2[%c1_103, %c3_104, %c0_105, %c0_106] : memref<4x4x16x1xf32, #tpu.memory_space<vmem>>, vector<1x1x16x1xf32>
    %181 = vector.shape_cast %180 : vector<1x1x16x1xf32> to vector<16x1xf32>
    %cst_107 = arith.constant 0.000000e+00 : f32
    %182 = vector.shape_cast %181 : vector<16x1xf32> to vector<16x1xf32>
    %183 = vector.broadcast %182 : vector<16x1xf32> to vector<16x512xf32>
    %184 = vector.broadcast %cst_107 : f32 to vector<16x512xf32>
    %185 = arith.select %140, %183, %184 : vector<16x512xi1>, vector<16x512xf32>
    %cst_108 = arith.constant dense<0.000000e+00> : vector<512xf32>
    %186 = vector.multi_reduction <add>, %185, %cst_108 [0] : vector<16x512xf32> to vector<512xf32>
    %187 = vector.shape_cast %186 : vector<512xf32> to vector<1x512xf32>
    %188 = arith.subf %96, %187 : vector<1x512xf32>
    %189 = arith.mulf %188, %188 : vector<1x512xf32>
    %190 = arith.addf %178, %189 : vector<1x512xf32>
    %191 = arith.addf %99, %187 : vector<1x512xf32>
    %c1_109 = arith.constant 1 : index
    %c0_110 = arith.constant 0 : index
    %192 = vector.load %arg8[%c1_109, %c0_110] : memref<4x512xf32, #tpu.memory_space<vmem>>, vector<1x512xf32>
    tpu.vector_store %arg8[%c1_109, %c0_110], %190 {strides = array<i32>} : memref<4x512xf32, #tpu.memory_space<vmem>>, vector<1x512xf32>,
    %c2_111 = arith.constant 2 : index
    %c0_112 = arith.constant 0 : index
    %c0_113 = arith.constant 0 : index
    %193 = vector.load %arg3[%c2_111, %c0_112, %c0_113] : memref<4x16x1xf32, #tpu.memory_space<vmem>>, vector<1x16x1xf32>
    %194 = vector.shape_cast %193 : vector<1x16x1xf32> to vector<16x1xf32>
    %c2_114 = arith.constant 2 : index
    %c0_115 = arith.constant 0 : index
    %c0_116 = arith.constant 0 : index
    %c0_117 = arith.constant 0 : index
    %195 = vector.load %arg1[%c2_114, %c0_115, %c0_116, %c0_117] : memref<4x4x16x1xf32, #tpu.memory_space<vmem>>, vector<1x1x16x1xf32>
    %196 = vector.shape_cast %195 : vector<1x1x16x1xf32> to vector<16x1xf32>
    %197 = vector.broadcast %196 : vector<16x1xf32> to vector<16x512xf32>
    %198 = vector.broadcast %152 : vector<1x512xf32> to vector<16x512xf32>
    %199 = arith.mulf %197, %198 : vector<16x512xf32>
    %200 = vector.broadcast %194 : vector<16x1xf32> to vector<16x512xf32>
    %201 = arith.addf %200, %199 : vector<16x512xf32>
    %c2_118 = arith.constant 2 : index
    %c1_119 = arith.constant 1 : index
    %c0_120 = arith.constant 0 : index
    %c0_121 = arith.constant 0 : index
    %202 = vector.load %arg1[%c2_118, %c1_119, %c0_120, %c0_121] : memref<4x4x16x1xf32, #tpu.memory_space<vmem>>, vector<1x1x16x1xf32>
    %203 = vector.shape_cast %202 : vector<1x1x16x1xf32> to vector<16x1xf32>
    %204 = vector.broadcast %203 : vector<16x1xf32> to vector<16x512xf32>
    %205 = vector.broadcast %164 : vector<1x512xf32> to vector<16x512xf32>
    %206 = arith.mulf %204, %205 : vector<16x512xf32>
    %207 = arith.addf %201, %206 : vector<16x512xf32>
    %c2_122 = arith.constant 2 : index
    %c2_123 = arith.constant 2 : index
    %c0_124 = arith.constant 0 : index
    %c0_125 = arith.constant 0 : index
    %208 = vector.load %arg1[%c2_122, %c2_123, %c0_124, %c0_125] : memref<4x4x16x1xf32, #tpu.memory_space<vmem>>, vector<1x1x16x1xf32>
    %209 = vector.shape_cast %208 : vector<1x1x16x1xf32> to vector<16x1xf32>
    %210 = vector.broadcast %209 : vector<16x1xf32> to vector<16x512xf32>
    %211 = vector.broadcast %176 : vector<1x512xf32> to vector<16x512xf32>
    %212 = arith.mulf %210, %211 : vector<16x512xf32>
    %213 = arith.addf %207, %212 : vector<16x512xf32>
    %c2_126 = arith.constant 2 : index
    %c3_127 = arith.constant 3 : index
    %c0_128 = arith.constant 0 : index
    %c0_129 = arith.constant 0 : index
    %214 = vector.load %arg1[%c2_126, %c3_127, %c0_128, %c0_129] : memref<4x4x16x1xf32, #tpu.memory_space<vmem>>, vector<1x1x16x1xf32>
    %215 = vector.shape_cast %214 : vector<1x1x16x1xf32> to vector<16x1xf32>
    %216 = vector.broadcast %215 : vector<16x1xf32> to vector<16x512xf32>
    %217 = vector.broadcast %188 : vector<1x512xf32> to vector<16x512xf32>
    %218 = arith.mulf %216, %217 : vector<16x512xf32>
    %219 = arith.addf %213, %218 : vector<16x512xf32>
    %cst_130 = arith.constant dense<0x7F800000> : vector<512xf32>
    %220 = vector.multi_reduction <minimumf>, %219, %cst_130 [0] : vector<16x512xf32> to vector<512xf32>
    %221 = vector.shape_cast %220 : vector<512xf32> to vector<1x512xf32>
    %222 = vector.broadcast %221 : vector<1x512xf32> to vector<16x512xf32>
    %223 = arith.cmpf ole, %219, %222 : vector<16x512xf32>
    %cst_131 = arith.constant 1.600000e+01 : f32
    %224 = vector.shape_cast %0 : vector<16x1xf32> to vector<16x1xf32>
    %225 = vector.broadcast %224 : vector<16x1xf32> to vector<16x512xf32>
    %226 = vector.broadcast %cst_131 : f32 to vector<16x512xf32>
    %227 = arith.select %223, %225, %226 : vector<16x512xi1>, vector<16x512xf32>
    %cst_132 = arith.constant dense<0x7F800000> : vector<512xf32>
    %228 = vector.multi_reduction <minimumf>, %227, %cst_132 [0] : vector<16x512xf32> to vector<512xf32>
    %229 = vector.shape_cast %228 : vector<512xf32> to vector<1x512xf32>
    %230 = vector.broadcast %0 : vector<16x1xf32> to vector<16x512xf32>
    %231 = vector.broadcast %229 : vector<1x512xf32> to vector<16x512xf32>
    %232 = arith.cmpf oeq, %230, %231 : vector<16x512xf32>
    %233 = arith.fptosi %229 : vector<1x512xf32> to vector<1x512xi32>
    %c2_133 = arith.constant 2 : index
    %c0_134 = arith.constant 0 : index
    %234 = vector.load %arg7[%c2_133, %c0_134] : memref<4x512xi32, #tpu.memory_space<vmem>>, vector<1x512xi32>
    tpu.vector_store %arg7[%c2_133, %c0_134], %233 {strides = array<i32>} : memref<4x512xi32, #tpu.memory_space<vmem>>, vector<1x512xi32>,
    %cst_135 = arith.constant 0.000000e+00 : f32
    %235 = vector.broadcast %cst_135 : f32 to vector<1x512xf32>
    %c2_136 = arith.constant 2 : index
    %c0_137 = arith.constant 0 : index
    %c0_138 = arith.constant 0 : index
    %c0_139 = arith.constant 0 : index
    %236 = vector.load %arg2[%c2_136, %c0_137, %c0_138, %c0_139] : memref<4x4x16x1xf32, #tpu.memory_space<vmem>>, vector<1x1x16x1xf32>
    %237 = vector.shape_cast %236 : vector<1x1x16x1xf32> to vector<16x1xf32>
    %cst_140 = arith.constant 0.000000e+00 : f32
    %238 = vector.shape_cast %237 : vector<16x1xf32> to vector<16x1xf32>
    %239 = vector.broadcast %238 : vector<16x1xf32> to vector<16x512xf32>
    %240 = vector.broadcast %cst_140 : f32 to vector<16x512xf32>
    %241 = arith.select %232, %239, %240 : vector<16x512xi1>, vector<16x512xf32>
    %cst_141 = arith.constant dense<0.000000e+00> : vector<512xf32>
    %242 = vector.multi_reduction <add>, %241, %cst_141 [0] : vector<16x512xf32> to vector<512xf32>
    %243 = vector.shape_cast %242 : vector<512xf32> to vector<1x512xf32>
    %244 = arith.subf %152, %243 : vector<1x512xf32>
    %245 = arith.mulf %244, %244 : vector<1x512xf32>
    %246 = arith.addf %235, %245 : vector<1x512xf32>
    %247 = arith.addf %155, %243 : vector<1x512xf32>
    %c2_142 = arith.constant 2 : index
    %c1_143 = arith.constant 1 : index
    %c0_144 = arith.constant 0 : index
    %c0_145 = arith.constant 0 : index
    %248 = vector.load %arg2[%c2_142, %c1_143, %c0_144, %c0_145] : memref<4x4x16x1xf32, #tpu.memory_space<vmem>>, vector<1x1x16x1xf32>
    %249 = vector.shape_cast %248 : vector<1x1x16x1xf32> to vector<16x1xf32>
    %cst_146 = arith.constant 0.000000e+00 : f32
    %250 = vector.shape_cast %249 : vector<16x1xf32> to vector<16x1xf32>
    %251 = vector.broadcast %250 : vector<16x1xf32> to vector<16x512xf32>
    %252 = vector.broadcast %cst_146 : f32 to vector<16x512xf32>
    %253 = arith.select %232, %251, %252 : vector<16x512xi1>, vector<16x512xf32>
    %cst_147 = arith.constant dense<0.000000e+00> : vector<512xf32>
    %254 = vector.multi_reduction <add>, %253, %cst_147 [0] : vector<16x512xf32> to vector<512xf32>
    %255 = vector.shape_cast %254 : vector<512xf32> to vector<1x512xf32>
    %256 = arith.subf %164, %255 : vector<1x512xf32>
    %257 = arith.mulf %256, %256 : vector<1x512xf32>
    %258 = arith.addf %246, %257 : vector<1x512xf32>
    %259 = arith.addf %167, %255 : vector<1x512xf32>
    %c2_148 = arith.constant 2 : index
    %c2_149 = arith.constant 2 : index
    %c0_150 = arith.constant 0 : index
    %c0_151 = arith.constant 0 : index
    %260 = vector.load %arg2[%c2_148, %c2_149, %c0_150, %c0_151] : memref<4x4x16x1xf32, #tpu.memory_space<vmem>>, vector<1x1x16x1xf32>
    %261 = vector.shape_cast %260 : vector<1x1x16x1xf32> to vector<16x1xf32>
    %cst_152 = arith.constant 0.000000e+00 : f32
    %262 = vector.shape_cast %261 : vector<16x1xf32> to vector<16x1xf32>
    %263 = vector.broadcast %262 : vector<16x1xf32> to vector<16x512xf32>
    %264 = vector.broadcast %cst_152 : f32 to vector<16x512xf32>
    %265 = arith.select %232, %263, %264 : vector<16x512xi1>, vector<16x512xf32>
    %cst_153 = arith.constant dense<0.000000e+00> : vector<512xf32>
    %266 = vector.multi_reduction <add>, %265, %cst_153 [0] : vector<16x512xf32> to vector<512xf32>
    %267 = vector.shape_cast %266 : vector<512xf32> to vector<1x512xf32>
    %268 = arith.subf %176, %267 : vector<1x512xf32>
    %269 = arith.mulf %268, %268 : vector<1x512xf32>
    %270 = arith.addf %258, %269 : vector<1x512xf32>
    %271 = arith.addf %179, %267 : vector<1x512xf32>
    %c2_154 = arith.constant 2 : index
    %c3_155 = arith.constant 3 : index
    %c0_156 = arith.constant 0 : index
    %c0_157 = arith.constant 0 : index
    %272 = vector.load %arg2[%c2_154, %c3_155, %c0_156, %c0_157] : memref<4x4x16x1xf32, #tpu.memory_space<vmem>>, vector<1x1x16x1xf32>
    %273 = vector.shape_cast %272 : vector<1x1x16x1xf32> to vector<16x1xf32>
    %cst_158 = arith.constant 0.000000e+00 : f32
    %274 = vector.shape_cast %273 : vector<16x1xf32> to vector<16x1xf32>
    %275 = vector.broadcast %274 : vector<16x1xf32> to vector<16x512xf32>
    %276 = vector.broadcast %cst_158 : f32 to vector<16x512xf32>
    %277 = arith.select %232, %275, %276 : vector<16x512xi1>, vector<16x512xf32>
    %cst_159 = arith.constant dense<0.000000e+00> : vector<512xf32>
    %278 = vector.multi_reduction <add>, %277, %cst_159 [0] : vector<16x512xf32> to vector<512xf32>
    %279 = vector.shape_cast %278 : vector<512xf32> to vector<1x512xf32>
    %280 = arith.subf %188, %279 : vector<1x512xf32>
    %281 = arith.mulf %280, %280 : vector<1x512xf32>
    %282 = arith.addf %270, %281 : vector<1x512xf32>
    %283 = arith.addf %191, %279 : vector<1x512xf32>
    %c2_160 = arith.constant 2 : index
    %c0_161 = arith.constant 0 : index
    %284 = vector.load %arg8[%c2_160, %c0_161] : memref<4x512xf32, #tpu.memory_space<vmem>>, vector<1x512xf32>
    tpu.vector_store %arg8[%c2_160, %c0_161], %282 {strides = array<i32>} : memref<4x512xf32, #tpu.memory_space<vmem>>, vector<1x512xf32>,
    %c3_162 = arith.constant 3 : index
    %c0_163 = arith.constant 0 : index
    %c0_164 = arith.constant 0 : index
    %285 = vector.load %arg3[%c3_162, %c0_163, %c0_164] : memref<4x16x1xf32, #tpu.memory_space<vmem>>, vector<1x16x1xf32>
    %286 = vector.shape_cast %285 : vector<1x16x1xf32> to vector<16x1xf32>
    %c3_165 = arith.constant 3 : index
    %c0_166 = arith.constant 0 : index
    %c0_167 = arith.constant 0 : index
    %c0_168 = arith.constant 0 : index
    %287 = vector.load %arg1[%c3_165, %c0_166, %c0_167, %c0_168] : memref<4x4x16x1xf32, #tpu.memory_space<vmem>>, vector<1x1x16x1xf32>
    %288 = vector.shape_cast %287 : vector<1x1x16x1xf32> to vector<16x1xf32>
    %289 = vector.broadcast %288 : vector<16x1xf32> to vector<16x512xf32>
    %290 = vector.broadcast %244 : vector<1x512xf32> to vector<16x512xf32>
    %291 = arith.mulf %289, %290 : vector<16x512xf32>
    %292 = vector.broadcast %286 : vector<16x1xf32> to vector<16x512xf32>
    %293 = arith.addf %292, %291 : vector<16x512xf32>
    %c3_169 = arith.constant 3 : index
    %c1_170 = arith.constant 1 : index
    %c0_171 = arith.constant 0 : index
    %c0_172 = arith.constant 0 : index
    %294 = vector.load %arg1[%c3_169, %c1_170, %c0_171, %c0_172] : memref<4x4x16x1xf32, #tpu.memory_space<vmem>>, vector<1x1x16x1xf32>
    %295 = vector.shape_cast %294 : vector<1x1x16x1xf32> to vector<16x1xf32>
    %296 = vector.broadcast %295 : vector<16x1xf32> to vector<16x512xf32>
    %297 = vector.broadcast %256 : vector<1x512xf32> to vector<16x512xf32>
    %298 = arith.mulf %296, %297 : vector<16x512xf32>
    %299 = arith.addf %293, %298 : vector<16x512xf32>
    %c3_173 = arith.constant 3 : index
    %c2_174 = arith.constant 2 : index
    %c0_175 = arith.constant 0 : index
    %c0_176 = arith.constant 0 : index
    %300 = vector.load %arg1[%c3_173, %c2_174, %c0_175, %c0_176] : memref<4x4x16x1xf32, #tpu.memory_space<vmem>>, vector<1x1x16x1xf32>
    %301 = vector.shape_cast %300 : vector<1x1x16x1xf32> to vector<16x1xf32>
    %302 = vector.broadcast %301 : vector<16x1xf32> to vector<16x512xf32>
    %303 = vector.broadcast %268 : vector<1x512xf32> to vector<16x512xf32>
    %304 = arith.mulf %302, %303 : vector<16x512xf32>
    %305 = arith.addf %299, %304 : vector<16x512xf32>
    %c3_177 = arith.constant 3 : index
    %c3_178 = arith.constant 3 : index
    %c0_179 = arith.constant 0 : index
    %c0_180 = arith.constant 0 : index
    %306 = vector.load %arg1[%c3_177, %c3_178, %c0_179, %c0_180] : memref<4x4x16x1xf32, #tpu.memory_space<vmem>>, vector<1x1x16x1xf32>
    %307 = vector.shape_cast %306 : vector<1x1x16x1xf32> to vector<16x1xf32>
    %308 = vector.broadcast %307 : vector<16x1xf32> to vector<16x512xf32>
    %309 = vector.broadcast %280 : vector<1x512xf32> to vector<16x512xf32>
    %310 = arith.mulf %308, %309 : vector<16x512xf32>
    %311 = arith.addf %305, %310 : vector<16x512xf32>
    %cst_181 = arith.constant dense<0x7F800000> : vector<512xf32>
    %312 = vector.multi_reduction <minimumf>, %311, %cst_181 [0] : vector<16x512xf32> to vector<512xf32>
    %313 = vector.shape_cast %312 : vector<512xf32> to vector<1x512xf32>
    %314 = vector.broadcast %313 : vector<1x512xf32> to vector<16x512xf32>
    %315 = arith.cmpf ole, %311, %314 : vector<16x512xf32>
    %cst_182 = arith.constant 1.600000e+01 : f32
    %316 = vector.shape_cast %0 : vector<16x1xf32> to vector<16x1xf32>
    %317 = vector.broadcast %316 : vector<16x1xf32> to vector<16x512xf32>
    %318 = vector.broadcast %cst_182 : f32 to vector<16x512xf32>
    %319 = arith.select %315, %317, %318 : vector<16x512xi1>, vector<16x512xf32>
    %cst_183 = arith.constant dense<0x7F800000> : vector<512xf32>
    %320 = vector.multi_reduction <minimumf>, %319, %cst_183 [0] : vector<16x512xf32> to vector<512xf32>
    %321 = vector.shape_cast %320 : vector<512xf32> to vector<1x512xf32>
    %322 = vector.broadcast %0 : vector<16x1xf32> to vector<16x512xf32>
    %323 = vector.broadcast %321 : vector<1x512xf32> to vector<16x512xf32>
    %324 = arith.cmpf oeq, %322, %323 : vector<16x512xf32>
    %325 = arith.fptosi %321 : vector<1x512xf32> to vector<1x512xi32>
    %c3_184 = arith.constant 3 : index
    %c0_185 = arith.constant 0 : index
    %326 = vector.load %arg7[%c3_184, %c0_185] : memref<4x512xi32, #tpu.memory_space<vmem>>, vector<1x512xi32>
    tpu.vector_store %arg7[%c3_184, %c0_185], %325 {strides = array<i32>} : memref<4x512xi32, #tpu.memory_space<vmem>>, vector<1x512xi32>,
    %cst_186 = arith.constant 0.000000e+00 : f32
    %327 = vector.broadcast %cst_186 : f32 to vector<1x512xf32>
    %c3_187 = arith.constant 3 : index
    %c0_188 = arith.constant 0 : index
    %c0_189 = arith.constant 0 : index
    %c0_190 = arith.constant 0 : index
    %328 = vector.load %arg2[%c3_187, %c0_188, %c0_189, %c0_190] : memref<4x4x16x1xf32, #tpu.memory_space<vmem>>, vector<1x1x16x1xf32>
    %329 = vector.shape_cast %328 : vector<1x1x16x1xf32> to vector<16x1xf32>
    %cst_191 = arith.constant 0.000000e+00 : f32
    %330 = vector.shape_cast %329 : vector<16x1xf32> to vector<16x1xf32>
    %331 = vector.broadcast %330 : vector<16x1xf32> to vector<16x512xf32>
    %332 = vector.broadcast %cst_191 : f32 to vector<16x512xf32>
    %333 = arith.select %324, %331, %332 : vector<16x512xi1>, vector<16x512xf32>
    %cst_192 = arith.constant dense<0.000000e+00> : vector<512xf32>
    %334 = vector.multi_reduction <add>, %333, %cst_192 [0] : vector<16x512xf32> to vector<512xf32>
    %335 = vector.shape_cast %334 : vector<512xf32> to vector<1x512xf32>
    %336 = arith.subf %244, %335 : vector<1x512xf32>
    %337 = arith.mulf %336, %336 : vector<1x512xf32>
    %338 = arith.addf %327, %337 : vector<1x512xf32>
    %339 = arith.addf %247, %335 : vector<1x512xf32>
    %c3_193 = arith.constant 3 : index
    %c1_194 = arith.constant 1 : index
    %c0_195 = arith.constant 0 : index
    %c0_196 = arith.constant 0 : index
    %340 = vector.load %arg2[%c3_193, %c1_194, %c0_195, %c0_196] : memref<4x4x16x1xf32, #tpu.memory_space<vmem>>, vector<1x1x16x1xf32>
    %341 = vector.shape_cast %340 : vector<1x1x16x1xf32> to vector<16x1xf32>
    %cst_197 = arith.constant 0.000000e+00 : f32
    %342 = vector.shape_cast %341 : vector<16x1xf32> to vector<16x1xf32>
    %343 = vector.broadcast %342 : vector<16x1xf32> to vector<16x512xf32>
    %344 = vector.broadcast %cst_197 : f32 to vector<16x512xf32>
    %345 = arith.select %324, %343, %344 : vector<16x512xi1>, vector<16x512xf32>
    %cst_198 = arith.constant dense<0.000000e+00> : vector<512xf32>
    %346 = vector.multi_reduction <add>, %345, %cst_198 [0] : vector<16x512xf32> to vector<512xf32>
    %347 = vector.shape_cast %346 : vector<512xf32> to vector<1x512xf32>
    %348 = arith.subf %256, %347 : vector<1x512xf32>
    %349 = arith.mulf %348, %348 : vector<1x512xf32>
    %350 = arith.addf %338, %349 : vector<1x512xf32>
    %351 = arith.addf %259, %347 : vector<1x512xf32>
    %c3_199 = arith.constant 3 : index
    %c2_200 = arith.constant 2 : index
    %c0_201 = arith.constant 0 : index
    %c0_202 = arith.constant 0 : index
    %352 = vector.load %arg2[%c3_199, %c2_200, %c0_201, %c0_202] : memref<4x4x16x1xf32, #tpu.memory_space<vmem>>, vector<1x1x16x1xf32>
    %353 = vector.shape_cast %352 : vector<1x1x16x1xf32> to vector<16x1xf32>
    %cst_203 = arith.constant 0.000000e+00 : f32
    %354 = vector.shape_cast %353 : vector<16x1xf32> to vector<16x1xf32>
    %355 = vector.broadcast %354 : vector<16x1xf32> to vector<16x512xf32>
    %356 = vector.broadcast %cst_203 : f32 to vector<16x512xf32>
    %357 = arith.select %324, %355, %356 : vector<16x512xi1>, vector<16x512xf32>
    %cst_204 = arith.constant dense<0.000000e+00> : vector<512xf32>
    %358 = vector.multi_reduction <add>, %357, %cst_204 [0] : vector<16x512xf32> to vector<512xf32>
    %359 = vector.shape_cast %358 : vector<512xf32> to vector<1x512xf32>
    %360 = arith.subf %268, %359 : vector<1x512xf32>
    %361 = arith.mulf %360, %360 : vector<1x512xf32>
    %362 = arith.addf %350, %361 : vector<1x512xf32>
    %363 = arith.addf %271, %359 : vector<1x512xf32>
    %c3_205 = arith.constant 3 : index
    %c3_206 = arith.constant 3 : index
    %c0_207 = arith.constant 0 : index
    %c0_208 = arith.constant 0 : index
    %364 = vector.load %arg2[%c3_205, %c3_206, %c0_207, %c0_208] : memref<4x4x16x1xf32, #tpu.memory_space<vmem>>, vector<1x1x16x1xf32>
    %365 = vector.shape_cast %364 : vector<1x1x16x1xf32> to vector<16x1xf32>
    %cst_209 = arith.constant 0.000000e+00 : f32
    %366 = vector.shape_cast %365 : vector<16x1xf32> to vector<16x1xf32>
    %367 = vector.broadcast %366 : vector<16x1xf32> to vector<16x512xf32>
    %368 = vector.broadcast %cst_209 : f32 to vector<16x512xf32>
    %369 = arith.select %324, %367, %368 : vector<16x512xi1>, vector<16x512xf32>
    %cst_210 = arith.constant dense<0.000000e+00> : vector<512xf32>
    %370 = vector.multi_reduction <add>, %369, %cst_210 [0] : vector<16x512xf32> to vector<512xf32>
    %371 = vector.shape_cast %370 : vector<512xf32> to vector<1x512xf32>
    %372 = arith.subf %280, %371 : vector<1x512xf32>
    %373 = arith.mulf %372, %372 : vector<1x512xf32>
    %374 = arith.addf %362, %373 : vector<1x512xf32>
    %375 = arith.addf %283, %371 : vector<1x512xf32>
    %c3_211 = arith.constant 3 : index
    %c0_212 = arith.constant 0 : index
    %376 = vector.load %arg8[%c3_211, %c0_212] : memref<4x512xf32, #tpu.memory_space<vmem>>, vector<1x512xf32>
    tpu.vector_store %arg8[%c3_211, %c0_212], %374 {strides = array<i32>} : memref<4x512xf32, #tpu.memory_space<vmem>>, vector<1x512xf32>,
    %c0_213 = arith.constant 0 : index
    %c0_214 = arith.constant 0 : index
    %377 = vector.load %arg6[%c0_213, %c0_214] : memref<4x512xf32, #tpu.memory_space<vmem>>, vector<1x512xf32>
    tpu.vector_store %arg6[%c0_213, %c0_214], %339 {strides = array<i32>} : memref<4x512xf32, #tpu.memory_space<vmem>>, vector<1x512xf32>,
    %c1_215 = arith.constant 1 : index
    %c0_216 = arith.constant 0 : index
    %378 = vector.load %arg6[%c1_215, %c0_216] : memref<4x512xf32, #tpu.memory_space<vmem>>, vector<1x512xf32>
    tpu.vector_store %arg6[%c1_215, %c0_216], %351 {strides = array<i32>} : memref<4x512xf32, #tpu.memory_space<vmem>>, vector<1x512xf32>,
    %c2_217 = arith.constant 2 : index
    %c0_218 = arith.constant 0 : index
    %379 = vector.load %arg6[%c2_217, %c0_218] : memref<4x512xf32, #tpu.memory_space<vmem>>, vector<1x512xf32>
    tpu.vector_store %arg6[%c2_217, %c0_218], %363 {strides = array<i32>} : memref<4x512xf32, #tpu.memory_space<vmem>>, vector<1x512xf32>,
    %c3_219 = arith.constant 3 : index
    %c0_220 = arith.constant 0 : index
    %380 = vector.load %arg6[%c3_219, %c0_220] : memref<4x512xf32, #tpu.memory_space<vmem>>, vector<1x512xf32>
    tpu.vector_store %arg6[%c3_219, %c0_220], %375 {strides = array<i32>} : memref<4x512xf32, #tpu.memory_space<vmem>>, vector<1x512xf32>,
    return
  }
  func.func @transform_0(%arg0: i32) -> (i32, i32, i32, i32) {
    %c0_i32 = arith.constant 0 : i32
    %c0_i32_0 = arith.constant 0 : i32
    %c0_i32_1 = arith.constant 0 : i32
    %c0_i32_2 = arith.constant 0 : i32
    %c0_i32_3 = arith.constant 0 : i32
    return %c0_i32, %c0_i32_0, %c0_i32_1, %c0_i32_2 : i32, i32, i32, i32
  }
  func.func @transform_1(%arg0: i32) -> (i32, i32, i32, i32) {
    %c0_i32 = arith.constant 0 : i32
    %c0_i32_0 = arith.constant 0 : i32
    %c0_i32_1 = arith.constant 0 : i32
    %c0_i32_2 = arith.constant 0 : i32
    %c0_i32_3 = arith.constant 0 : i32
    return %c0_i32, %c0_i32_0, %c0_i32_1, %c0_i32_2 : i32, i32, i32, i32
  }
  func.func @transform_2(%arg0: i32) -> (i32, i32, i32) {
    %c0_i32 = arith.constant 0 : i32
    %c0_i32_0 = arith.constant 0 : i32
    %c0_i32_1 = arith.constant 0 : i32
    %c0_i32_2 = arith.constant 0 : i32
    return %c0_i32, %c0_i32_0, %c0_i32_1 : i32, i32, i32
  }
  func.func @transform_3(%arg0: i32) -> (i32, i32) {
    %c0_i32 = arith.constant 0 : i32
    %c0_i32_0 = arith.constant 0 : i32
    %c0_i32_1 = arith.constant 0 : i32
    return %c0_i32, %c0_i32_0 : i32, i32
  }
  func.func @transform_4(%arg0: i32) -> (i32, i32) {
    %c0_i32 = arith.constant 0 : i32
    %c0_i32_0 = arith.constant 0 : i32
    return %c0_i32, %arg0 : i32, i32
  }
  func.func @transform_5(%arg0: i32) -> (i32, i32) {
    %c0_i32 = arith.constant 0 : i32
    %c0_i32_0 = arith.constant 0 : i32
    return %c0_i32, %arg0 : i32, i32
  }
  func.func @transform_6(%arg0: i32) -> (i32, i32) {
    %c0_i32 = arith.constant 0 : i32
    %c0_i32_0 = arith.constant 0 : i32
    return %c0_i32, %arg0 : i32, i32
  }
  func.func @transform_7(%arg0: i32) -> (i32, i32) {
    %c0_i32 = arith.constant 0 : i32
    %c0_i32_0 = arith.constant 0 : i32
    return %c0_i32, %arg0 : i32, i32
  }
}

</mosaic_0001>

<bundles_post_ra>
// kernel: residual_vq_forward.1
= control target key start
LH: loop header
LB: loop body
LE: loop exit
PB: predicated region body
PF: predicated region fallthrough
CT: control target
= control target key end

     0   :  { %v2950_v0 = vmov 0   ;;  %v47_v61 = vlaneseq  ;;  %s4395_s2 = inlined_call_operand.vmem [shape: f32[4,16,1], index: 2, kind: input, shape index: {}]   ;;  %s4396_s0 = inlined_call_operand.vmem [shape: f32[4,4,16,1], index: 0, kind: input, shape index: {}]   ;;  %s4397_s3 = inlined_call_operand.vmem [shape: f32[16,1], index: 3, kind: input, shape index: {}]   ;;  %s4398_s1 = inlined_call_operand.vmem [shape: f32[4,4,16,1], index: 1, kind: input, shape index: {}]   ;;  %s4399_s4 = inlined_call_operand.vmem [shape: f32[4,512], index: 4, kind: input, shape index: {}]   ;;  %s4400_s6 = inlined_call_operand.vmem [shape: s32[4,512], index: 6, kind: output, shape index: {1}]   ;;  %s4401_s7 = inlined_call_operand.vmem [shape: f32[4,512], index: 7, kind: output, shape index: {2}]   ;;  %s4402_s5 = inlined_call_operand.vmem [shape: f32[4,512], index: 5, kind: output, shape index: {0}]  }
   0x1   :  { %2949 = vset.pattern.permute.xlu1 %v2950_v0  ;;  %2948 = vset.pattern.permute.xlu0 %v2950_v0  ;;  %v32_v1 = vld [vmem:[%s4395_s2] sm:$0xff]  ;;  %v33_v3 = vld [vmem:[%s4395_s2 + $0x8] sm:$0xff]  ;;  %v2840_v5 = vld [vmem:[%s4396_s0 + $0x18] sm:$0xff] }
   0x2   :  { %v34_v2 = vld [vmem:[%s4396_s0] sm:$0xff]  ;;  %77 = vperm.xlu1 %2949, %v32_v1   ;;  %v35_v4 = vld [vmem:[%s4396_s0 + $0x8] sm:$0xff]  ;;  %v2839_v6 = vld [vmem:[%s4396_s0 + $0x10] sm:$0xff]  ;;  %v3179_v0 = vshrl.u32 %v47_v61, 7 }
   0x3   :  { %38 = vperm.xlu0 %2948, %v34_v2   ;;  %v2842_v7 = vld [vmem:[%s4396_s0 + $0x28] sm:$0xff]  ;;  %v2841_v8 = vld [vmem:[%s4396_s0 + $0x20] sm:$0xff]  ;;  %v2844_v9 = vld [vmem:[%s4396_s0 + $0x38] sm:$0xff] }
   0x4   :  { %v2843_v10 = vld [vmem:[%s4396_s0 + $0x30] sm:$0xff]  ;;  %v24_v11 = vld [vmem:[%s4397_s3 + $0x8] sm:$0xff]  ;;  %v23_v12 = vld [vmem:[%s4397_s3] sm:$0xff] }
   0x5   :  { %v367_v13 = vld [vmem:[%s4398_s1 + $0x8] sm:$0xff]  ;;  %v366_v14 = vld [vmem:[%s4398_s1] sm:$0xff]  ;;  %v2846_v15 = vld [vmem:[%s4398_s1 + $0x18] sm:$0xff] }
   0x6   :  { %82 = vperm.xlu1 %2949, %v33_v3   ;;  %v2845_v16 = vld [vmem:[%s4398_s1 + $0x10] sm:$0xff]  ;;  %v2848_v17 = vld [vmem:[%s4398_s1 + $0x28] sm:$0xff]  ;;  %v2847_v18 = vld [vmem:[%s4398_s1 + $0x20] sm:$0xff]  ;;  %v3188_v3 = vsub.s32 0, %v3179_v0 }
   0x7   :  { %43 = vperm.xlu0 %2948, %v35_v4   ;;  %v2850_v19 = vld [vmem:[%s4398_s1 + $0x38] sm:$0xff]  ;;  %v2849_v20 = vld [vmem:[%s4398_s1 + $0x30] sm:$0xff]  ;;  %v2854_v21 = vld [vmem:[%s4396_s0 + $0x48] sm:$0xff]  ;;  %v3191_v4 = vsub.s32 1, %v3179_v0 }
   0x8   :  { %v2853_v22 = vld [vmem:[%s4396_s0 + $0x40] sm:$0xff]  ;;  %v2852_v23 = vld [vmem:[%s4395_s2 + $0x18] sm:$0xff]  ;;  %v2851_v24 = vld [vmem:[%s4395_s2 + $0x10] sm:$0xff] }
   0x9   :  { %v2856_v25 = vld [vmem:[%s4396_s0 + $0x58] sm:$0xff]  ;;  %v2855_v26 = vld [vmem:[%s4396_s0 + $0x50] sm:$0xff]  ;;  %v2858_v27 = vld [vmem:[%s4396_s0 + $0x68] sm:$0xff] }
   0xa   :  { %103 = vperm.xlu1 %2949, %v2840_v5   ;;  %v2857_v28 = vld [vmem:[%s4396_s0 + $0x60] sm:$0xff]  ;;  %v2860_v29 = vld [vmem:[%s4396_s0 + $0x78] sm:$0xff]  ;;  %v2859_v30 = vld [vmem:[%s4396_s0 + $0x70] sm:$0xff]  ;;  %v3194_v5 = vsub.s32 2, %v3179_v0 }
   0xb   :  { %98 = vperm.xlu0 %2948, %v2839_v6   ;;  %v2863_v31 = vld [vmem:[%s4398_s1 + $0x48] sm:$0xff]  ;;  %v2862_v32 = vld [vmem:[%s4398_s1 + $0x40] sm:$0xff]  ;;  %v2865_v33 = vld [vmem:[%s4398_s1 + $0x58] sm:$0xff]  ;;  %v3197_v6 = vsub.s32 3, %v3179_v0 }
   0xc   :  { %v2864_v34 = vld [vmem:[%s4398_s1 + $0x50] sm:$0xff]  ;;  %v2867_v35 = vld [vmem:[%s4398_s1 + $0x68] sm:$0xff]  ;;  %v2866_v36 = vld [vmem:[%s4398_s1 + $0x60] sm:$0xff] }
   0xd   :  { %v2869_v37 = vld [vmem:[%s4398_s1 + $0x78] sm:$0xff]  ;;  %v2868_v38 = vld [vmem:[%s4398_s1 + $0x70] sm:$0xff]  ;;  %v2874_v39 = vld [vmem:[%s4396_s0 + $0x88] sm:$0xff] }
   0xe   :  { %153 = vperm.xlu1 %2949, %v2842_v7   ;;  %v2873_v40 = vld [vmem:[%s4396_s0 + $0x80] sm:$0xff]  ;;  %v2872_v41 = vld [vmem:[%s4395_s2 + $0x28] sm:$0xff]  ;;  %v2876_v43 = vld [vmem:[%s4396_s0 + $0x98] sm:$0xff] }
   0xf   :  { %148 = vperm.xlu0 %2948, %v2841_v8   ;;  %v2871_v42 = vld [vmem:[%s4395_s2 + $0x20] sm:$0xff]  ;;  %v2875_v44 = vld [vmem:[%s4396_s0 + $0x90] sm:$0xff]  ;;  %v2878_v45 = vld [vmem:[%s4396_s0 + $0xa8] sm:$0xff] }
  0x10   :  { %v2877_v46 = vld [vmem:[%s4396_s0 + $0xa0] sm:$0xff]  ;;  %v2880_v47 = vld [vmem:[%s4396_s0 + $0xb8] sm:$0xff]  ;;  %v2879_v48 = vld [vmem:[%s4396_s0 + $0xb0] sm:$0xff] }
  0x11   :  { %v2883_v49 = vld [vmem:[%s4398_s1 + $0x88] sm:$0xff]  ;;  %v2882_v50 = vld [vmem:[%s4398_s1 + $0x80] sm:$0xff]  ;;  %v2885_v51 = vld [vmem:[%s4398_s1 + $0x98] sm:$0xff] }
  0x12   :  { %203 = vperm.xlu1 %2949, %v2844_v9   ;;  %v2884_v52 = vld [vmem:[%s4398_s1 + $0x90] sm:$0xff]  ;;  %v2887_v53 = vld [vmem:[%s4398_s1 + $0xa8] sm:$0xff]  ;;  %v2886_v54 = vld [vmem:[%s4398_s1 + $0xa0] sm:$0xff] }
  0x13   :  { %198 = vperm.xlu0 %2948, %v2843_v10   ;;  %v2889_v55 = vld [vmem:[%s4398_s1 + $0xb8] sm:$0xff]  ;;  %v2888_v56 = vld [vmem:[%s4398_s1 + $0xb0] sm:$0xff]  ;;  %v2894_v57 = vld [vmem:[%s4396_s0 + $0xc8] sm:$0xff] }
  0x14   :  { %v2893_v58 = vld [vmem:[%s4396_s0 + $0xc0] sm:$0xff]  ;;  %v2892_v59 = vld [vmem:[%s4395_s2 + $0x38] sm:$0xff]  ;;  %v2891_v60 = vld [vmem:[%s4395_s2 + $0x30] sm:$0xff] }
  0x15   :  { %v2896_v62 = vld [vmem:[%s4396_s0 + $0xd8] sm:$0xff]  ;;  %v2895_v63 = vld [vmem:[%s4396_s0 + $0xd0] sm:$0xff]  ;;  %v2898_v1 = vld [vmem:[%s4396_s0 + $0xe8] sm:$0xff] }
  0x16   :  { %286 = vperm.xlu1 %2949, %v24_v11   ;;  %v2897_v2 = vld [vmem:[%s4396_s0 + $0xe0] sm:$0xff]  ;;  %v2900_v8 = vld [vmem:[%s4396_s0 + $0xf8] sm:$0xff] }
  0x17   :  { %281 = vperm.xlu0 %2948, %v23_v12   ;;  %v3202_v7 = vld [vmem:[%s4399_s4] ss:$4 sm:$0xf] }
  0x18   :  { %v50_v9 = vrot.slane %v3202_v7, %v3188_v3  ;;  %v54_v10 = vrot.slane %v3202_v7, %v3191_v4  ;;  %v58_v11 = vrot.slane %v3202_v7, %v3194_v5  ;;  %v62_v12 = vrot.slane %v3202_v7, %v3197_v6 }
  0x1a   :  { %375 = vperm.xlu1 %2949, %v367_v13   ;;  %v2899_v13 = vld [vmem:[%s4396_s0 + $0xf0] sm:$0xff] }
  0x1b   :  { %370 = vperm.xlu0 %2948, %v366_v14   ;;  %v3221_v14 = vld [vmem:[%s4399_s4 + $0x1] ss:$4 sm:$0xf] }
  0x1e   :  { %460 = vperm.xlu1 %2949, %v2846_v15  }
  0x1f   :  { %455 = vperm.xlu0 %2948, %v2845_v16  }
  0x22   :  { %545 = vperm.xlu1 %2949, %v2848_v17   ;;  %v3226_v17 = vld [vmem:[%s4399_s4 + $0x2] ss:$4 sm:$0xf] }
  0x23   :  { %540 = vperm.xlu0 %2948, %v2847_v18   ;;  %v2903_v18 = vld [vmem:[%s4398_s1 + $0xc8] sm:$0xff] }
  0x26   :  { %630 = vperm.xlu1 %2949, %v2850_v19   ;;  %v110_v19 = vrot.slane %v3221_v14, %v3188_v3 }
  0x27   :  { %625 = vperm.xlu0 %2948, %v2849_v20   ;;  %v114_v20 = vrot.slane %v3221_v14, %v3191_v4 }
  0x2a   :  { %719 = vperm.xlu1 %2949, %v2854_v21   ;;  %v118_v21 = vrot.slane %v3221_v14, %v3194_v5 }
  0x2b   :  { %714 = vperm.xlu0 %2948, %v2853_v22   ;;  %v122_v22 = vrot.slane %v3221_v14, %v3197_v6 }
  0x2e   :  { %758 = vperm.xlu1 %2949, %v2852_v23  }
  0x2f   :  { %753 = vperm.xlu0 %2948, %v2851_v24  }
  0x32   :  { %779 = vperm.xlu1 %2949, %v2856_v25  }
  0x33   :  { %774 = vperm.xlu0 %2948, %v2855_v26  }
  0x36   :  { %829 = vperm.xlu1 %2949, %v2858_v27   ;;  %v2902_v27 = vld [vmem:[%s4398_s1 + $0xc0] sm:$0xff] }
  0x37   :  { %824 = vperm.xlu0 %2948, %v2857_v28   ;;  %v3245_v28 = vld [vmem:[%s4399_s4 + $0x3] ss:$4 sm:$0xf] }
  0x3a   :  { %879 = vperm.xlu1 %2949, %v2860_v29  }
  0x3b   :  { %874 = vperm.xlu0 %2948, %v2859_v30  }
  0x3e   :  { %1039 = vperm.xlu1 %2949, %v2863_v31   ;;  %v160_v31 = vrot.slane %v3226_v17, %v3188_v3 }
  0x3f   :  { %1034 = vperm.xlu0 %2948, %v2862_v32   ;;  %v164_v32 = vrot.slane %v3226_v17, %v3191_v4 }
  0x42   :  { %1124 = vperm.xlu1 %2949, %v2865_v33   ;;  %v168_v33 = vrot.slane %v3226_v17, %v3194_v5 }
  0x43   :  { %1119 = vperm.xlu0 %2948, %v2864_v34   ;;  %v172_v34 = vrot.slane %v3226_v17, %v3197_v6 }
  0x46   :  { %1209 = vperm.xlu1 %2949, %v2867_v35  }
  0x47   :  { %1204 = vperm.xlu0 %2948, %v2866_v36  }
  0x4a   :  { %1294 = vperm.xlu1 %2949, %v2869_v37  }
  0x4b   :  { %1289 = vperm.xlu0 %2948, %v2868_v38  }
  0x4e   :  { %1384 = vperm.xlu1 %2949, %v2874_v39   ;;  %v2905_v39 = vld [vmem:[%s4398_s1 + $0xd8] sm:$0xff] }
  0x4f   :  { %1379 = vperm.xlu0 %2948, %v2873_v40   ;;  %v3260_v40 = vrot.slane %v3245_v28, %v3188_v3 }
  0x52   :  { %1423 = vperm.xlu1 %2949, %v2872_v41   ;;  %v3264_v41 = vrot.slane %v3245_v28, %v3191_v4 }
  0x53   :  { %1418 = vperm.xlu0 %2948, %v2871_v42   ;;  %v3268_v42 = vrot.slane %v3245_v28, %v3194_v5 }
  0x56   :  { %1444 = vperm.xlu1 %2949, %v2876_v43   ;;  %v3272_v43 = vrot.slane %v3245_v28, %v3197_v6 }
  0x57   :  { %1439 = vperm.xlu0 %2948, %v2875_v44  }
  0x5a   :  { %1494 = vperm.xlu1 %2949, %v2878_v45  }
  0x5b   :  { %1489 = vperm.xlu0 %2948, %v2877_v46  }
  0x5e   :  { %1544 = vperm.xlu1 %2949, %v2880_v47  }
  0x5f   :  { %1539 = vperm.xlu0 %2948, %v2879_v48   ;;  %v2904_v48 = vld [vmem:[%s4398_s1 + $0xd0] sm:$0xff] }
  0x62   :  { %1704 = vperm.xlu1 %2949, %v2883_v49  }
  0x63   :  { %1699 = vperm.xlu0 %2948, %v2882_v50  }
  0x66   :  { %1789 = vperm.xlu1 %2949, %v2885_v51  }
  0x67   :  { %1784 = vperm.xlu0 %2948, %v2884_v52  }
  0x6a   :  { %1874 = vperm.xlu1 %2949, %v2887_v53  }
  0x6b   :  { %1869 = vperm.xlu0 %2948, %v2886_v54  }
  0x6e   :  { %1959 = vperm.xlu1 %2949, %v2889_v55  }
  0x6f   :  { %1954 = vperm.xlu0 %2948, %v2888_v56  }
  0x72   :  { %2049 = vperm.xlu1 %2949, %v2894_v57  }
  0x73   :  { %2044 = vperm.xlu0 %2948, %v2893_v58  }
  0x76   :  { %2088 = vperm.xlu1 %2949, %v2892_v59  }
  0x77   :  { %2083 = vperm.xlu0 %2948, %v2891_v60  }
  0x7a   :  { %2109 = vperm.xlu1 %2949, %v2896_v62  }
  0x7b   :  { %2104 = vperm.xlu0 %2948, %v2895_v63  }
  0x7e   :  { %2159 = vperm.xlu1 %2949, %v2898_v1   ;;  %v2907_v1 = vld [vmem:[%s4398_s1 + $0xe8] sm:$0xff] }
  0x7f   :  { %2154 = vperm.xlu0 %2948, %v2897_v2  }
  0x81   :  { %v78_v15 = vpop.permute.xlu1 %77 }
  0x82   :  { %v39_v16 = vpop.permute.xlu0 %38  ;;  %2209 = vperm.xlu1 %2949, %v2900_v8  }
  0x83   :  { %2204 = vperm.xlu0 %2948, %v2899_v13   ;;  %v67_v23 = vmul.f32 %v50_v9, %v39_v16  ;;  %v68_v24 = vmul.f32 %v54_v10, %v39_v16  ;;  %v69_v25 = vmul.f32 %v58_v11, %v39_v16  ;;  %v70_v26 = vmul.f32 %v62_v12, %v39_v16 }
  0x85   :  { %v83_v29 = vpop.permute.xlu1 %82  ;;  %v85_v44 = vadd.f32 %v78_v15, %v67_v23  ;;  %v86_v45 = vadd.f32 %v78_v15, %v68_v24  ;;  %v87_v46 = vadd.f32 %v78_v15, %v69_v25  ;;  %v88_v47 = vadd.f32 %v78_v15, %v70_v26 }
  0x86   :  { %v44_v30 = vpop.permute.xlu0 %43  ;;  %2369 = vperm.xlu1 %2949, %v2903_v18  }
  0x87   :  { %v71_v35 = vmul.f32 %v50_v9, %v44_v30  ;;  %v72_v36 = vmul.f32 %v54_v10, %v44_v30  ;;  %v73_v37 = vmul.f32 %v58_v11, %v44_v30  ;;  %v74_v38 = vmul.f32 %v62_v12, %v44_v30  ;;  %2364 = vperm.xlu0 %2948, %v2902_v27   ;;  %v2906_v11 = vld [vmem:[%s4398_s1 + $0xe0] sm:$0xff] }
  0x89   :  { %v89_v49 = vadd.f32 %v83_v29, %v71_v35  ;;  %v90_v50 = vadd.f32 %v83_v29, %v72_v36  ;;  %v91_v51 = vadd.f32 %v83_v29, %v73_v37  ;;  %v92_v52 = vadd.f32 %v83_v29, %v74_v38  ;;  %v104_v53 = vpop.permute.xlu1 %103  ;;  %v2909_v29 = vld [vmem:[%s4398_s1 + $0xf8] sm:$0xff]  ;;  %v2908_v38 = vld [vmem:[%s4398_s1 + $0xf0] sm:$0xff] }
  0x8a   :  { %v99_v54 = vpop.permute.xlu0 %98  ;;  %v131_v55 = vmul.f32 %v110_v19, %v104_v53  ;;  %v132_v56 = vmul.f32 %v114_v20, %v104_v53  ;;  %v133_v57 = vmul.f32 %v118_v21, %v104_v53  ;;  %v134_v58 = vmul.f32 %v122_v22, %v104_v53  ;;  %2454 = vperm.xlu1 %2949, %v2905_v39  }
  0x8b   :  { %v127_v59 = vmul.f32 %v110_v19, %v99_v54  ;;  %v128_v60 = vmul.f32 %v114_v20, %v99_v54  ;;  %v129_v62 = vmul.f32 %v118_v21, %v99_v54  ;;  %v130_v63 = vmul.f32 %v122_v22, %v99_v54  ;;  %2449 = vperm.xlu0 %2948, %v2904_v48  }
  0x8c   :  { %v139_v2 = vadd.f32 %v131_v55, %v89_v49  ;;  %v140_v8 = vadd.f32 %v132_v56, %v90_v50  ;;  %v141_v9 = vadd.f32 %v133_v57, %v91_v51  ;;  %v142_v10 = vadd.f32 %v134_v58, %v92_v52 }
  0x8d   :  { %v135_v12 = vadd.f32 %v127_v59, %v85_v44  ;;  %v136_v13 = vadd.f32 %v128_v60, %v86_v45  ;;  %v137_v15 = vadd.f32 %v129_v62, %v87_v46  ;;  %v138_v16 = vadd.f32 %v130_v63, %v88_v47  ;;  %v154_v18 = vpop.permute.xlu1 %153 }
  0x8e   :  { %v149_v19 = vpop.permute.xlu0 %148  ;;  %v181_v20 = vmul.f32 %v160_v31, %v154_v18  ;;  %v182_v21 = vmul.f32 %v164_v32, %v154_v18  ;;  %v183_v22 = vmul.f32 %v168_v33, %v154_v18  ;;  %v184_v23 = vmul.f32 %v172_v34, %v154_v18  ;;  %2539 = vperm.xlu1 %2949, %v2907_v1  }
  0x8f   :  { %v177_v24 = vmul.f32 %v160_v31, %v149_v19  ;;  %v178_v25 = vmul.f32 %v164_v32, %v149_v19  ;;  %v179_v26 = vmul.f32 %v168_v33, %v149_v19  ;;  %v180_v27 = vmul.f32 %v172_v34, %v149_v19  ;;  %2534 = vperm.xlu0 %2948, %v2906_v11  }
  0x90   :  { %v189_v30 = vadd.f32 %v181_v20, %v139_v2  ;;  %v190_v35 = vadd.f32 %v182_v21, %v140_v8  ;;  %v191_v36 = vadd.f32 %v183_v22, %v141_v9  ;;  %v192_v37 = vadd.f32 %v184_v23, %v142_v10 }
  0x91   :  { %v185_v39 = vadd.f32 %v177_v24, %v135_v12  ;;  %v186_v44 = vadd.f32 %v178_v25, %v136_v13  ;;  %v187_v45 = vadd.f32 %v179_v26, %v137_v15  ;;  %v188_v31 = vadd.f32 %v180_v27, %v138_v16  ;;  %v204_v32 = vpop.permute.xlu1 %203 }
  0x92   :  { %v199_v33 = vpop.permute.xlu0 %198  ;;  %v231_v34 = vmul.f32 %v3260_v40, %v204_v32  ;;  %v232_v46 = vmul.f32 %v3264_v41, %v204_v32  ;;  %v233_v47 = vmul.f32 %v3268_v42, %v204_v32  ;;  %v234_v48 = vmul.f32 %v3272_v43, %v204_v32  ;;  %2624 = vperm.xlu1 %2949, %v2909_v29  }
  0x93   :  { %v227_v49 = vmul.f32 %v3260_v40, %v199_v33  ;;  %v228_v50 = vmul.f32 %v3264_v41, %v199_v33  ;;  %v229_v51 = vmul.f32 %v3268_v42, %v199_v33  ;;  %v230_v52 = vmul.f32 %v3272_v43, %v199_v33  ;;  %2619 = vperm.xlu0 %2948, %v2908_v38  }
  0x94   :  { %v239_v53 = vadd.f32 %v231_v34, %v189_v30  ;;  %v240_v54 = vadd.f32 %v232_v46, %v190_v35  ;;  %v241_v55 = vadd.f32 %v233_v47, %v191_v36  ;;  %v242_v56 = vadd.f32 %v234_v48, %v192_v37 }
  0x95   :  { %v235_v57 = vadd.f32 %v227_v49, %v185_v39  ;;  %v236_v58 = vadd.f32 %v228_v50, %v186_v44  ;;  %v237_v59 = vadd.f32 %v229_v51, %v187_v45  ;;  %v238_v60 = vadd.f32 %v230_v52, %v188_v31  ;;  %v3299_v36 = vpop.permute.xlu1 %286 }
  0x96   :  { %v3297_v35 = vpop.permute.xlu0 %281 }
  0x97   :  { %v243_v62 = vmin.f32 %v235_v57, %v239_v53  ;;  %v250_v63 = vmin.f32 %v236_v58, %v240_v54  ;;  %v257_v1 = vmin.f32 %v237_v59, %v241_v55  ;;  %v264_v2 = vmin.f32 %v238_v60, %v242_v56 }
  0x99   :  { %v244_v40 = vrot.slane %v243_v62, 4  ;;  %v251_v8 = vrot.slane %v250_v63, 4  ;;  %v258_v41 = vrot.slane %v257_v1, 4  ;;  %v265_v9 = vrot.slane %v264_v2, 4 }
  0x9b   :  { %v245_v42 = vmin.f32 %v243_v62, %v244_v40  ;;  %v252_v10 = vmin.f32 %v250_v63, %v251_v8  ;;  %v259_v43 = vmin.f32 %v257_v1, %v258_v41  ;;  %v266_v11 = vmin.f32 %v264_v2, %v265_v9 }
  0x9d   :  { %v246_v12 = vrot.slane %v245_v42, 2  ;;  %v253_v13 = vrot.slane %v252_v10, 2  ;;  %v260_v15 = vrot.slane %v259_v43, 2  ;;  %v267_v16 = vrot.slane %v266_v11, 2 }
  0x9f   :  { %v247_v18 = vmin.f32 %v245_v42, %v246_v12  ;;  %v254_v19 = vmin.f32 %v252_v10, %v253_v13  ;;  %v261_v20 = vmin.f32 %v259_v43, %v260_v15  ;;  %v268_v21 = vmin.f32 %v266_v11, %v267_v16  ;;  %v376_v11 = vpop.permute.xlu1 %375 }
  0xa1   :  { %v248_v22 = vrot.slane %v247_v18, 1  ;;  %v255_v23 = vrot.slane %v254_v19, 1  ;;  %v262_v24 = vrot.slane %v261_v20, 1  ;;  %v269_v25 = vrot.slane %v268_v21, 1 }
  0xa3   :  { %v249_v26 = vmin.f32 %v247_v18, %v248_v22  ;;  %v256_v27 = vmin.f32 %v254_v19, %v255_v23  ;;  %v263_v29 = vmin.f32 %v261_v20, %v262_v24  ;;  %v270_v30 = vmin.f32 %v268_v21, %v269_v25  ;;  %v371_v19 = vpop.permute.xlu0 %370 }
  0xa5   :  { %vm271_vm0 = vcmp.le.f32.partialorder %v235_v57, %v249_v26  ;;  %vm272_vm1 = vcmp.le.f32.partialorder %v236_v58, %v256_v27  ;;  %vm273_vm2 = vcmp.le.f32.partialorder %v237_v59, %v263_v29  ;;  %vm274_vm3 = vcmp.le.f32.partialorder %v238_v60, %v270_v30 }
  0xa6   :  { %vm275_vm4 = vcmp.le.f32.partialorder %v239_v53, %v249_v26  ;;  %vm276_vm5 = vcmp.le.f32.partialorder %v240_v54, %v256_v27  ;;  %vm277_vm6 = vcmp.le.f32.partialorder %v241_v55, %v263_v29  ;;  %vm278_vm7 = vcmp.le.f32.partialorder %v242_v56, %v270_v30 }
  0xa7   :  { %v289_v37 = vsel %vm271_vm0, %v3297_v35, 16.0  ;;  %v290_v38 = vsel %vm272_vm1, %v3297_v35, 16.0  ;;  %v291_v39 = vsel %vm273_vm2, %v3297_v35, 16.0  ;;  %v292_v44 = vsel %vm274_vm3, %v3297_v35, 16.0 }
  0xa8   :  { %v293_v45 = vsel %vm275_vm4, %v3299_v36, 16.0  ;;  %v294_v31 = vsel %vm276_vm5, %v3299_v36, 16.0  ;;  %v295_v32 = vsel %vm277_vm6, %v3299_v36, 16.0  ;;  %v296_v33 = vsel %vm278_vm7, %v3299_v36, 16.0 }
  0xa9   :  { %v297_v34 = vmin.f32 %v289_v37, %v293_v45  ;;  %v304_v46 = vmin.f32 %v290_v38, %v294_v31  ;;  %v311_v47 = vmin.f32 %v291_v39, %v295_v32  ;;  %v318_v48 = vmin.f32 %v292_v44, %v296_v33  ;;  %v461_v38 = vpop.permute.xlu1 %460 }
  0xaa   :  { %v2951_v57 = vmov 1966171168   ;;  %vm3415_vm0 = vcmp.lt.s32.totalorder %v47_v61, 512 }
  0xab   :  { %v298_v49 = vrot.slane %v297_v34, 4  ;;  %v305_v50 = vrot.slane %v304_v46, 4  ;;  %v312_v51 = vrot.slane %v311_v47, 4  ;;  %v319_v52 = vrot.slane %v318_v48, 4 }
  0xac   :  { %v340_v58 = vunpack.c.l.s4 %v2951_v57 }
  0xad   :  { %v299_v53 = vmin.f32 %v297_v34, %v298_v49  ;;  %v306_v54 = vmin.f32 %v304_v46, %v305_v50  ;;  %v313_v55 = vmin.f32 %v311_v47, %v312_v51  ;;  %v320_v56 = vmin.f32 %v318_v48, %v319_v52  ;;  %v456_v47 = vpop.permute.xlu0 %455 }
  0xae   :  { %v341_v41 = vunpack.c.0.s8 %v340_v58 }
  0xaf   :  { %v300_v59 = vrot.slane %v299_v53, 2  ;;  %v307_v60 = vrot.slane %v306_v54, 2  ;;  %v314_v62 = vrot.slane %v313_v55, 2  ;;  %v321_v63 = vrot.slane %v320_v56, 2 }
  0xb0   :  { %v3318_v18 = vsub.s32 %v341_v41, %v3179_v0 }
  0xb1   :  { %v301_v1 = vmin.f32 %v299_v53, %v300_v59  ;;  %v308_v2 = vmin.f32 %v306_v54, %v307_v60  ;;  %v315_v40 = vmin.f32 %v313_v55, %v314_v62  ;;  %v322_v8 = vmin.f32 %v320_v56, %v321_v63 }
  0xb3   :  { %v302_v9 = vrot.slane %v301_v1, 1  ;;  %v309_v42 = vrot.slane %v308_v2, 1  ;;  %v316_v10 = vrot.slane %v315_v40, 1  ;;  %v323_v43 = vrot.slane %v322_v8, 1 }
  0xb5   :  { %v3309_v12 = vmin.f32 %v301_v1, %v302_v9  ;;  %v3311_v13 = vmin.f32 %v308_v2, %v309_v42  ;;  %v3313_v15 = vmin.f32 %v315_v40, %v316_v10  ;;  %v3315_v16 = vmin.f32 %v322_v8, %v323_v43 }
  0xb7   :  { %vm329_vm8 = vcmp.eq.f32.partialorder %v3299_v36, %v3309_v12  ;;  %vm330_vm9 = vcmp.eq.f32.partialorder %v3299_v36, %v3311_v13  ;;  %vm331_vm10 = vcmp.eq.f32.partialorder %v3299_v36, %v3313_v15  ;;  %vm332_vm11 = vcmp.eq.f32.partialorder %v3299_v36, %v3315_v16 }
  0xb8   :  { %v382_v20 = vsel %vm329_vm8, %v376_v11, 0.0  ;;  %v383_v0 = vsel %vm330_vm9, %v376_v11, 0.0  ;;  %v384_v21 = vsel %vm331_vm10, %v376_v11, 0.0  ;;  %v385_v22 = vsel %vm332_vm11, %v376_v11, 0.0 }
  0xb9   :  { %vm325_vm12 = vcmp.eq.f32.partialorder %v3297_v35, %v3309_v12  ;;  %vm326_vm13 = vcmp.eq.f32.partialorder %v3297_v35, %v3311_v13  ;;  %vm327_vm14 = vcmp.eq.f32.partialorder %v3297_v35, %v3313_v15  ;;  %vm328_vm15 = vcmp.eq.f32.partialorder %v3297_v35, %v3315_v16 }
  0xba   :  { %v378_v23 = vsel %vm325_vm12, %v371_v19, 0.0  ;;  %v379_v24 = vsel %vm326_vm13, %v371_v19, 0.0  ;;  %v380_v25 = vsel %vm327_vm14, %v371_v19, 0.0  ;;  %v381_v26 = vsel %vm328_vm15, %v371_v19, 0.0 }
  0xbb   :  { %v386_v27 = vadd.f32 %v382_v20, %v378_v23  ;;  %v393_v29 = vadd.f32 %v383_v0, %v379_v24  ;;  %v400_v30 = vadd.f32 %v384_v21, %v380_v25  ;;  %v407_v37 = vadd.f32 %v385_v22, %v381_v26 }
  0xbc   :  { %v467_v39 = vsel %vm329_vm8, %v461_v38, 0.0  ;;  %v468_v44 = vsel %vm330_vm9, %v461_v38, 0.0  ;;  %v469_v45 = vsel %vm331_vm10, %v461_v38, 0.0  ;;  %v470_v31 = vsel %vm332_vm11, %v461_v38, 0.0 }
  0xbd   :  { %v387_v32 = vrot.slane %v386_v27, 4  ;;  %v394_v33 = vrot.slane %v393_v29, 4  ;;  %v401_v34 = vrot.slane %v400_v30, 4  ;;  %v408_v46 = vrot.slane %v407_v37, 4 }
  0xbe   :  { %v463_v48 = vsel %vm325_vm12, %v456_v47, 0.0  ;;  %v464_v49 = vsel %vm326_vm13, %v456_v47, 0.0  ;;  %v465_v50 = vsel %vm327_vm14, %v456_v47, 0.0  ;;  %v466_v51 = vsel %vm328_vm15, %v456_v47, 0.0 }
  0xbf   :  { %v388_v52 = vadd.f32 %v387_v32, %v386_v27  ;;  %v395_v53 = vadd.f32 %v394_v33, %v393_v29  ;;  %v402_v54 = vadd.f32 %v401_v34, %v400_v30  ;;  %v409_v55 = vadd.f32 %v408_v46, %v407_v37 }
  0xc0   :  { %v471_v56 = vadd.f32 %v467_v39, %v463_v48  ;;  %v478_v57 = vadd.f32 %v468_v44, %v464_v49  ;;  %v485_v58 = vadd.f32 %v469_v45, %v465_v50  ;;  %v492_v59 = vadd.f32 %v470_v31, %v466_v51 }
  0xc1   :  { %v389_v60 = vrot.slane %v388_v52, 2  ;;  %v396_v62 = vrot.slane %v395_v53, 2  ;;  %v403_v63 = vrot.slane %v402_v54, 2  ;;  %v410_v1 = vrot.slane %v409_v55, 2 }
  0xc2   :  { %v472_v2 = vrot.slane %v471_v56, 4  ;;  %v479_v40 = vrot.slane %v478_v57, 4  ;;  %v486_v8 = vrot.slane %v485_v58, 4  ;;  %v493_v41 = vrot.slane %v492_v59, 4 }
  0xc3   :  { %v390_v9 = vadd.f32 %v389_v60, %v388_v52  ;;  %v397_v42 = vadd.f32 %v396_v62, %v395_v53  ;;  %v404_v10 = vadd.f32 %v403_v63, %v402_v54  ;;  %v411_v43 = vadd.f32 %v410_v1, %v409_v55  ;;  %v546_v62 = vpop.permute.xlu1 %545 }
  0xc4   :  { %v473_v11 = vadd.f32 %v472_v2, %v471_v56  ;;  %v480_v19 = vadd.f32 %v479_v40, %v478_v57  ;;  %v487_v20 = vadd.f32 %v486_v8, %v485_v58  ;;  %v494_v0 = vadd.f32 %v493_v41, %v492_v59 }
  0xc5   :  { %v391_v21 = vrot.slane %v390_v9, 1  ;;  %v398_v22 = vrot.slane %v397_v42, 1  ;;  %v405_v23 = vrot.slane %v404_v10, 1  ;;  %v412_v24 = vrot.slane %v411_v43, 1 }
  0xc6   :  { %v474_v25 = vrot.slane %v473_v11, 2  ;;  %v481_v26 = vrot.slane %v480_v19, 2  ;;  %v488_v27 = vrot.slane %v487_v20, 2  ;;  %v495_v29 = vrot.slane %v494_v0, 2 }
  0xc7   :  { %v3384_v30 = vadd.f32 %v391_v21, %v390_v9  ;;  %v3386_v37 = vadd.f32 %v398_v22, %v397_v42  ;;  %v3388_v38 = vadd.f32 %v405_v23, %v404_v10  ;;  %v3390_v39 = vadd.f32 %v412_v24, %v411_v43  ;;  %v541_v22 = vpop.permute.xlu0 %540 }
  0xc8   :  { %v475_v44 = vadd.f32 %v474_v25, %v473_v11  ;;  %v482_v45 = vadd.f32 %v481_v26, %v480_v19  ;;  %v489_v31 = vadd.f32 %v488_v27, %v487_v20  ;;  %v496_v32 = vadd.f32 %v495_v29, %v494_v0 }
  0xc9   :  { %v418_v33 = vcombine.low %v3384_v30, %v3386_v37  ;;  %v419_v34 = vcombine.low %v3388_v38, %v3390_v39  ;;  %v2914_v46 = vtrunc.f32 %v3309_v12  ;;  %v2916_v47 = vtrunc.f32 %v3311_v13 }
  0xca   :  { %v476_v48 = vrot.slane %v475_v44, 1  ;;  %v483_v49 = vrot.slane %v482_v45, 1  ;;  %v490_v50 = vrot.slane %v489_v31, 1  ;;  %v497_v51 = vrot.slane %v496_v32, 1 }
  0xcb   :  { %v426_v52 = vrot.slane %v418_v33, %v3318_v18  ;;  %v433_v53 = vrot.slane %v419_v34, %v3318_v18  ;;  %v2915_v54 = vcvt.f32.s32 %v2914_v46  ;;  %v2917_v55 = vcvt.f32.s32 %v2916_v47  ;;  %v631_v34 = vpop.permute.xlu1 %630 }
  0xcc   :  { %v3400_v56 = vadd.f32 %v476_v48, %v475_v44  ;;  %v3402_v57 = vadd.f32 %v483_v49, %v482_v45  ;;  %v3404_v58 = vadd.f32 %v490_v50, %v489_v31  ;;  %v3406_v59 = vadd.f32 %v497_v51, %v496_v32 }
  0xcd   :  { %v434_v60 = vcombine.low %v426_v52, %v433_v53  ;;  %v2918_v63 = vtrunc.f32 %v3313_v15  ;;  %v2920_v1 = vtrunc.f32 %v3315_v16  ;;  %v337_v2 = vcombine.low %v2915_v54, %v2917_v55 }
  0xce   :  { %v503_v40 = vcombine.low %v3400_v56, %v3402_v57  ;;  %v504_v8 = vcombine.low %v3404_v58, %v3406_v59  ;;  %v552_v9 = vsel %vm329_vm8, %v546_v62, 0.0  ;;  %v553_v42 = vsel %vm330_vm9, %v546_v62, 0.0 }
  0xcf   :  { %v441_v10 = vrot.slane %v434_v60, %v3318_v18  ;;  %v2919_v43 = vcvt.f32.s32 %v2918_v63  ;;  %v2921_v11 = vcvt.f32.s32 %v2920_v1  ;;  %v345_v19 = vrot.slane %v337_v2, %v3318_v18 }
  0xd0   :  { %v511_v20 = vrot.slane %v503_v40, %v3318_v18  ;;  %v518_v61 = vrot.slane %v504_v8, %v3318_v18  ;;  %v554_v0 = vsel %vm331_vm10, %v546_v62, 0.0  ;;  %v555_v21 = vsel %vm332_vm11, %v546_v62, 0.0  ;;  %v626_v8 = vpop.permute.xlu0 %625 }
  0xd1   :  { %v3436_v23 = vsub.f32 %v3202_v7, %v441_v10  ;;  %v338_v24 = vcombine.low %v2919_v43, %v2921_v11  ;;  %v548_v25 = vsel %vm325_vm12, %v541_v22, 0.0  ;;  %v549_v26 = vsel %vm326_vm13, %v541_v22, 0.0 }
  0xd2   :  { %v519_v27 = vcombine.low %v511_v20, %v518_v61  ;;  %v550_v29 = vsel %vm327_vm14, %v541_v22, 0.0  ;;  %v551_v44 = vsel %vm328_vm15, %v541_v22, 0.0  ;;  %v556_v7 = vadd.f32 %v552_v9, %v548_v25 }
  0xd3   :  { %v444_v45 = vmul.f32 %v3436_v23, %v3436_v23  ;;  %v352_v31 = vrot.slane %v338_v24, %v3318_v18  ;;  %v563_v32 = vadd.f32 %v553_v42, %v549_v26  ;;  %v570_v33 = vadd.f32 %v554_v0, %v550_v29 }
  0xd4   :  { %v526_v46 = vrot.slane %v519_v27, %v3318_v18  ;;  %v557_v47 = vrot.slane %v556_v7, 4  ;;  %v577_v48 = vadd.f32 %v555_v21, %v551_v44  ;;  %v637_v49 = vsel %vm329_vm8, %v631_v34, 0.0 }
  0xd5   :  { %v353_v50 = vcombine.low %v345_v19, %v352_v31  ;;  %v564_v51 = vrot.slane %v563_v32, 4  ;;  %v571_v52 = vrot.slane %v570_v33, 4  ;;  %v638_v53 = vsel %vm330_vm9, %v631_v34, 0.0 }
  0xd6   :  { %v3461_v54 = vsub.f32 %v3221_v14, %v526_v46  ;;  %v558_v55 = vadd.f32 %v557_v47, %v556_v7  ;;  %v578_v60 = vrot.slane %v577_v48, 4  ;;  %v639_v62 = vsel %vm331_vm10, %v631_v34, 0.0 }
  0xd7   :  { %v360_v63 = vrot.slane %v353_v50, %v3318_v18  ;;  %v565_v1 = vadd.f32 %v564_v51, %v563_v32  ;;  %v572_v2 = vadd.f32 %v571_v52, %v570_v33  ;;  %v640_v40 = vsel %vm332_vm11, %v631_v34, 0.0  ;;  %v720_v50 = vpop.permute.xlu1 %719 }
  0xd8   :  { %v529_v9 = vmul.f32 %v3461_v54, %v3461_v54  ;;  %v559_v14 = vrot.slane %v558_v55, 2  ;;  %v579_v42 = vadd.f32 %v578_v60, %v577_v48  ;;  %v633_v10 = vsel %vm325_vm12, %v626_v8, 0.0  ;;  %v715_v60 = vpop.permute.xlu0 %714 }
  0xd9   :  { %365 = vst.msk [vmem:[%s4400_s6] ss:$4 sm:$0xf] %vm3415_vm0, %v360_v63  ;;  %v566_v43 = vrot.slane %v565_v1, 2  ;;  %v573_v11 = vrot.slane %v572_v2, 2  ;;  %v634_v19 = vsel %vm326_vm13, %v626_v8, 0.0  ;;  %v641_v25 = vadd.f32 %v637_v49, %v633_v10 }
  0xda   :  { %v635_v20 = vsel %vm327_vm14, %v626_v8, 0.0  ;;  %v3486_v61 = vadd.f32 %v529_v9, %v444_v45  ;;  %v560_v12 = vadd.f32 %v559_v14, %v558_v55  ;;  %v580_v0 = vrot.slane %v579_v42, 2 }
  0xdb   :  { %v636_v21 = vsel %vm328_vm15, %v626_v8, 0.0  ;;  %v567_v22 = vadd.f32 %v566_v43, %v565_v1  ;;  %v574_v24 = vadd.f32 %v573_v11, %v572_v2  ;;  %v648_v26 = vadd.f32 %v638_v53, %v634_v19 }
  0xdc   :  { %v561_v27 = vrot.slane %v560_v12, 1  ;;  %v581_v29 = vadd.f32 %v580_v0, %v579_v42  ;;  %v655_v13 = vadd.f32 %v639_v62, %v635_v20  ;;  %v662_v44 = vadd.f32 %v640_v40, %v636_v21 }
  0xdd   :  { %v568_v7 = vrot.slane %v567_v22, 1  ;;  %v575_v31 = vrot.slane %v574_v24, 1  ;;  %v642_v15 = vrot.slane %v641_v25, 4  ;;  %v649_v32 = vrot.slane %v648_v26, 4 }
  0xde   :  { %v3491_v45 = vadd.f32 %v561_v27, %v560_v12  ;;  %v582_v33 = vrot.slane %v581_v29, 1  ;;  %v656_v34 = vrot.slane %v655_v13, 4  ;;  %v663_v46 = vrot.slane %v662_v44, 4 }
  0xdf   :  { %v3493_v47 = vadd.f32 %v568_v7, %v567_v22  ;;  %v3495_v16 = vadd.f32 %v575_v31, %v574_v24  ;;  %v643_v48 = vadd.f32 %v642_v15, %v641_v25  ;;  %v650_v49 = vadd.f32 %v649_v32, %v648_v26  ;;  %v759_v26 = vpop.permute.xlu1 %758  ;;  %v754_v7 = vpop.permute.xlu0 %753 }
  0xe0   :  { %4425 = vst [vmem:[#allocation2_spill] sm:$0xff] %v3491_v45  ;;  %v3497_v51 = vadd.f32 %v582_v33, %v581_v29  ;;  %v657_v52 = vadd.f32 %v656_v34, %v655_v13  ;;  %v664_v53 = vadd.f32 %v663_v46, %v662_v44  ;;  %v726_v55 = vrot.slane %v3436_v23, %v3188_v3 }
  0xe1   :  { %4426 = vst [vmem:[#allocation3_spill] sm:$0xff] %v3493_v47  ;;  %4427 = vst [vmem:[#allocation4_spill] sm:$0xff] %v3495_v16  ;;  %v588_v62 = vcombine.low %v3491_v45, %v3493_v47  ;;  %v644_v63 = vrot.slane %v643_v48, 2  ;;  %v651_v1 = vrot.slane %v650_v49, 2  ;;  %v730_v2 = vrot.slane %v3436_v23, %v3191_v4 }
  0xe2   :  { %4428 = vst [vmem:[#allocation5_spill] sm:$0xff] %v3497_v51  ;;  %v589_v40 = vcombine.low %v3495_v16, %v3497_v51  ;;  %v658_v8 = vrot.slane %v657_v52, 2  ;;  %v665_v9 = vrot.slane %v664_v53, 2  ;;  %v734_v14 = vrot.slane %v3436_v23, %v3194_v5 }
  0xe3   :  { %v596_v42 = vrot.slane %v588_v62, %v3318_v18  ;;  %v645_v10 = vadd.f32 %v644_v63, %v643_v48  ;;  %v652_v43 = vadd.f32 %v651_v1, %v650_v49  ;;  %v738_v11 = vrot.slane %v3436_v23, %v3197_v6 }
  0xe4   :  { %v603_v19 = vrot.slane %v589_v40, %v3318_v18  ;;  %v659_v20 = vadd.f32 %v658_v8, %v657_v52  ;;  %v666_v12 = vadd.f32 %v665_v9, %v664_v53  ;;  %v747_v0 = vmul.f32 %v726_v55, %v720_v50 }
  0xe5   :  { %v646_v21 = vrot.slane %v645_v10, 1  ;;  %v653_v22 = vrot.slane %v652_v43, 1  ;;  %v748_v24 = vmul.f32 %v730_v2, %v720_v50  ;;  %v749_v25 = vmul.f32 %v734_v14, %v720_v50 }
  0xe6   :  { %v604_v27 = vcombine.low %v596_v42, %v603_v19  ;;  %v660_v29 = vrot.slane %v659_v20, 1  ;;  %v667_v13 = vrot.slane %v666_v12, 1  ;;  %v750_v44 = vmul.f32 %v738_v11, %v720_v50 }
  0xe7   :  { %v3513_v31 = vadd.f32 %v646_v21, %v645_v10  ;;  %v3515_v15 = vadd.f32 %v653_v22, %v652_v43  ;;  %v743_v32 = vmul.f32 %v726_v55, %v715_v60  ;;  %v744_v33 = vmul.f32 %v730_v2, %v715_v60 }
  0xe8   :  { %v611_v34 = vrot.slane %v604_v27, %v3318_v18  ;;  %v3518_v46 = vadd.f32 %v660_v29, %v659_v20  ;;  %v3520_v48 = vadd.f32 %v667_v13, %v666_v12  ;;  %v745_v49 = vmul.f32 %v734_v14, %v715_v60  ;;  %v780_v14 = vpop.permute.xlu1 %779 }
  0xe9   :  { %4429 = vst [vmem:[#allocation6_spill] sm:$0xff] %v3513_v31  ;;  %4430 = vst [vmem:[#allocation7_spill] sm:$0xff] %v3515_v15  ;;  %v673_v52 = vcombine.low %v3513_v31, %v3515_v15  ;;  %v746_v53 = vmul.f32 %v738_v11, %v715_v60  ;;  %v765_v62 = vadd.f32 %v759_v26, %v747_v0  ;;  %v775_v11 = vpop.permute.xlu0 %774 }
  0xea   :  { %4431 = vst [vmem:[#allocation8_spill] sm:$0xff] %v3518_v46  ;;  %4432 = vst [vmem:[#allocation9_spill] sm:$0xff] %v3520_v48  ;;  %v766_v50 = vadd.f32 %v759_v26, %v748_v24  ;;  %v3525_v63 = vsub.f32 %v3226_v17, %v611_v34  ;;  %v674_v55 = vcombine.low %v3518_v46, %v3520_v48 }
  0xeb   :  { %v767_v1 = vadd.f32 %v759_v26, %v749_v25  ;;  %v768_v2 = vadd.f32 %v759_v26, %v750_v44  ;;  %v681_v40 = vrot.slane %v673_v52, %v3318_v18  ;;  %v761_v8 = vadd.f32 %v754_v7, %v743_v32 }
  0xec   :  { %v762_v9 = vadd.f32 %v754_v7, %v744_v33  ;;  %v763_v42 = vadd.f32 %v754_v7, %v745_v49  ;;  %v3532_v10 = vmul.f32 %v3525_v63, %v3525_v63  ;;  %v688_v60 = vrot.slane %v674_v55, %v3318_v18  ;;  %v830_v55 = vpop.permute.xlu1 %829 }
  0xed   :  { %v764_v43 = vadd.f32 %v754_v7, %v746_v53  ;;  %v786_v17 = vrot.slane %v3461_v54, %v3188_v3  ;;  %v790_v19 = vrot.slane %v3461_v54, %v3191_v4  ;;  %v794_v20 = vrot.slane %v3461_v54, %v3194_v5  ;;  %v825_v46 = vpop.permute.xlu0 %824 }
  0xee   :  { %v798_v12 = vrot.slane %v3461_v54, %v3197_v6  ;;  %v836_v0 = vrot.slane %v3525_v63, %v3188_v3  ;;  %v689_v21 = vcombine.low %v681_v40, %v688_v60  ;;  %v840_v25 = vrot.slane %v3525_v63, %v3191_v4 }
  0xef   :  { %v807_v22 = vmul.f32 %v786_v17, %v780_v14  ;;  %v803_v24 = vmul.f32 %v786_v17, %v775_v11  ;;  %v808_v26 = vmul.f32 %v790_v19, %v780_v14  ;;  %v809_v27 = vmul.f32 %v794_v20, %v780_v14 }
  0xf0   :  { %v810_v29 = vmul.f32 %v798_v12, %v780_v14  ;;  %v804_v13 = vmul.f32 %v790_v19, %v775_v11  ;;  %v696_v44 = vrot.slane %v689_v21, %v3318_v18  ;;  %v805_v32 = vmul.f32 %v794_v20, %v775_v11 }
  0xf1   :  { %v815_v7 = vadd.f32 %v807_v22, %v765_v62  ;;  %v806_v33 = vmul.f32 %v798_v12, %v775_v11  ;;  %v816_v34 = vadd.f32 %v808_v26, %v766_v50  ;;  %v817_v49 = vadd.f32 %v809_v27, %v767_v1  ;;  %v880_v27 = vpop.permute.xlu1 %879 }
  0xf2   :  { %v818_v52 = vadd.f32 %v810_v29, %v768_v2  ;;  %v811_v53 = vadd.f32 %v803_v24, %v761_v8  ;;  %v3549_v40 = vsub.f32 %v3245_v28, %v696_v44  ;;  %v812_v60 = vadd.f32 %v804_v13, %v762_v9 }
  0xf3   :  { %v813_v17 = vadd.f32 %v805_v32, %v763_v42  ;;  %v814_v48 = vadd.f32 %v806_v33, %v764_v43  ;;  %v844_v14 = vrot.slane %v3525_v63, %v3194_v5  ;;  %v848_v62 = vrot.slane %v3525_v63, %v3197_v6  ;;  %v875_v32 = vpop.permute.xlu0 %874 }
  0xf4   :  { %v857_v19 = vmul.f32 %v836_v0, %v830_v55  ;;  %v858_v11 = vmul.f32 %v840_v25, %v830_v55  ;;  %v699_v50 = vmul.f32 %v3549_v40, %v3549_v40  ;;  %v853_v1 = vmul.f32 %v836_v0, %v825_v46 }
  0xf5   :  { %v854_v2 = vmul.f32 %v840_v25, %v825_v46  ;;  %v886_v28 = vrot.slane %v3549_v40, %v3188_v3  ;;  %v859_v8 = vmul.f32 %v844_v14, %v830_v55  ;;  %v860_v9 = vmul.f32 %v848_v62, %v830_v55 }
  0xf6   :  { %v865_v42 = vadd.f32 %v857_v19, %v815_v7  ;;  %v866_v43 = vadd.f32 %v858_v11, %v816_v34  ;;  %v855_v20 = vmul.f32 %v844_v14, %v825_v46  ;;  %v856_v12 = vmul.f32 %v848_v62, %v825_v46 }
  0xf7   :  { %v861_v21 = vadd.f32 %v853_v1, %v811_v53  ;;  %v862_v22 = vadd.f32 %v854_v2, %v812_v60  ;;  %v867_v24 = vadd.f32 %v859_v8, %v817_v49  ;;  %v868_v26 = vadd.f32 %v860_v9, %v818_v52 }
  0xf8   :  { %v890_v29 = vrot.slane %v3549_v40, %v3191_v4  ;;  %v894_v0 = vrot.slane %v3549_v40, %v3194_v5  ;;  %v863_v25 = vadd.f32 %v855_v20, %v813_v17  ;;  %v864_v13 = vadd.f32 %v856_v12, %v814_v48 }
  0xf9   :  { %v898_v44 = vrot.slane %v3549_v40, %v3197_v6  ;;  %v907_v7 = vmul.f32 %v886_v28, %v880_v27  ;;  %v903_v34 = vmul.f32 %v886_v28, %v875_v32  ;;  %v615_v2 = vadd.f32 %v3532_v10, %v3486_v61 }
  0xfa   :  { %v908_v33 = vmul.f32 %v890_v29, %v880_v27  ;;  %v909_v46 = vmul.f32 %v894_v0, %v880_v27  ;;  %v904_v53 = vmul.f32 %v890_v29, %v875_v32  ;;  %v905_v55 = vmul.f32 %v894_v0, %v875_v32 }
  0xfb   :  { %v910_v49 = vmul.f32 %v898_v44, %v880_v27  ;;  %v915_v52 = vadd.f32 %v907_v7, %v865_v42  ;;  %v906_v60 = vmul.f32 %v898_v44, %v875_v32  ;;  %v911_v19 = vadd.f32 %v903_v34, %v861_v21 }
  0xfc   :  { %v916_v14 = vadd.f32 %v908_v33, %v866_v43  ;;  %v917_v62 = vadd.f32 %v909_v46, %v867_v24  ;;  %v912_v11 = vadd.f32 %v904_v53, %v862_v22  ;;  %v913_v17 = vadd.f32 %v905_v55, %v863_v25 }
  0xfd   :  { %v918_v1 = vadd.f32 %v910_v49, %v868_v26  ;;  %v914_v48 = vadd.f32 %v906_v60, %v864_v13  ;;  %v919_v8 = vmin.f32 %v911_v19, %v915_v52  ;;  %v700_v28 = vadd.f32 %v699_v50, %v615_v2 }
  0xfe   :  { %v926_v9 = vmin.f32 %v912_v11, %v916_v14  ;;  %v933_v20 = vmin.f32 %v913_v17, %v917_v62 }
  0xff   :  { %v940_v12 = vmin.f32 %v914_v48, %v918_v1  ;;  %v920_v29 = vrot.slane %v919_v8, 4  ;;  %705 = vst.msk [vmem:[%s4401_s7] ss:$4 sm:$0xf] %vm3415_vm0, %v700_v28 }
 0x100   :  { %v927_v27 = vrot.slane %v926_v9, 4  ;;  %v934_v42 = vrot.slane %v933_v20, 4 }
 0x101   :  { %v941_v0 = vrot.slane %v940_v12, 4  ;;  %v921_v43 = vmin.f32 %v919_v8, %v920_v29 }
 0x102   :  { %v928_v21 = vmin.f32 %v926_v9, %v927_v27  ;;  %v935_v22 = vmin.f32 %v933_v20, %v934_v42 }
 0x103   :  { %v942_v24 = vmin.f32 %v940_v12, %v941_v0  ;;  %v922_v61 = vrot.slane %v921_v43, 2 }
 0x104   :  { %v929_v10 = vrot.slane %v928_v21, 2  ;;  %v936_v26 = vrot.slane %v935_v22, 2 }
 0x105   :  { %v943_v25 = vrot.slane %v942_v24, 2  ;;  %v923_v13 = vmin.f32 %v921_v43, %v922_v61 }
 0x106   :  { %v930_v50 = vmin.f32 %v928_v21, %v929_v10  ;;  %v937_v44 = vmin.f32 %v935_v22, %v936_v26 }
 0x107   :  { %v944_v7 = vmin.f32 %v942_v24, %v943_v25  ;;  %v924_v32 = vrot.slane %v923_v13, 1 }
 0x108   :  { %v931_v33 = vrot.slane %v930_v50, 1  ;;  %v938_v46 = vrot.slane %v937_v44, 1 }
 0x109   :  { %v945_v34 = vrot.slane %v944_v7, 1  ;;  %v925_v53 = vmin.f32 %v923_v13, %v924_v32 }
 0x10a   :  { %v932_v49 = vmin.f32 %v930_v50, %v931_v33  ;;  %v939_v55 = vmin.f32 %v937_v44, %v938_v46  ;;  %v1040_v46 = vpop.permute.xlu1 %1039 }
 0x10b   :  { %v946_v60 = vmin.f32 %v944_v7, %v945_v34  ;;  %vm947_vm1 = vcmp.le.f32.partialorder %v911_v19, %v925_v53  ;;  %vm951_vm3 = vcmp.le.f32.partialorder %v915_v52, %v925_v53 }
 0x10c   :  { %vm948_vm2 = vcmp.le.f32.partialorder %v912_v11, %v932_v49  ;;  %vm952_vm4 = vcmp.le.f32.partialorder %v916_v14, %v932_v49  ;;  %vm949_vm5 = vcmp.le.f32.partialorder %v913_v17, %v939_v55  ;;  %vm953_vm7 = vcmp.le.f32.partialorder %v917_v62, %v939_v55 }
 0x10d   :  { %vm950_vm6 = vcmp.le.f32.partialorder %v914_v48, %v946_v60  ;;  %vm954_vm8 = vcmp.le.f32.partialorder %v918_v1, %v946_v60  ;;  %v955_v2 = vsel %vm947_vm1, %v3297_v35, 16.0  ;;  %v956_v8 = vsel %vm948_vm2, %v3297_v35, 16.0  ;;  %v1035_v60 = vpop.permute.xlu0 %1034 }
 0x10e   :  { %v957_v9 = vsel %vm949_vm5, %v3297_v35, 16.0  ;;  %v958_v20 = vsel %vm950_vm6, %v3297_v35, 16.0  ;;  %v959_v12 = vsel %vm951_vm3, %v3299_v36, 16.0  ;;  %v960_v28 = vsel %vm952_vm4, %v3299_v36, 16.0 }
 0x10f   :  { %v961_v19 = vsel %vm953_vm7, %v3299_v36, 16.0  ;;  %v962_v52 = vsel %vm954_vm8, %v3299_v36, 16.0  ;;  %v963_v14 = vmin.f32 %v955_v2, %v959_v12  ;;  %v970_v11 = vmin.f32 %v956_v8, %v960_v28 }
 0x110   :  { %v977_v62 = vmin.f32 %v957_v9, %v961_v19  ;;  %v984_v1 = vmin.f32 %v958_v20, %v962_v52 }
 0x111   :  { %v964_v17 = vrot.slane %v963_v14, 4  ;;  %v971_v48 = vrot.slane %v970_v11, 4 }
 0x112   :  { %v978_v29 = vrot.slane %v977_v62, 4  ;;  %v985_v27 = vrot.slane %v984_v1, 4 }
 0x113   :  { %v965_v42 = vmin.f32 %v963_v14, %v964_v17  ;;  %v972_v0 = vmin.f32 %v970_v11, %v971_v48  ;;  %v1125_v17 = vpop.permute.xlu1 %1124 }
 0x114   :  { %v979_v43 = vmin.f32 %v977_v62, %v978_v29  ;;  %v986_v21 = vmin.f32 %v984_v1, %v985_v27 }
 0x115   :  { %v966_v22 = vrot.slane %v965_v42, 2  ;;  %v973_v24 = vrot.slane %v972_v0, 2 }
 0x116   :  { %v980_v61 = vrot.slane %v979_v43, 2  ;;  %v987_v10 = vrot.slane %v986_v21, 2 }
 0x117   :  { %v967_v26 = vmin.f32 %v965_v42, %v966_v22  ;;  %v974_v25 = vmin.f32 %v972_v0, %v973_v24  ;;  %v1120_v24 = vpop.permute.xlu0 %1119 }
 0x118   :  { %v981_v13 = vmin.f32 %v979_v43, %v980_v61  ;;  %v988_v50 = vmin.f32 %v986_v21, %v987_v10 }
 0x119   :  { %v968_v44 = vrot.slane %v967_v26, 1  ;;  %v975_v7 = vrot.slane %v974_v25, 1 }
 0x11a   :  { %v982_v32 = vrot.slane %v981_v13, 1  ;;  %v989_v33 = vrot.slane %v988_v50, 1 }
 0x11b   :  { %v3580_v34 = vmin.f32 %v967_v26, %v968_v44  ;;  %v3582_v53 = vmin.f32 %v974_v25, %v975_v7 }
 0x11c   :  { %v3584_v49 = vmin.f32 %v981_v13, %v982_v32  ;;  %v3586_v55 = vmin.f32 %v988_v50, %v989_v33 }
 0x11d   :  { %vm995_vm9 = vcmp.eq.f32.partialorder %v3299_v36, %v3580_v34  ;;  %vm996_vm10 = vcmp.eq.f32.partialorder %v3299_v36, %v3582_v53  ;;  %vm991_vm13 = vcmp.eq.f32.partialorder %v3297_v35, %v3580_v34  ;;  %vm992_vm14 = vcmp.eq.f32.partialorder %v3297_v35, %v3582_v53 }
 0x11e   :  { %vm997_vm11 = vcmp.eq.f32.partialorder %v3299_v36, %v3584_v49  ;;  %vm998_vm12 = vcmp.eq.f32.partialorder %v3299_v36, %v3586_v55  ;;  %v1046_v2 = vsel %vm995_vm9, %v1040_v46, 0.0  ;;  %v1047_v8 = vsel %vm996_vm10, %v1040_v46, 0.0 }
 0x11f   :  { %v1048_v9 = vsel %vm997_vm11, %v1040_v46, 0.0  ;;  %v1049_v20 = vsel %vm998_vm12, %v1040_v46, 0.0  ;;  %vm993_vm15 = vcmp.eq.f32.partialorder %v3297_v35, %v3584_v49  ;;  %vm994_vm1 = vcmp.eq.f32.partialorder %v3297_v35, %v3586_v55 }
 0x120   :  { %v1042_v12 = vsel %vm991_vm13, %v1035_v60, 0.0  ;;  %v1043_v28 = vsel %vm992_vm14, %v1035_v60, 0.0  ;;  %v1044_v19 = vsel %vm993_vm15, %v1035_v60, 0.0  ;;  %v1045_v52 = vsel %vm994_vm1, %v1035_v60, 0.0 }
 0x121   :  { %v1050_v14 = vadd.f32 %v1046_v2, %v1042_v12  ;;  %v1057_v11 = vadd.f32 %v1047_v8, %v1043_v28  ;;  %v1064_v62 = vadd.f32 %v1048_v9, %v1044_v19  ;;  %v1071_v1 = vadd.f32 %v1049_v20, %v1045_v52 }
 0x122   :  { %v1131_v48 = vsel %vm995_vm9, %v1125_v17, 0.0  ;;  %v1132_v29 = vsel %vm996_vm10, %v1125_v17, 0.0  ;;  %v1133_v27 = vsel %vm997_vm11, %v1125_v17, 0.0  ;;  %v1134_v42 = vsel %vm998_vm12, %v1125_v17, 0.0 }
 0x123   :  { %v1051_v0 = vrot.slane %v1050_v14, 4  ;;  %v1058_v43 = vrot.slane %v1057_v11, 4  ;;  %v1065_v21 = vrot.slane %v1064_v62, 4  ;;  %v1072_v22 = vrot.slane %v1071_v1, 4 }
 0x124   :  { %v1127_v61 = vsel %vm991_vm13, %v1120_v24, 0.0  ;;  %v1128_v10 = vsel %vm992_vm14, %v1120_v24, 0.0  ;;  %v1129_v26 = vsel %vm993_vm15, %v1120_v24, 0.0  ;;  %v1130_v25 = vsel %vm994_vm1, %v1120_v24, 0.0 }
 0x125   :  { %v1052_v13 = vadd.f32 %v1051_v0, %v1050_v14  ;;  %v1059_v50 = vadd.f32 %v1058_v43, %v1057_v11  ;;  %v1066_v44 = vadd.f32 %v1065_v21, %v1064_v62  ;;  %v1073_v7 = vadd.f32 %v1072_v22, %v1071_v1 }
 0x126   :  { %v1135_v32 = vadd.f32 %v1131_v48, %v1127_v61  ;;  %v1142_v33 = vadd.f32 %v1132_v29, %v1128_v10  ;;  %v1149_v46 = vadd.f32 %v1133_v27, %v1129_v26  ;;  %v1156_v60 = vadd.f32 %v1134_v42, %v1130_v25 }
 0x127   :  { %v1053_v2 = vrot.slane %v1052_v13, 2  ;;  %v1060_v8 = vrot.slane %v1059_v50, 2  ;;  %v1067_v9 = vrot.slane %v1066_v44, 2  ;;  %v1074_v20 = vrot.slane %v1073_v7, 2 }
 0x128   :  { %v1136_v12 = vrot.slane %v1135_v32, 4  ;;  %v1143_v28 = vrot.slane %v1142_v33, 4  ;;  %v1150_v19 = vrot.slane %v1149_v46, 4  ;;  %v1157_v52 = vrot.slane %v1156_v60, 4 }
 0x129   :  { %v1054_v17 = vadd.f32 %v1053_v2, %v1052_v13  ;;  %v1061_v15 = vadd.f32 %v1060_v8, %v1059_v50  ;;  %v1068_v31 = vadd.f32 %v1067_v9, %v1066_v44  ;;  %v1075_v24 = vadd.f32 %v1074_v20, %v1073_v7 }
 0x12a   :  { %v1137_v14 = vadd.f32 %v1136_v12, %v1135_v32  ;;  %v1144_v11 = vadd.f32 %v1143_v28, %v1142_v33  ;;  %v1151_v62 = vadd.f32 %v1150_v19, %v1149_v46  ;;  %v1158_v1 = vadd.f32 %v1157_v52, %v1156_v60 }
 0x12b   :  { %v1055_v48 = vrot.slane %v1054_v17, 1  ;;  %v1062_v29 = vrot.slane %v1061_v15, 1  ;;  %v1069_v27 = vrot.slane %v1068_v31, 1  ;;  %v1076_v42 = vrot.slane %v1075_v24, 1 }
 0x12c   :  { %v1138_v0 = vrot.slane %v1137_v14, 2  ;;  %v1145_v43 = vrot.slane %v1144_v11, 2  ;;  %v1152_v21 = vrot.slane %v1151_v62, 2  ;;  %v1159_v22 = vrot.slane %v1158_v1, 2 }
 0x12d   :  { %v3652_v61 = vadd.f32 %v1055_v48, %v1054_v17  ;;  %v3654_v10 = vadd.f32 %v1062_v29, %v1061_v15  ;;  %v3656_v26 = vadd.f32 %v1069_v27, %v1068_v31  ;;  %v3658_v25 = vadd.f32 %v1076_v42, %v1075_v24  ;;  %v1210_v48 = vpop.permute.xlu1 %1209 }
 0x12e   :  { %v1139_v13 = vadd.f32 %v1138_v0, %v1137_v14  ;;  %v1146_v50 = vadd.f32 %v1145_v43, %v1144_v11  ;;  %v1153_v44 = vadd.f32 %v1152_v21, %v1151_v62  ;;  %v1160_v7 = vadd.f32 %v1159_v22, %v1158_v1 }
 0x12f   :  { %v1082_v32 = vcombine.low %v3652_v61, %v3654_v10  ;;  %v1083_v33 = vcombine.low %v3656_v26, %v3658_v25  ;;  %v2922_v12 = vtrunc.f32 %v3580_v34  ;;  %v2924_v28 = vtrunc.f32 %v3582_v53 }
 0x130   :  { %v1140_v46 = vrot.slane %v1139_v13, 1  ;;  %v1147_v60 = vrot.slane %v1146_v50, 1  ;;  %v1154_v31 = vrot.slane %v1153_v44, 1  ;;  %v1161_v8 = vrot.slane %v1160_v7, 1 }
 0x131   :  { %v1090_v2 = vrot.slane %v1082_v32, %v3318_v18  ;;  %v1097_v15 = vrot.slane %v1083_v33, %v3318_v18  ;;  %v2926_v24 = vtrunc.f32 %v3584_v49  ;;  %v2923_v11 = vcvt.f32.s32 %v2922_v12 }
 0x132   :  { %v3666_v9 = vadd.f32 %v1140_v46, %v1139_v13  ;;  %v3668_v20 = vadd.f32 %v1147_v60, %v1146_v50  ;;  %v3672_v52 = vadd.f32 %v1154_v31, %v1153_v44  ;;  %v3674_v17 = vadd.f32 %v1161_v8, %v1160_v7  ;;  %v1205_v7 = vpop.permute.xlu0 %1204 }
 0x133   :  { %v1098_v19 = vcombine.low %v1090_v2, %v1097_v15  ;;  %v2925_v29 = vcvt.f32.s32 %v2924_v28  ;;  %v2927_v27 = vcvt.f32.s32 %v2926_v24  ;;  %v2928_v42 = vtrunc.f32 %v3586_v55 }
 0x134   :  { %4433 = vst [vmem:[#allocation10_spill] sm:$0xff] %v3674_v17  ;;  %v1167_v14 = vcombine.low %v3666_v9, %v3668_v20  ;;  %v1168_v62 = vcombine.low %v3672_v52, %v3674_v17  ;;  %v1216_v21 = vsel %vm995_vm9, %v1210_v48, 0.0  ;;  %v1217_v50 = vsel %vm996_vm10, %v1210_v48, 0.0 }
 0x135   :  { %v1105_v0 = vrot.slane %v1098_v19, %v3318_v18  ;;  %v2929_v22 = vcvt.f32.s32 %v2928_v42  ;;  %v1003_v13 = vcombine.low %v2923_v11, %v2925_v29  ;;  %v1218_v44 = vsel %vm997_vm11, %v1210_v48, 0.0 }
 0x136   :  { %v1175_v1 = vrot.slane %v1167_v14, %v3318_v18  ;;  %v1182_v43 = vrot.slane %v1168_v62, %v3318_v18  ;;  %v1219_v33 = vsel %vm998_vm12, %v1210_v48, 0.0  ;;  %v1212_v46 = vsel %vm991_vm13, %v1205_v7, 0.0 }
 0x137   :  { %v1213_v60 = vsel %vm992_vm14, %v1205_v7, 0.0  ;;  %v1004_v2 = vcombine.low %v2927_v27, %v2929_v22  ;;  %v1011_v15 = vrot.slane %v1003_v13, %v3318_v18  ;;  %v1214_v31 = vsel %vm993_vm15, %v1205_v7, 0.0  ;;  %v1295_v27 = vpop.permute.xlu1 %1294 }
 0x138   :  { %v1183_v32 = vcombine.low %v1175_v1, %v1182_v43  ;;  %v1215_v8 = vsel %vm994_vm1, %v1205_v7, 0.0  ;;  %v1220_v12 = vadd.f32 %v1216_v21, %v1212_v46  ;;  %v1227_v28 = vadd.f32 %v1217_v50, %v1213_v60 }
 0x139   :  { %v1234_v19 = vadd.f32 %v1218_v44, %v1214_v31  ;;  %v3711_v24 = vsub.f32 %v3436_v23, %v1105_v0  ;;  %v1018_v14 = vrot.slane %v1004_v2, %v3318_v18  ;;  %v1241_v11 = vadd.f32 %v1219_v33, %v1215_v8  ;;  %v1290_v44 = vpop.permute.xlu0 %1289 }
 0x13a   :  { %v1190_v62 = vrot.slane %v1183_v32, %v3318_v18  ;;  %v1221_v1 = vrot.slane %v1220_v12, 4  ;;  %v1228_v48 = vrot.slane %v1227_v28, 4  ;;  %v1301_v21 = vsel %vm995_vm9, %v1295_v27, 0.0 }
 0x13b   :  { %4434 = vst [vmem:[#allocation11_spill] sm:$0xff] %v3711_v24  ;;  %v1235_v29 = vrot.slane %v1234_v19, 4  ;;  %v1019_v42 = vcombine.low %v1011_v15, %v1018_v14  ;;  %v1242_v43 = vrot.slane %v1241_v11, 4  ;;  %v1302_v23 = vsel %vm996_vm10, %v1295_v27, 0.0 }
 0x13c   :  { %v1222_v0 = vadd.f32 %v1221_v1, %v1220_v12  ;;  %v1229_v22 = vadd.f32 %v1228_v48, %v1227_v28  ;;  %v1303_v50 = vsel %vm997_vm11, %v1295_v27, 0.0  ;;  %v1297_v33 = vsel %vm991_vm13, %v1290_v44, 0.0 }
 0x13d   :  { %v1236_v13 = vadd.f32 %v1235_v29, %v1234_v19  ;;  %v1026_v7 = vrot.slane %v1019_v42, %v3318_v18  ;;  %v1243_v32 = vadd.f32 %v1242_v43, %v1241_v11  ;;  %v1298_v46 = vsel %vm992_vm14, %v1290_v44, 0.0 }
 0x13e   :  { %v1223_v60 = vrot.slane %v1222_v0, 2  ;;  %v1230_v2 = vrot.slane %v1229_v22, 2  ;;  %v1304_v31 = vsel %vm998_vm12, %v1295_v27, 0.0  ;;  %v1299_v34 = vsel %vm993_vm15, %v1290_v44, 0.0 }
 0x13f   :  { %v1237_v15 = vrot.slane %v1236_v13, 2  ;;  %2861 = vst.msk [vmem:[%s4400_s6 + $0x1] ss:$4 sm:$0xf] %vm3415_vm0, %v1026_v7  ;;  %v1244_v8 = vrot.slane %v1243_v32, 2  ;;  %v1300_v53 = vsel %vm994_vm1, %v1290_v44, 0.0  ;;  %v1305_v12 = vadd.f32 %v1301_v21, %v1297_v33 }
 0x140   :  { %v1224_v28 = vadd.f32 %v1223_v60, %v1222_v0  ;;  %v1231_v19 = vadd.f32 %v1230_v2, %v1229_v22  ;;  %v1312_v11 = vadd.f32 %v1302_v23, %v1298_v46  ;;  %v1319_v29 = vadd.f32 %v1303_v50, %v1299_v34 }
 0x141   :  { %v1238_v14 = vadd.f32 %v1237_v15, %v1236_v13  ;;  %v1245_v1 = vadd.f32 %v1244_v8, %v1243_v32  ;;  %v1306_v48 = vrot.slane %v1305_v12, 4  ;;  %v1326_v27 = vadd.f32 %v1304_v31, %v1300_v53  ;;  %v1385_v32 = vpop.permute.xlu1 %1384  ;;  %v1380_v15 = vpop.permute.xlu0 %1379 }
 0x142   :  { %v1225_v42 = vrot.slane %v1224_v28, 1  ;;  %v1232_v43 = vrot.slane %v1231_v19, 1  ;;  %v1313_v51 = vrot.slane %v1312_v11, 4  ;;  %v1320_v47 = vrot.slane %v1319_v29, 4 }
 0x143   :  { %v1239_v7 = vrot.slane %v1238_v14, 1  ;;  %v1246_v16 = vrot.slane %v1245_v1, 1  ;;  %v1307_v49 = vadd.f32 %v1306_v48, %v1305_v12  ;;  %v1327_v45 = vrot.slane %v1326_v27, 4 }
 0x144   :  { %v3745_v17 = vadd.f32 %v1225_v42, %v1224_v28  ;;  %v3747_v55 = vadd.f32 %v1232_v43, %v1231_v19  ;;  %v1314_v0 = vadd.f32 %v1313_v51, %v1312_v11  ;;  %v1321_v13 = vadd.f32 %v1320_v47, %v1319_v29 }
 0x145   :  { %v3749_v21 = vadd.f32 %v1239_v7, %v1238_v14  ;;  %v3751_v23 = vadd.f32 %v1246_v16, %v1245_v1  ;;  %v1308_v22 = vrot.slane %v1307_v49, 2  ;;  %v1328_v50 = vadd.f32 %v1327_v45, %v1326_v27  ;;  %v1424_v43 = vpop.permute.xlu1 %1423 }
 0x146   :  { %4435 = vst [vmem:[#allocation12_spill] sm:$0xff] %v3747_v55  ;;  %v1252_v44 = vcombine.low %v3745_v17, %v3747_v55  ;;  %v3756_v33 = vsub.f32 %v3461_v54, %v1190_v62  ;;  %v1315_v2 = vrot.slane %v1314_v0, 2  ;;  %v1322_v16 = vrot.slane %v1321_v13, 2 }
 0x147   :  { %4436 = vst [vmem:[#allocation13_spill] sm:$0xff] %v3749_v21  ;;  %4437 = vst [vmem:[#allocation14_spill] sm:$0xff] %v3751_v23  ;;  %v1253_v46 = vcombine.low %v3749_v21, %v3751_v23  ;;  %v1309_v60 = vadd.f32 %v1308_v22, %v1307_v49  ;;  %v1329_v31 = vrot.slane %v1328_v50, 2  ;;  %v1391_v45 = vrot.slane %v3711_v24, %v3188_v3 }
 0x148   :  { %4438 = vst [vmem:[#allocation15_spill] sm:$0xff] %v3756_v33  ;;  %v1260_v51 = vrot.slane %v1252_v44, %v3318_v18  ;;  %v1316_v34 = vadd.f32 %v1315_v2, %v1314_v0  ;;  %v1395_v54 = vrot.slane %v3711_v24, %v3191_v4  ;;  %v1323_v62 = vadd.f32 %v1322_v16, %v1321_v13  ;;  %v1419_v13 = vpop.permute.xlu0 %1418 }
 0x149   :  { %v1267_v47 = vrot.slane %v1253_v46, %v3318_v18  ;;  %v1310_v8 = vrot.slane %v1309_v60, 1  ;;  %v1330_v53 = vadd.f32 %v1329_v31, %v1328_v50  ;;  %v1399_v12 = vrot.slane %v3711_v24, %v3194_v5 }
 0x14a   :  { %v1403_v28 = vrot.slane %v3711_v24, %v3197_v6  ;;  %v1108_v19 = vmul.f32 %v3711_v24, %v3711_v24  ;;  %v1317_v1 = vrot.slane %v1316_v34, 1  ;;  %v1193_v48 = vmul.f32 %v3756_v33, %v3756_v33 }
 0x14b   :  { %v1268_v14 = vcombine.low %v1260_v51, %v1267_v47  ;;  %v3772_v11 = vadd.f32 %v1310_v8, %v1309_v60  ;;  %v1324_v29 = vrot.slane %v1323_v62, 1  ;;  %v1331_v27 = vrot.slane %v1330_v53, 1 }
 0x14c   :  { %v1412_v42 = vmul.f32 %v1391_v45, %v1385_v32  ;;  %v3777_v49 = vadd.f32 %v1317_v1, %v1316_v34  ;;  %v1413_v0 = vmul.f32 %v1395_v54, %v1385_v32  ;;  %v1414_v22 = vmul.f32 %v1399_v12, %v1385_v32 }
 0x14d   :  { %4439 = vst [vmem:[#allocation16_spill] sm:$0xff] %v3772_v11  ;;  %v1275_v7 = vrot.slane %v1268_v14, %v3318_v18  ;;  %v3779_v50 = vadd.f32 %v1324_v29, %v1323_v62  ;;  %v3781_v44 = vadd.f32 %v1331_v27, %v1330_v53  ;;  %v1415_v46 = vmul.f32 %v1403_v28, %v1385_v32 }
 0x14e   :  { %4440 = vst [vmem:[#allocation17_spill] sm:$0xff] %v3777_v49  ;;  %v1408_v60 = vmul.f32 %v1391_v45, %v1380_v15  ;;  %v1337_v51 = vcombine.low %v3772_v11, %v3777_v49  ;;  %v1409_v16 = vmul.f32 %v1395_v54, %v1380_v15  ;;  %v1410_v31 = vmul.f32 %v1399_v12, %v1380_v15  ;;  %v1445_v12 = vpop.permute.xlu1 %1444 }
 0x14f   :  { %4441 = vst [vmem:[#allocation18_spill] sm:$0xff] %v3779_v50  ;;  %4442 = vst [vmem:[#allocation19_spill] sm:$0xff] %v3781_v44  ;;  %v3784_v2 = vsub.f32 %v3525_v63, %v1275_v7  ;;  %v3788_v47 = vadd.f32 %v1193_v48, %v1108_v19  ;;  %v1338_v8 = vcombine.low %v3779_v50, %v3781_v44 }
 0x150   :  { %v1411_v34 = vmul.f32 %v1403_v28, %v1380_v15  ;;  %v1345_v32 = vrot.slane %v1337_v51, %v3318_v18  ;;  %v1430_v45 = vadd.f32 %v1424_v43, %v1412_v42  ;;  %v1431_v63 = vadd.f32 %v1424_v43, %v1413_v0  ;;  %v1440_v28 = vpop.permute.xlu0 %1439 }
 0x151   :  { %v3794_v62 = vmul.f32 %v3784_v2, %v3784_v2  ;;  %v1352_v53 = vrot.slane %v1338_v8, %v3318_v18  ;;  %v1432_v14 = vadd.f32 %v1424_v43, %v1414_v22  ;;  %v1433_v1 = vadd.f32 %v1424_v43, %v1415_v46 }
 0x152   :  { %v1426_v54 = vadd.f32 %v1419_v13, %v1408_v60  ;;  %v1427_v19 = vadd.f32 %v1419_v13, %v1409_v16  ;;  %v1428_v48 = vadd.f32 %v1419_v13, %v1410_v31  ;;  %v1429_v29 = vadd.f32 %v1419_v13, %v1411_v34  ;;  %v1495_v24 = vpop.permute.xlu1 %1494 }
 0x153   :  { %v1451_v15 = vrot.slane %v3756_v33, %v3188_v3  ;;  %v1353_v27 = vcombine.low %v1345_v32, %v1352_v53  ;;  %v1455_v7 = vrot.slane %v3756_v33, %v3191_v4  ;;  %v1459_v42 = vrot.slane %v3756_v33, %v3194_v5 }
 0x154   :  { %v1463_v0 = vrot.slane %v3756_v33, %v3197_v6  ;;  %v1501_v46 = vrot.slane %v3784_v2, %v3188_v3  ;;  %v1505_v13 = vrot.slane %v3784_v2, %v3191_v4  ;;  %v1490_v55 = vpop.permute.xlu0 %1489 }
 0x155   :  { %v1472_v43 = vmul.f32 %v1451_v15, %v1445_v12  ;;  %v1468_v22 = vmul.f32 %v1451_v15, %v1440_v28  ;;  %v1360_v60 = vrot.slane %v1353_v27, %v3318_v18  ;;  %v1473_v51 = vmul.f32 %v1455_v7, %v1445_v12 }
 0x156   :  { %v1474_v16 = vmul.f32 %v1459_v42, %v1445_v12  ;;  %v1475_v31 = vmul.f32 %v1463_v0, %v1445_v12  ;;  %v1469_v34 = vmul.f32 %v1455_v7, %v1440_v28  ;;  %v1470_v32 = vmul.f32 %v1459_v42, %v1440_v28 }
 0x157   :  { %v1480_v8 = vadd.f32 %v1472_v43, %v1430_v45  ;;  %v1471_v53 = vmul.f32 %v1463_v0, %v1440_v28  ;;  %v3812_v44 = vsub.f32 %v3549_v40, %v1360_v60  ;;  %v1481_v50 = vadd.f32 %v1473_v51, %v1431_v63 }
 0x158   :  { %v1482_v15 = vadd.f32 %v1474_v16, %v1432_v14  ;;  %v1483_v33 = vadd.f32 %v1475_v31, %v1433_v1  ;;  %v1476_v49 = vadd.f32 %v1468_v22, %v1426_v54  ;;  %v1477_v11 = vadd.f32 %v1469_v34, %v1427_v19  ;;  %v1545_v16 = vpop.permute.xlu1 %1544  ;;  %v1540_v34 = vpop.permute.xlu0 %1539 }
 0x159   :  { %v1478_v23 = vadd.f32 %v1470_v32, %v1428_v48  ;;  %v1479_v21 = vadd.f32 %v1471_v53, %v1429_v29  ;;  %v1363_v27 = vmul.f32 %v3812_v44, %v3812_v44  ;;  %v1509_v45 = vrot.slane %v3784_v2, %v3194_v5 }
 0x15a   :  { %v1513_v12 = vrot.slane %v3784_v2, %v3197_v6  ;;  %v1522_v40 = vmul.f32 %v1501_v46, %v1495_v24  ;;  %v1523_v28 = vmul.f32 %v1505_v13, %v1495_v24  ;;  %v1518_v63 = vmul.f32 %v1501_v46, %v1490_v55 }
 0x15b   :  { %v1519_v14 = vmul.f32 %v1505_v13, %v1490_v55  ;;  %v1551_v1 = vrot.slane %v3812_v44, %v3188_v3  ;;  %v1524_v54 = vmul.f32 %v1509_v45, %v1495_v24  ;;  %v1520_v29 = vmul.f32 %v1509_v45, %v1490_v55 }
 0x15c   :  { %v1525_v19 = vmul.f32 %v1513_v12, %v1495_v24  ;;  %v1530_v48 = vadd.f32 %v1522_v40, %v1480_v8  ;;  %v1531_v7 = vadd.f32 %v1523_v28, %v1481_v50  ;;  %v1521_v42 = vmul.f32 %v1513_v12, %v1490_v55 }
 0x15d   :  { %v1526_v0 = vadd.f32 %v1518_v63, %v1476_v49  ;;  %v1527_v43 = vadd.f32 %v1519_v14, %v1477_v11  ;;  %v1532_v22 = vadd.f32 %v1524_v54, %v1482_v15  ;;  %v1528_v51 = vadd.f32 %v1520_v29, %v1478_v23 }
 0x15e   :  { %v1533_v60 = vadd.f32 %v1525_v19, %v1483_v33  ;;  %v1555_v31 = vrot.slane %v3812_v44, %v3191_v4  ;;  %v1529_v46 = vadd.f32 %v1521_v42, %v1479_v21  ;;  %v1559_v13 = vrot.slane %v3812_v44, %v3194_v5 }
 0x15f   :  { %v1563_v24 = vrot.slane %v3812_v44, %v3197_v6  ;;  %v1572_v8 = vmul.f32 %v1551_v1, %v1545_v16  ;;  %v1568_v55 = vmul.f32 %v1551_v1, %v1540_v34  ;;  %v1279_v33 = vadd.f32 %v3794_v62, %v3788_v47 }
 0x160   :  { %v1573_v50 = vmul.f32 %v1555_v31, %v1545_v16  ;;  %v1569_v49 = vmul.f32 %v1555_v31, %v1540_v34  ;;  %v1574_v23 = vmul.f32 %v1559_v13, %v1545_v16  ;;  %v1570_v53 = vmul.f32 %v1559_v13, %v1540_v34 }
 0x161   :  { %v1575_v11 = vmul.f32 %v1563_v24, %v1545_v16  ;;  %v1580_v32 = vadd.f32 %v1572_v8, %v1530_v48  ;;  %v1571_v21 = vmul.f32 %v1563_v24, %v1540_v34  ;;  %v1576_v45 = vadd.f32 %v1568_v55, %v1526_v0 }
 0x162   :  { %v1581_v15 = vadd.f32 %v1573_v50, %v1531_v7  ;;  %v1577_v12 = vadd.f32 %v1569_v49, %v1527_v43  ;;  %v1582_v40 = vadd.f32 %v1574_v23, %v1532_v22  ;;  %v1578_v63 = vadd.f32 %v1570_v53, %v1528_v51 }
 0x163   :  { %v1583_v28 = vadd.f32 %v1575_v11, %v1533_v60  ;;  %v1364_v14 = vadd.f32 %v1363_v27, %v1279_v33  ;;  %v1579_v54 = vadd.f32 %v1571_v21, %v1529_v46  ;;  %v1584_v19 = vmin.f32 %v1576_v45, %v1580_v32 }
 0x164   :  { %v1591_v29 = vmin.f32 %v1577_v12, %v1581_v15  ;;  %v1598_v1 = vmin.f32 %v1578_v63, %v1582_v40 }
 0x165   :  { %2870 = vst.msk [vmem:[%s4401_s7 + $0x1] ss:$4 sm:$0xf] %vm3415_vm0, %v1364_v14  ;;  %v1585_v47 = vrot.slane %v1584_v19, 4  ;;  %v1605_v48 = vmin.f32 %v1579_v54, %v1583_v28 }
 0x166   :  { %v1592_v62 = vrot.slane %v1591_v29, 4  ;;  %v1599_v7 = vrot.slane %v1598_v1, 4 }
 0x167   :  { %v1586_v42 = vmin.f32 %v1584_v19, %v1585_v47  ;;  %v1606_v43 = vrot.slane %v1605_v48, 4 }
 0x168   :  { %v1593_v0 = vmin.f32 %v1591_v29, %v1592_v62  ;;  %v1600_v22 = vmin.f32 %v1598_v1, %v1599_v7 }
 0x169   :  { %v1587_v60 = vrot.slane %v1586_v42, 2  ;;  %v1607_v51 = vmin.f32 %v1605_v48, %v1606_v43 }
 0x16a   :  { %v1594_v27 = vrot.slane %v1593_v0, 2  ;;  %v1601_v16 = vrot.slane %v1600_v22, 2 }
 0x16b   :  { %v1588_v31 = vmin.f32 %v1586_v42, %v1587_v60  ;;  %v1608_v13 = vrot.slane %v1607_v51, 2 }
 0x16c   :  { %v1595_v46 = vmin.f32 %v1593_v0, %v1594_v27  ;;  %v1602_v24 = vmin.f32 %v1600_v22, %v1601_v16  ;;  %v3845_v16 = vadd.f32 %v3652_v61, %v3384_v30  ;;  %v3861_v30 = vadd.f32 %v3666_v9, %v3400_v56 }
 0x16d   :  { %v1589_v8 = vrot.slane %v1588_v31, 1  ;;  %v1609_v50 = vmin.f32 %v1607_v51, %v1608_v13 }
 0x16e   :  { %v1596_v34 = vrot.slane %v1595_v46, 1  ;;  %v1603_v55 = vrot.slane %v1602_v24, 1 }
 0x16f   :  { %v1590_v49 = vmin.f32 %v1588_v31, %v1589_v8  ;;  %v1610_v23 = vrot.slane %v1609_v50, 1  ;;  %v3853_v8 = vadd.f32 %v3656_v26, %v3388_v38  ;;  %v3869_v38 = vadd.f32 %v3672_v52, %v3404_v58  ;;  %v4447_v58 = vld [vmem:[#allocation4_spill] sm:$0xff]  ;;  %v4448_v52 = vld [vmem:[#allocation13_spill] sm:$0xff] }
 0x170   :  { %v1597_v33 = vmin.f32 %v1595_v46, %v1596_v34  ;;  %v1604_v11 = vmin.f32 %v1602_v24, %v1603_v55  ;;  %v3849_v24 = vadd.f32 %v3654_v10, %v3386_v37  ;;  %v3857_v34 = vadd.f32 %v3658_v25, %v3390_v39  ;;  %v4443_v10 = vld [vmem:[#allocation10_spill] sm:$0xff] }
 0x171   :  { %v1611_v53 = vmin.f32 %v1609_v50, %v1610_v23  ;;  %vm1612_vm2 = vcmp.le.f32.partialorder %v1576_v45, %v1590_v49  ;;  %vm1616_vm4 = vcmp.le.f32.partialorder %v1580_v32, %v1590_v49  ;;  %v3865_v37 = vadd.f32 %v3668_v20, %v3402_v57  ;;  %v4444_v25 = vld [vmem:[#allocation2_spill] sm:$0xff]  ;;  %v4445_v57 = vld [vmem:[#allocation3_spill] sm:$0xff]  ;;  %v4446_v20 = vld [vmem:[#allocation12_spill] sm:$0xff] }
 0x172   :  { %vm1613_vm3 = vcmp.le.f32.partialorder %v1577_v12, %v1597_v33  ;;  %vm1614_vm5 = vcmp.le.f32.partialorder %v1578_v63, %v1604_v11  ;;  %vm1617_vm6 = vcmp.le.f32.partialorder %v1581_v15, %v1597_v33  ;;  %vm1618_vm7 = vcmp.le.f32.partialorder %v1582_v40, %v1604_v11 }
 0x173   :  { %v1620_v21 = vsel %vm1612_vm2, %v3297_v35, 16.0  ;;  %vm1615_vm8 = vcmp.le.f32.partialorder %v1579_v54, %v1611_v53  ;;  %vm1619_vm9 = vcmp.le.f32.partialorder %v1583_v28, %v1611_v53  ;;  %v1621_v14 = vsel %vm1613_vm3, %v3297_v35, 16.0 }
 0x174   :  { %v1622_v19 = vsel %vm1614_vm5, %v3297_v35, 16.0  ;;  %v1623_v29 = vsel %vm1615_vm8, %v3297_v35, 16.0  ;;  %v1624_v1 = vsel %vm1616_vm4, %v3299_v36, 16.0  ;;  %v1625_v47 = vsel %vm1617_vm6, %v3299_v36, 16.0 }
 0x175   :  { %v1626_v45 = vsel %vm1618_vm7, %v3299_v36, 16.0  ;;  %v1627_v32 = vsel %vm1619_vm9, %v3299_v36, 16.0  ;;  %v1628_v15 = vmin.f32 %v1620_v21, %v1624_v1  ;;  %v1635_v12 = vmin.f32 %v1621_v14, %v1625_v47  ;;  %v4450_v21 = vld [vmem:[#allocation14_spill] sm:$0xff] }
 0x176   :  { %v1642_v40 = vmin.f32 %v1622_v19, %v1626_v45  ;;  %v1649_v63 = vmin.f32 %v1623_v29, %v1627_v32  ;;  %v3873_v39 = vadd.f32 %v4443_v10, %v3406_v59  ;;  %v3877_v56 = vadd.f32 %v3745_v17, %v4444_v25  ;;  %v4449_v59 = vld [vmem:[#allocation5_spill] sm:$0xff]  ;;  %v1705_v29 = vpop.permute.xlu1 %1704 }
 0x177   :  { %v1629_v54 = vrot.slane %v1628_v15, 4  ;;  %v1636_v28 = vrot.slane %v1635_v12, 4  ;;  %v3887_v11 = vadd.f32 %v4446_v20, %v4445_v57  ;;  %v3891_v53 = vadd.f32 %v4448_v52, %v4447_v58 }
 0x178   :  { %v1643_v62 = vrot.slane %v1642_v40, 4  ;;  %v1650_v48 = vrot.slane %v1649_v63, 4  ;;  %v3895_v14 = vadd.f32 %v4450_v21, %v4449_v59 }
 0x179   :  { %v1630_v7 = vmin.f32 %v1628_v15, %v1629_v54  ;;  %v1637_v42 = vmin.f32 %v1635_v12, %v1636_v28 }
 0x17a   :  { %v1644_v0 = vmin.f32 %v1642_v40, %v1643_v62  ;;  %v1651_v43 = vmin.f32 %v1649_v63, %v1650_v48  ;;  %v1700_v48 = vpop.permute.xlu0 %1699 }
 0x17b   :  { %v1631_v22 = vrot.slane %v1630_v7, 2  ;;  %v1638_v60 = vrot.slane %v1637_v42, 2 }
 0x17c   :  { %v1645_v27 = vrot.slane %v1644_v0, 2  ;;  %v1652_v51 = vrot.slane %v1651_v43, 2 }
 0x17d   :  { %v1632_v31 = vmin.f32 %v1630_v7, %v1631_v22  ;;  %v1639_v46 = vmin.f32 %v1637_v42, %v1638_v60 }
 0x17e   :  { %v1646_v13 = vmin.f32 %v1644_v0, %v1645_v27  ;;  %v1653_v50 = vmin.f32 %v1651_v43, %v1652_v51  ;;  %v1785_v52 = vpop.permute.xlu0 %1784 }
 0x17f   :  { %v1633_v61 = vrot.slane %v1632_v31, 1  ;;  %v1640_v55 = vrot.slane %v1639_v46, 1 }
 0x180   :  { %v1647_v49 = vrot.slane %v1646_v13, 1  ;;  %v1654_v26 = vrot.slane %v1653_v50, 1 }
 0x181   :  { %v3879_v9 = vmin.f32 %v1632_v31, %v1633_v61  ;;  %v3881_v33 = vmin.f32 %v1639_v46, %v1640_v55  ;;  %v1790_v61 = vpop.permute.xlu1 %1789 }
 0x182   :  { %v3883_v23 = vmin.f32 %v1646_v13, %v1647_v49  ;;  %v3897_v17 = vmin.f32 %v1653_v50, %v1654_v26 }
 0x183   :  { %vm1660_vm10 = vcmp.eq.f32.partialorder %v3299_v36, %v3879_v9  ;;  %vm1661_vm11 = vcmp.eq.f32.partialorder %v3299_v36, %v3881_v33  ;;  %v2930_v19 = vtrunc.f32 %v3879_v9  ;;  %v2932_v1 = vtrunc.f32 %v3881_v33 }
 0x184   :  { %vm1662_vm12 = vcmp.eq.f32.partialorder %v3299_v36, %v3883_v23  ;;  %vm1663_vm13 = vcmp.eq.f32.partialorder %v3299_v36, %v3897_v17  ;;  %v2934_v47 = vtrunc.f32 %v3883_v23  ;;  %v2936_v45 = vtrunc.f32 %v3897_v17 }
 0x185   :  { %v2931_v32 = vcvt.f32.s32 %v2930_v19  ;;  %v1711_v15 = vsel %vm1660_vm10, %v1705_v29, 0.0  ;;  %v1712_v12 = vsel %vm1661_vm11, %v1705_v29, 0.0  ;;  %v1713_v40 = vsel %vm1662_vm12, %v1705_v29, 0.0 }
 0x186   :  { %v2933_v63 = vcvt.f32.s32 %v2932_v1  ;;  %v2935_v54 = vcvt.f32.s32 %v2934_v47  ;;  %v2937_v28 = vcvt.f32.s32 %v2936_v45  ;;  %v1714_v62 = vsel %vm1663_vm13, %v1705_v29, 0.0 }
 0x187   :  { %vm1656_vm14 = vcmp.eq.f32.partialorder %v3297_v35, %v3879_v9  ;;  %vm1657_vm15 = vcmp.eq.f32.partialorder %v3297_v35, %v3881_v33  ;;  %vm1658_vm1 = vcmp.eq.f32.partialorder %v3297_v35, %v3883_v23  ;;  %vm1659_vm2 = vcmp.eq.f32.partialorder %v3297_v35, %v3897_v17 }
 0x188   :  { %v1668_v7 = vcombine.low %v2931_v32, %v2933_v63  ;;  %v1669_v42 = vcombine.low %v2935_v54, %v2937_v28  ;;  %v1707_v0 = vsel %vm1656_vm14, %v1700_v48, 0.0  ;;  %v1708_v43 = vsel %vm1657_vm15, %v1700_v48, 0.0 }
 0x189   :  { %v1709_v22 = vsel %vm1658_vm1, %v1700_v48, 0.0  ;;  %v1710_v60 = vsel %vm1659_vm2, %v1700_v48, 0.0  ;;  %v1715_v27 = vadd.f32 %v1711_v15, %v1707_v0  ;;  %v1722_v51 = vadd.f32 %v1712_v12, %v1708_v43 }
 0x18a   :  { %v1676_v31 = vrot.slane %v1668_v7, %v3318_v18  ;;  %v1683_v46 = vrot.slane %v1669_v42, %v3318_v18  ;;  %v1729_v13 = vadd.f32 %v1713_v40, %v1709_v22  ;;  %v1736_v50 = vadd.f32 %v1714_v62, %v1710_v60 }
 0x18b   :  { %v1716_v55 = vrot.slane %v1715_v27, 4  ;;  %v1723_v49 = vrot.slane %v1722_v51, 4  ;;  %v1796_v10 = vsel %vm1660_vm10, %v1790_v61, 0.0  ;;  %v1797_v26 = vsel %vm1661_vm11, %v1790_v61, 0.0 }
 0x18c   :  { %v1684_v25 = vcombine.low %v1676_v31, %v1683_v46  ;;  %v1730_v57 = vrot.slane %v1729_v13, 4  ;;  %v1737_v20 = vrot.slane %v1736_v50, 4  ;;  %v1798_v58 = vsel %vm1662_vm12, %v1790_v61, 0.0 }
 0x18d   :  { %v1717_v59 = vadd.f32 %v1716_v55, %v1715_v27  ;;  %v1724_v21 = vadd.f32 %v1723_v49, %v1722_v51  ;;  %v1799_v19 = vsel %vm1663_vm13, %v1790_v61, 0.0  ;;  %v1792_v29 = vsel %vm1656_vm14, %v1785_v52, 0.0 }
 0x18e   :  { %v1691_v1 = vrot.slane %v1684_v25, %v3318_v18  ;;  %v1731_v47 = vadd.f32 %v1730_v57, %v1729_v13  ;;  %v1738_v45 = vadd.f32 %v1737_v20, %v1736_v50  ;;  %v1793_v32 = vsel %vm1657_vm15, %v1785_v52, 0.0 }
 0x18f   :  { %v1718_v15 = vrot.slane %v1717_v59, 2  ;;  %v1725_v12 = vrot.slane %v1724_v21, 2  ;;  %v1794_v40 = vsel %vm1658_vm1, %v1785_v52, 0.0  ;;  %v1795_v63 = vsel %vm1659_vm2, %v1785_v52, 0.0 }
 0x190   :  { %2881 = vst.msk [vmem:[%s4400_s6 + $0x2] ss:$4 sm:$0xf] %vm3415_vm0, %v1691_v1  ;;  %v1732_v54 = vrot.slane %v1731_v47, 2  ;;  %v1739_v28 = vrot.slane %v1738_v45, 2  ;;  %v1800_v62 = vadd.f32 %v1796_v10, %v1792_v29  ;;  %v1807_v48 = vadd.f32 %v1797_v26, %v1793_v32 }
 0x191   :  { %v1719_v7 = vadd.f32 %v1718_v15, %v1717_v59  ;;  %v1726_v42 = vadd.f32 %v1725_v12, %v1724_v21  ;;  %v1814_v0 = vadd.f32 %v1798_v58, %v1794_v40  ;;  %v1821_v43 = vadd.f32 %v1799_v19, %v1795_v63 }
 0x192   :  { %v1733_v22 = vadd.f32 %v1732_v54, %v1731_v47  ;;  %v1740_v60 = vadd.f32 %v1739_v28, %v1738_v45  ;;  %v1801_v27 = vrot.slane %v1800_v62, 4  ;;  %v1808_v51 = vrot.slane %v1807_v48, 4 }
 0x193   :  { %v1720_v31 = vrot.slane %v1719_v7, 1  ;;  %v1727_v46 = vrot.slane %v1726_v42, 1  ;;  %v1815_v13 = vrot.slane %v1814_v0, 4  ;;  %v1822_v50 = vrot.slane %v1821_v43, 4 }
 0x194   :  { %v1734_v61 = vrot.slane %v1733_v22, 1  ;;  %v1741_v55 = vrot.slane %v1740_v60, 1  ;;  %v1802_v49 = vadd.f32 %v1801_v27, %v1800_v62  ;;  %v1809_v25 = vadd.f32 %v1808_v51, %v1807_v48  ;;  %v1875_v62 = vpop.permute.xlu1 %1874 }
 0x195   :  { %v1721_v57 = vadd.f32 %v1720_v31, %v1719_v7  ;;  %v1728_v20 = vadd.f32 %v1727_v46, %v1726_v42  ;;  %v1816_v10 = vadd.f32 %v1815_v13, %v1814_v0  ;;  %v1823_v26 = vadd.f32 %v1822_v50, %v1821_v43  ;;  %v1870_v43 = vpop.permute.xlu0 %1869 }
 0x196   :  { %v1735_v52 = vadd.f32 %v1734_v61, %v1733_v22  ;;  %v1742_v59 = vadd.f32 %v1741_v55, %v1740_v60  ;;  %v1803_v58 = vrot.slane %v1802_v49, 2  ;;  %v1810_v21 = vrot.slane %v1809_v25, 2 }
 0x197   :  { %v1747_v19 = vcombine.low %v1721_v57, %v1728_v20  ;;  %v3976_v29 = vadd.f32 %v1721_v57, %v3845_v16  ;;  %v3979_v1 = vadd.f32 %v1728_v20, %v3849_v24  ;;  %v1817_v47 = vrot.slane %v1816_v10, 2 }
 0x198   :  { %v1748_v45 = vcombine.low %v1735_v52, %v1742_v59  ;;  %v3982_v32 = vadd.f32 %v1735_v52, %v3853_v8  ;;  %v3985_v15 = vadd.f32 %v1742_v59, %v3857_v34  ;;  %v1804_v12 = vadd.f32 %v1803_v58, %v1802_v49  ;;  %v4454_v52 = vld [vmem:[#allocation6_spill] sm:$0xff]  ;;  %v4455_v59 = vld [vmem:[#allocation16_spill] sm:$0xff] }
 0x199   :  { %v1755_v40 = vrot.slane %v1747_v19, %v3318_v18  ;;  %v1811_v63 = vadd.f32 %v1810_v21, %v1809_v25  ;;  %v1818_v54 = vadd.f32 %v1817_v47, %v1816_v10  ;;  %v1824_v28 = vrot.slane %v1823_v26, 2 }
 0x19a   :  { %v1762_v16 = vrot.slane %v1748_v45, %v3318_v18  ;;  %v1805_v48 = vrot.slane %v1804_v12, 1  ;;  %v1881_v24 = vsel %vm1660_vm10, %v1875_v62, 0.0  ;;  %v1882_v8 = vsel %vm1661_vm11, %v1875_v62, 0.0 }
 0x19b   :  { %v1812_v34 = vrot.slane %v1811_v63, 1  ;;  %v1819_v7 = vrot.slane %v1818_v54, 1  ;;  %v1825_v42 = vadd.f32 %v1824_v28, %v1823_v26  ;;  %v1883_v0 = vsel %vm1662_vm12, %v1875_v62, 0.0 }
 0x19c   :  { %v1763_v22 = vcombine.low %v1755_v40, %v1762_v16  ;;  %v1806_v60 = vadd.f32 %v1805_v48, %v1804_v12  ;;  %v1884_v27 = vsel %vm1663_vm13, %v1875_v62, 0.0  ;;  %v1877_v51 = vsel %vm1656_vm14, %v1870_v43, 0.0  ;;  %v1960_v16 = vpop.permute.xlu1 %1959  ;;  %v4459_v48 = vld [vmem:[#allocation11_spill] sm:$0xff] }
 0x19d   :  { %v1813_v31 = vadd.f32 %v1812_v34, %v1811_v63  ;;  %v1820_v46 = vadd.f32 %v1819_v7, %v1818_v54  ;;  %v1826_v13 = vrot.slane %v1825_v42, 1  ;;  %v1878_v50 = vsel %vm1657_vm15, %v1870_v43, 0.0  ;;  %v4457_v63 = vld [vmem:[#allocation7_spill] sm:$0xff] }
 0x19e   :  { %v1770_v61 = vrot.slane %v1763_v22, %v3318_v18  ;;  %v4009_v55 = vadd.f32 %v1806_v60, %v3861_v30  ;;  %v1879_v49 = vsel %vm1658_vm1, %v1870_v43, 0.0  ;;  %v1880_v25 = vsel %vm1659_vm2, %v1870_v43, 0.0  ;;  %v1955_v22 = vpop.permute.xlu0 %1954 }
 0x19f   :  { %v1827_v57 = vadd.f32 %v1826_v13, %v1825_v42  ;;  %v1832_v20 = vcombine.low %v1806_v60, %v1813_v31  ;;  %v4018_v10 = vadd.f32 %v1813_v31, %v3865_v37  ;;  %v4021_v26 = vadd.f32 %v1820_v46, %v3869_v38  ;;  %v4458_v37 = vld [vmem:[#allocation17_spill] sm:$0xff] }
 0x1a0   :  { %4451 = vst [vmem:[#allocation10_spill] sm:$0xff] %v4009_v55  ;;  %v4025_v30 = vadd.f32 %v4455_v59, %v4454_v52  ;;  %v1885_v58 = vadd.f32 %v1881_v24, %v1877_v51  ;;  %v1892_v21 = vadd.f32 %v1882_v8, %v1878_v50  ;;  %v1899_v19 = vadd.f32 %v1883_v0, %v1879_v49 }
 0x1a1   :  { %4452 = vst [vmem:[#allocation2_spill] sm:$0xff] %v4018_v10  ;;  %4453 = vst [vmem:[#allocation3_spill] sm:$0xff] %v4021_v26  ;;  %v1833_v47 = vcombine.low %v1820_v46, %v1827_v57  ;;  %v1840_v45 = vrot.slane %v1832_v20, %v3318_v18  ;;  %v4029_v12 = vadd.f32 %v1827_v57, %v3873_v39  ;;  %v1966_v39 = vsel %vm1660_vm10, %v1960_v16, 0.0 }
 0x1a2   :  { %v1906_v40 = vadd.f32 %v1884_v27, %v1880_v25  ;;  %v4033_v54 = vadd.f32 %v4458_v37, %v4457_v63  ;;  %v1886_v38 = vrot.slane %v1885_v58, 4  ;;  %v1893_v28 = vrot.slane %v1892_v21, 4 }
 0x1a3   :  { %4456 = vst [vmem:[#allocation12_spill] sm:$0xff] %v4029_v12  ;;  %v1900_v62 = vrot.slane %v1899_v19, 4  ;;  %v4036_v34 = vsub.f32 %v4459_v48, %v1770_v61  ;;  %v1847_v24 = vrot.slane %v1833_v47, %v3318_v18  ;;  %v1967_v43 = vsel %vm1661_vm11, %v1960_v16, 0.0 }
 0x1a4   :  { %v1907_v8 = vrot.slane %v1906_v40, 4  ;;  %v1887_v7 = vadd.f32 %v1886_v38, %v1885_v58  ;;  %v1894_v42 = vadd.f32 %v1893_v28, %v1892_v21  ;;  %v1968_v51 = vsel %vm1662_vm12, %v1960_v16, 0.0 }
 0x1a5   :  { %4460 = vst [vmem:[#allocation4_spill] sm:$0xff] %v4036_v34  ;;  %v1901_v0 = vadd.f32 %v1900_v62, %v1899_v19  ;;  %v1848_v60 = vcombine.low %v1840_v45, %v1847_v24  ;;  %v1962_v31 = vsel %vm1656_vm14, %v1955_v22, 0.0  ;;  %v1963_v61 = vsel %vm1657_vm15, %v1955_v22, 0.0 }
 0x1a6   :  { %v1908_v27 = vadd.f32 %v1907_v8, %v1906_v40  ;;  %v1888_v46 = vrot.slane %v1887_v7, 2  ;;  %v1895_v13 = vrot.slane %v1894_v42, 2  ;;  %v4056_v49 = vmul.f32 %v4036_v34, %v4036_v34 }
 0x1a7   :  { %v1902_v50 = vrot.slane %v1901_v0, 2  ;;  %v1969_v57 = vsel %vm1663_vm13, %v1960_v16, 0.0  ;;  %v1964_v9 = vsel %vm1658_vm1, %v1955_v22, 0.0  ;;  %v1970_v58 = vadd.f32 %v1966_v39, %v1962_v31  ;;  %v4461_v39 = vld [vmem:[#allocation15_spill] sm:$0xff] }
 0x1a8   :  { %v1909_v25 = vrot.slane %v1908_v27, 2  ;;  %v1889_v20 = vadd.f32 %v1888_v46, %v1887_v7  ;;  %v1896_v52 = vadd.f32 %v1895_v13, %v1894_v42  ;;  %v1855_v33 = vrot.slane %v1848_v60, %v3318_v18 }
 0x1a9   :  { %v1903_v59 = vadd.f32 %v1902_v50, %v1901_v0  ;;  %v1977_v19 = vadd.f32 %v1967_v43, %v1963_v61  ;;  %v1984_v47 = vadd.f32 %v1968_v51, %v1964_v9  ;;  %v1971_v37 = vrot.slane %v1970_v58, 4  ;;  %v2050_v50 = vpop.permute.xlu1 %2049 }
 0x1aa   :  { %v1910_v21 = vadd.f32 %v1909_v25, %v1908_v27  ;;  %v1890_v45 = vrot.slane %v1889_v20, 1  ;;  %v1897_v40 = vrot.slane %v1896_v52, 1  ;;  %v1965_v28 = vsel %vm1659_vm2, %v1955_v22, 0.0 }
 0x1ab   :  { %v1904_v63 = vrot.slane %v1903_v59, 1  ;;  %v1978_v23 = vrot.slane %v1977_v19, 4  ;;  %v1985_v62 = vrot.slane %v1984_v47, 4  ;;  %v1972_v8 = vadd.f32 %v1971_v37, %v1970_v58 }
 0x1ac   :  { %v1911_v38 = vrot.slane %v1910_v21, 1  ;;  %v1891_v16 = vadd.f32 %v1890_v45, %v1889_v20  ;;  %v1898_v48 = vadd.f32 %v1897_v40, %v1896_v52  ;;  %v4069_v7 = vsub.f32 %v4461_v39, %v1855_v33  ;;  %v2045_v20 = vpop.permute.xlu0 %2044 }
 0x1ad   :  { %v1905_v24 = vadd.f32 %v1904_v63, %v1903_v59  ;;  %v1979_v0 = vadd.f32 %v1978_v23, %v1977_v19  ;;  %v1986_v43 = vadd.f32 %v1985_v62, %v1984_v47  ;;  %v1973_v46 = vrot.slane %v1972_v8, 2 }
 0x1ae   :  { %4462 = vst [vmem:[#allocation13_spill] sm:$0xff] %v4069_v7  ;;  %v1912_v42 = vadd.f32 %v1911_v38, %v1910_v21  ;;  %v1917_v60 = vcombine.low %v1891_v16, %v1898_v48  ;;  %v4072_v27 = vadd.f32 %v1891_v16, %v3877_v56  ;;  %v4075_v51 = vadd.f32 %v1898_v48, %v3887_v11  ;;  %v2089_v48 = vpop.permute.xlu1 %2088 }
 0x1af   :  { %v4078_v17 = vadd.f32 %v1905_v24, %v3891_v53  ;;  %v1980_v13 = vrot.slane %v1979_v0, 2  ;;  %v1987_v25 = vrot.slane %v1986_v43, 2  ;;  %v1991_v9 = vadd.f32 %v1969_v57, %v1965_v28 }
 0x1b0   :  { %4463 = vst [vmem:[#allocation5_spill] sm:$0xff] %v4072_v27  ;;  %4464 = vst [vmem:[#allocation14_spill] sm:$0xff] %v4075_v51  ;;  %v1918_v22 = vcombine.low %v1905_v24, %v1912_v42  ;;  %v4081_v31 = vadd.f32 %v1912_v42, %v3895_v14  ;;  %v1925_v61 = vrot.slane %v1917_v60, %v3318_v18  ;;  %v4467_v24 = vld [vmem:[#allocation8_spill] sm:$0xff]  ;;  %v4469_v42 = vld [vmem:[#allocation9_spill] sm:$0xff] }
 0x1b1   :  { %4465 = vst [vmem:[#allocation6_spill] sm:$0xff] %v4078_v17  ;;  %v2056_v56 = vrot.slane %v4036_v34, %v3188_v3  ;;  %v1974_v52 = vadd.f32 %v1973_v46, %v1972_v8  ;;  %v1981_v53 = vadd.f32 %v1980_v13, %v1979_v0  ;;  %v2060_v59 = vrot.slane %v4036_v34, %v3191_v4  ;;  %v4468_v8 = vld [vmem:[#allocation18_spill] sm:$0xff]  ;;  %v4470_v0 = vld [vmem:[#allocation19_spill] sm:$0xff]  ;;  %v2084_v46 = vpop.permute.xlu0 %2083 }
 0x1b2   :  { %4466 = vst [vmem:[#allocation16_spill] sm:$0xff] %v4081_v31  ;;  %v1932_v11 = vrot.slane %v1918_v22, %v3318_v18  ;;  %v1988_v14 = vadd.f32 %v1987_v25, %v1986_v43  ;;  %v1992_v58 = vrot.slane %v1991_v9, 4  ;;  %v2064_v33 = vrot.slane %v4036_v34, %v3194_v5 }
 0x1b3   :  { %v2068_v21 = vrot.slane %v4036_v34, %v3197_v6  ;;  %v1858_v57 = vmul.f32 %v4069_v7, %v4069_v7  ;;  %v1975_v47 = vrot.slane %v1974_v52, 1  ;;  %v1982_v45 = vrot.slane %v1981_v53, 1 }
 0x1b4   :  { %v1933_v19 = vcombine.low %v1925_v61, %v1932_v11  ;;  %v1989_v40 = vrot.slane %v1988_v14, 1  ;;  %v1993_v63 = vadd.f32 %v1992_v58, %v1991_v9  ;;  %v2077_v37 = vmul.f32 %v2056_v56, %v2050_v50 }
 0x1b5   :  { %v2078_v38 = vmul.f32 %v2060_v59, %v2050_v50  ;;  %v4096_v23 = vadd.f32 %v1975_v47, %v1974_v52  ;;  %v4098_v62 = vadd.f32 %v1982_v45, %v1981_v53  ;;  %v2079_v16 = vmul.f32 %v2064_v33, %v2050_v50 }
 0x1b6   :  { %v1940_v28 = vrot.slane %v1933_v19, %v3318_v18  ;;  %v4102_v39 = vadd.f32 %v4468_v8, %v4467_v24  ;;  %v4106_v43 = vadd.f32 %v4470_v0, %v4469_v42  ;;  %v1994_v60 = vrot.slane %v1993_v63, 2 }
 0x1b7   :  { %v2080_v22 = vmul.f32 %v2068_v21, %v2050_v50  ;;  %v4109_v13 = vadd.f32 %v1858_v57, %v4056_v49  ;;  %v4114_v25 = vadd.f32 %v1989_v40, %v1988_v14  ;;  %v2002_v9 = vcombine.low %v4096_v23, %v4098_v62  ;;  %v2110_v40 = vpop.permute.xlu1 %2109 }
 0x1b8   :  { %v4112_v61 = vsub.f32 %v3784_v2, %v1940_v28  ;;  %v1995_v11 = vadd.f32 %v1994_v60, %v1993_v63  ;;  %v2073_v52 = vmul.f32 %v2056_v56, %v2045_v20  ;;  %v2074_v53 = vmul.f32 %v2060_v59, %v2045_v20 }
 0x1b9   :  { %v2075_v58 = vmul.f32 %v2064_v33, %v2045_v20  ;;  %v2076_v19 = vmul.f32 %v2068_v21, %v2045_v20  ;;  %v2095_v47 = vadd.f32 %v2089_v48, %v2077_v37  ;;  %v2096_v45 = vadd.f32 %v2089_v48, %v2078_v38  ;;  %v2105_v38 = vpop.permute.xlu0 %2104 }
 0x1ba   :  { %v2097_v50 = vadd.f32 %v2089_v48, %v2079_v16  ;;  %v4120_v49 = vmul.f32 %v4112_v61, %v4112_v61  ;;  %v1996_v57 = vrot.slane %v1995_v11, 1  ;;  %v2010_v2 = vrot.slane %v2002_v9, %v3318_v18 }
 0x1bb   :  { %v2098_v14 = vadd.f32 %v2089_v48, %v2080_v22  ;;  %v2116_v28 = vrot.slane %v4069_v7, %v3188_v3  ;;  %v2120_v56 = vrot.slane %v4069_v7, %v3191_v4  ;;  %v2124_v20 = vrot.slane %v4069_v7, %v3194_v5  ;;  %v2160_v17 = vpop.permute.xlu1 %2159 }
 0x1bc   :  { %v2128_v59 = vrot.slane %v4069_v7, %v3197_v6  ;;  %v1997_v33 = vadd.f32 %v1996_v57, %v1995_v11  ;;  %v2091_v21 = vadd.f32 %v2084_v46, %v2073_v52  ;;  %v2092_v63 = vadd.f32 %v2084_v46, %v2074_v53 }
 0x1bd   :  { %v2093_v37 = vadd.f32 %v2084_v46, %v2075_v58  ;;  %v2094_v16 = vadd.f32 %v2084_v46, %v2076_v19  ;;  %v2166_v48 = vrot.slane %v4112_v61, %v3188_v3  ;;  %v2170_v24 = vrot.slane %v4112_v61, %v3191_v4 }
 0x1be   :  { %v2174_v8 = vrot.slane %v4112_v61, %v3194_v5  ;;  %v2003_v42 = vcombine.low %v4114_v25, %v1997_v33  ;;  %v2137_v0 = vmul.f32 %v2116_v28, %v2110_v40  ;;  %v2138_v60 = vmul.f32 %v2120_v56, %v2110_v40 }
 0x1bf   :  { %v2139_v22 = vmul.f32 %v2124_v20, %v2110_v40  ;;  %v2140_v9 = vmul.f32 %v2128_v59, %v2110_v40  ;;  %v2133_v11 = vmul.f32 %v2116_v28, %v2105_v38  ;;  %v2134_v52 = vmul.f32 %v2120_v56, %v2105_v38  ;;  %v2155_v40 = vpop.permute.xlu0 %2154 }
 0x1c0   :  { %v2135_v53 = vmul.f32 %v2124_v20, %v2105_v38  ;;  %v2017_v46 = vrot.slane %v2003_v42, %v3318_v18  ;;  %v2145_v58 = vadd.f32 %v2137_v0, %v2095_v47  ;;  %v2146_v19 = vadd.f32 %v2138_v60, %v2096_v45 }
 0x1c1   :  { %v2147_v57 = vadd.f32 %v2139_v22, %v2097_v50  ;;  %v2148_v7 = vadd.f32 %v2140_v9, %v2098_v14  ;;  %v2136_v34 = vmul.f32 %v2128_v59, %v2105_v38  ;;  %v2141_v31 = vadd.f32 %v2133_v11, %v2091_v21 }
 0x1c2   :  { %v2178_v51 = vrot.slane %v4112_v61, %v3197_v6  ;;  %v2018_v27 = vcombine.low %v2010_v2, %v2017_v46  ;;  %v2142_v12 = vadd.f32 %v2134_v52, %v2092_v63  ;;  %v2187_v26 = vmul.f32 %v2166_v48, %v2160_v17 }
 0x1c3   :  { %v2188_v10 = vmul.f32 %v2170_v24, %v2160_v17  ;;  %v2143_v28 = vadd.f32 %v2135_v53, %v2093_v37  ;;  %v2144_v56 = vadd.f32 %v2136_v34, %v2094_v16  ;;  %v2189_v20 = vmul.f32 %v2174_v8, %v2160_v17 }
 0x1c4   :  { %v2183_v55 = vmul.f32 %v2166_v48, %v2155_v40  ;;  %v2025_v47 = vrot.slane %v2018_v27, %v3318_v18  ;;  %v2190_v45 = vmul.f32 %v2178_v51, %v2160_v17  ;;  %v2195_v50 = vadd.f32 %v2187_v26, %v2145_v58  ;;  %v2210_v17 = vpop.permute.xlu1 %2209 }
 0x1c5   :  { %v2196_v14 = vadd.f32 %v2188_v10, %v2146_v19  ;;  %v2197_v59 = vadd.f32 %v2189_v20, %v2147_v57  ;;  %v2184_v21 = vmul.f32 %v2170_v24, %v2155_v40  ;;  %v2185_v38 = vmul.f32 %v2174_v8, %v2155_v40 }
 0x1c6   :  { %v2186_v42 = vmul.f32 %v2178_v51, %v2155_v40  ;;  %v4143_v0 = vsub.f32 %v3812_v44, %v2025_v47  ;;  %v2198_v2 = vadd.f32 %v2190_v45, %v2148_v7  ;;  %v2191_v63 = vadd.f32 %v2183_v55, %v2141_v31 }
 0x1c7   :  { %v4147_v37 = vadd.f32 %v4096_v23, %v4025_v30  ;;  %v2192_v34 = vadd.f32 %v2184_v21, %v2142_v12  ;;  %v4151_v27 = vadd.f32 %v4098_v62, %v4033_v54  ;;  %v4155_v10 = vadd.f32 %v4114_v25, %v4102_v39  ;;  %v2205_v23 = vpop.permute.xlu0 %2204 }
 0x1c8   :  { %v4158_v26 = vadd.f32 %v1997_v33, %v4106_v43  ;;  %v2216_v44 = vrot.slane %v4143_v0, %v3188_v3  ;;  %v2220_v55 = vrot.slane %v4143_v0, %v3191_v4  ;;  %v2224_v30 = vrot.slane %v4143_v0, %v3194_v5 }
 0x1c9   :  { %v1944_v12 = vadd.f32 %v4120_v49, %v4109_v13  ;;  %v2028_v54 = vmul.f32 %v4143_v0, %v4143_v0  ;;  %v2193_v7 = vadd.f32 %v2185_v38, %v2143_v28  ;;  %v2194_v51 = vadd.f32 %v2186_v42, %v2144_v56 }
 0x1ca   :  { %v2228_v31 = vrot.slane %v4143_v0, %v3197_v6  ;;  %v2237_v3 = vmul.f32 %v2216_v44, %v2210_v17  ;;  %v2238_v62 = vmul.f32 %v2220_v55, %v2210_v17  ;;  %v2239_v39 = vmul.f32 %v2224_v30, %v2210_v17 }
 0x1cb   :  { %v2233_v4 = vmul.f32 %v2216_v44, %v2205_v23  ;;  %v2234_v25 = vmul.f32 %v2220_v55, %v2205_v23  ;;  %v2235_v5 = vmul.f32 %v2224_v30, %v2205_v23  ;;  %v2029_v11 = vadd.f32 %v2028_v54, %v1944_v12 }
 0x1cc   :  { %v2240_v43 = vmul.f32 %v2228_v31, %v2210_v17  ;;  %v2236_v33 = vmul.f32 %v2228_v31, %v2205_v23  ;;  %v2245_v16 = vadd.f32 %v2237_v3, %v2195_v50  ;;  %v2246_v13 = vadd.f32 %v2238_v62, %v2196_v14 }
 0x1cd   :  { %v2247_v49 = vadd.f32 %v2239_v39, %v2197_v59  ;;  %v2241_v48 = vadd.f32 %v2233_v4, %v2191_v63  ;;  %v2242_v8 = vadd.f32 %v2234_v25, %v2192_v34  ;;  %v2243_v60 = vadd.f32 %v2235_v5, %v2193_v7  ;;  %2890 = vst.msk [vmem:[%s4401_s7 + $0x2] ss:$4 sm:$0xf] %vm3415_vm0, %v2029_v11 }
 0x1ce   :  { %v2248_v24 = vadd.f32 %v2240_v43, %v2198_v2  ;;  %v2244_v22 = vadd.f32 %v2236_v33, %v2194_v51 }
 0x1cf   :  { %v2249_v9 = vmin.f32 %v2241_v48, %v2245_v16  ;;  %v2256_v6 = vmin.f32 %v2242_v8, %v2246_v13  ;;  %v2263_v52 = vmin.f32 %v2243_v60, %v2247_v49 }
 0x1d0   :  { %v2270_v53 = vmin.f32 %v2244_v22, %v2248_v24 }
 0x1d1   :  { %v2250_v46 = vrot.slane %v2249_v9, 4  ;;  %v2257_v58 = vrot.slane %v2256_v6, 4  ;;  %v2264_v19 = vrot.slane %v2263_v52, 4 }
 0x1d2   :  { %v2271_v57 = vrot.slane %v2270_v53, 4 }
 0x1d3   :  { %v2251_v40 = vmin.f32 %v2249_v9, %v2250_v46  ;;  %v2258_v28 = vmin.f32 %v2256_v6, %v2257_v58  ;;  %v2265_v56 = vmin.f32 %v2263_v52, %v2264_v19 }
 0x1d4   :  { %v2272_v20 = vmin.f32 %v2270_v53, %v2271_v57 }
 0x1d5   :  { %v2252_v47 = vrot.slane %v2251_v40, 2  ;;  %v2259_v45 = vrot.slane %v2258_v28, 2  ;;  %v2266_v50 = vrot.slane %v2265_v56, 2 }
 0x1d6   :  { %v2273_v14 = vrot.slane %v2272_v20, 2 }
 0x1d7   :  { %v2253_v59 = vmin.f32 %v2251_v40, %v2252_v47  ;;  %v2260_v21 = vmin.f32 %v2258_v28, %v2259_v45  ;;  %v2267_v38 = vmin.f32 %v2265_v56, %v2266_v50 }
 0x1d8   :  { %v2274_v42 = vmin.f32 %v2272_v20, %v2273_v14 }
 0x1d9   :  { %v2254_v2 = vrot.slane %v2253_v59, 1  ;;  %v2261_v63 = vrot.slane %v2260_v21, 1  ;;  %v2268_v34 = vrot.slane %v2267_v38, 1 }
 0x1da   :  { %v2275_v44 = vrot.slane %v2274_v42, 1 }
 0x1db   :  { %v2255_v55 = vmin.f32 %v2253_v59, %v2254_v2  ;;  %v2262_v30 = vmin.f32 %v2260_v21, %v2261_v63  ;;  %v2269_v12 = vmin.f32 %v2267_v38, %v2268_v34  ;;  %v2370_v59 = vpop.permute.xlu1 %2369 }
 0x1dc   :  { %v2276_v54 = vmin.f32 %v2274_v42, %v2275_v44 }
 0x1dd   :  { %vm2277_vm3 = vcmp.le.f32.partialorder %v2241_v48, %v2255_v55  ;;  %vm2281_vm4 = vcmp.le.f32.partialorder %v2245_v16, %v2255_v55  ;;  %vm2278_vm5 = vcmp.le.f32.partialorder %v2242_v8, %v2262_v30  ;;  %vm2279_vm6 = vcmp.le.f32.partialorder %v2243_v60, %v2269_v12 }
 0x1de   :  { %vm2280_vm7 = vcmp.le.f32.partialorder %v2244_v22, %v2276_v54  ;;  %vm2282_vm8 = vcmp.le.f32.partialorder %v2246_v13, %v2262_v30  ;;  %vm2283_vm9 = vcmp.le.f32.partialorder %v2247_v49, %v2269_v12  ;;  %vm2284_vm10 = vcmp.le.f32.partialorder %v2248_v24, %v2276_v54  ;;  %v2365_v54 = vpop.permute.xlu0 %2364 }
 0x1df   :  { %v2285_v7 = vsel %vm2277_vm3, %v3297_v35, 16.0  ;;  %v2286_v51 = vsel %vm2278_vm5, %v3297_v35, 16.0  ;;  %v2287_v17 = vsel %vm2279_vm6, %v3297_v35, 16.0  ;;  %v2288_v31 = vsel %vm2280_vm7, %v3297_v35, 16.0 }
 0x1e0   :  { %v2289_v23 = vsel %vm2281_vm4, %v3299_v36, 16.0  ;;  %v2290_v3 = vsel %vm2282_vm8, %v3299_v36, 16.0  ;;  %v2291_v62 = vsel %vm2283_vm9, %v3299_v36, 16.0  ;;  %v2292_v39 = vsel %vm2284_vm10, %v3299_v36, 16.0 }
 0x1e1   :  { %v2293_v4 = vmin.f32 %v2285_v7, %v2289_v23  ;;  %v2300_v43 = vmin.f32 %v2286_v51, %v2290_v3  ;;  %v2307_v25 = vmin.f32 %v2287_v17, %v2291_v62  ;;  %v2314_v5 = vmin.f32 %v2288_v31, %v2292_v39 }
 0x1e3   :  { %v2294_v33 = vrot.slane %v2293_v4, 4  ;;  %v2301_v16 = vrot.slane %v2300_v43, 4  ;;  %v2308_v13 = vrot.slane %v2307_v25, 4  ;;  %v2315_v49 = vrot.slane %v2314_v5, 4 }
 0x1e5   :  { %v2295_v48 = vmin.f32 %v2293_v4, %v2294_v33  ;;  %v2302_v24 = vmin.f32 %v2300_v43, %v2301_v16  ;;  %v2309_v8 = vmin.f32 %v2307_v25, %v2308_v13  ;;  %v2316_v60 = vmin.f32 %v2314_v5, %v2315_v49  ;;  %v2455_v33 = vpop.permute.xlu1 %2454 }
 0x1e7   :  { %v2296_v22 = vrot.slane %v2295_v48, 2  ;;  %v2303_v9 = vrot.slane %v2302_v24, 2  ;;  %v2310_v11 = vrot.slane %v2309_v8, 2  ;;  %v2317_v6 = vrot.slane %v2316_v60, 2 }
 0x1e9   :  { %v2297_v52 = vmin.f32 %v2295_v48, %v2296_v22  ;;  %v2304_v53 = vmin.f32 %v2302_v24, %v2303_v9  ;;  %v2311_v46 = vmin.f32 %v2309_v8, %v2310_v11  ;;  %v2318_v58 = vmin.f32 %v2316_v60, %v2317_v6  ;;  %v2450_v9 = vpop.permute.xlu0 %2449 }
 0x1eb   :  { %v2298_v19 = vrot.slane %v2297_v52, 1  ;;  %v2305_v57 = vrot.slane %v2304_v53, 1  ;;  %v2312_v40 = vrot.slane %v2311_v46, 1  ;;  %v2319_v28 = vrot.slane %v2318_v58, 1 }
 0x1ed   :  { %v4185_v56 = vmin.f32 %v2297_v52, %v2298_v19  ;;  %v4187_v20 = vmin.f32 %v2304_v53, %v2305_v57  ;;  %v4189_v47 = vmin.f32 %v2311_v46, %v2312_v40  ;;  %v4191_v45 = vmin.f32 %v2318_v58, %v2319_v28 }
 0x1ef   :  { %vm2325_vm11 = vcmp.eq.f32.partialorder %v3299_v36, %v4185_v56  ;;  %vm2326_vm12 = vcmp.eq.f32.partialorder %v3299_v36, %v4187_v20  ;;  %v2938_v50 = vtrunc.f32 %v4185_v56  ;;  %v2940_v14 = vtrunc.f32 %v4187_v20 }
 0x1f0   :  { %vm2327_vm13 = vcmp.eq.f32.partialorder %v3299_v36, %v4189_v47  ;;  %vm2328_vm14 = vcmp.eq.f32.partialorder %v3299_v36, %v4191_v45  ;;  %v2942_v21 = vtrunc.f32 %v4189_v47  ;;  %v2944_v38 = vtrunc.f32 %v4191_v45 }
 0x1f1   :  { %v2939_v42 = vcvt.f32.s32 %v2938_v50  ;;  %v2941_v2 = vcvt.f32.s32 %v2940_v14  ;;  %v2376_v63 = vsel %vm2325_vm11, %v2370_v59, 0.0  ;;  %v2377_v34 = vsel %vm2326_vm12, %v2370_v59, 0.0 }
 0x1f2   :  { %v2943_v44 = vcvt.f32.s32 %v2942_v21  ;;  %v2945_v55 = vcvt.f32.s32 %v2944_v38  ;;  %v2378_v30 = vsel %vm2327_vm13, %v2370_v59, 0.0  ;;  %v2379_v12 = vsel %vm2328_vm14, %v2370_v59, 0.0 }
 0x1f3   :  { %v2333_v7 = vcombine.low %v2939_v42, %v2941_v2  ;;  %vm2321_vm15 = vcmp.eq.f32.partialorder %v3297_v35, %v4185_v56  ;;  %vm2322_vm1 = vcmp.eq.f32.partialorder %v3297_v35, %v4187_v20  ;;  %vm2323_vm2 = vcmp.eq.f32.partialorder %v3297_v35, %v4189_v47 }
 0x1f4   :  { %v2334_v51 = vcombine.low %v2943_v44, %v2945_v55  ;;  %vm2324_vm3 = vcmp.eq.f32.partialorder %v3297_v35, %v4191_v45  ;;  %v2372_v17 = vsel %vm2321_vm15, %v2365_v54, 0.0  ;;  %v2373_v31 = vsel %vm2322_vm1, %v2365_v54, 0.0 }
 0x1f5   :  { %v2341_v23 = vrot.slane %v2333_v7, %v3318_v18  ;;  %v2374_v3 = vsel %vm2323_vm2, %v2365_v54, 0.0  ;;  %v2375_v62 = vsel %vm2324_vm3, %v2365_v54, 0.0  ;;  %v2380_v39 = vadd.f32 %v2376_v63, %v2372_v17 }
 0x1f6   :  { %v2348_v4 = vrot.slane %v2334_v51, %v3318_v18  ;;  %v2387_v43 = vadd.f32 %v2377_v34, %v2373_v31  ;;  %v2394_v25 = vadd.f32 %v2378_v30, %v2374_v3  ;;  %v2401_v5 = vadd.f32 %v2379_v12, %v2375_v62 }
 0x1f7   :  { %v2381_v16 = vrot.slane %v2380_v39, 4  ;;  %v2461_v13 = vsel %vm2325_vm11, %v2455_v33, 0.0  ;;  %v2462_v49 = vsel %vm2326_vm12, %v2455_v33, 0.0  ;;  %v2463_v48 = vsel %vm2327_vm13, %v2455_v33, 0.0 }
 0x1f8   :  { %v2349_v24 = vcombine.low %v2341_v23, %v2348_v4  ;;  %v2388_v8 = vrot.slane %v2387_v43, 4  ;;  %v2395_v60 = vrot.slane %v2394_v25, 4  ;;  %v2402_v22 = vrot.slane %v2401_v5, 4 }
 0x1f9   :  { %v2382_v11 = vadd.f32 %v2381_v16, %v2380_v39  ;;  %v2464_v6 = vsel %vm2328_vm14, %v2455_v33, 0.0  ;;  %v2457_v52 = vsel %vm2321_vm15, %v2450_v9, 0.0  ;;  %v2458_v53 = vsel %vm2322_vm1, %v2450_v9, 0.0 }
 0x1fa   :  { %v2356_v46 = vrot.slane %v2349_v24, %v3318_v18  ;;  %v2389_v58 = vadd.f32 %v2388_v8, %v2387_v43  ;;  %v2396_v19 = vadd.f32 %v2395_v60, %v2394_v25  ;;  %v2403_v57 = vadd.f32 %v2402_v22, %v2401_v5 }
 0x1fb   :  { %v2383_v40 = vrot.slane %v2382_v11, 2  ;;  %v2459_v28 = vsel %vm2323_vm2, %v2450_v9, 0.0  ;;  %v2460_v50 = vsel %vm2324_vm3, %v2450_v9, 0.0  ;;  %v2465_v14 = vadd.f32 %v2461_v13, %v2457_v52 }
 0x1fc   :  { %2901 = vst.msk [vmem:[%s4400_s6 + $0x3] ss:$4 sm:$0xf] %vm3415_vm0, %v2356_v46  ;;  %v2390_v59 = vrot.slane %v2389_v58, 2  ;;  %v2397_v21 = vrot.slane %v2396_v19, 2  ;;  %v2404_v38 = vrot.slane %v2403_v57, 2  ;;  %v2472_v42 = vadd.f32 %v2462_v49, %v2458_v53 }
 0x1fd   :  { %v2384_v2 = vadd.f32 %v2383_v40, %v2382_v11  ;;  %v2466_v63 = vrot.slane %v2465_v14, 4  ;;  %v2479_v34 = vadd.f32 %v2463_v48, %v2459_v28  ;;  %v2486_v44 = vadd.f32 %v2464_v6, %v2460_v50 }
 0x1fe   :  { %v2391_v55 = vadd.f32 %v2390_v59, %v2389_v58  ;;  %v2398_v30 = vadd.f32 %v2397_v21, %v2396_v19  ;;  %v2405_v12 = vadd.f32 %v2404_v38, %v2403_v57  ;;  %v2473_v54 = vrot.slane %v2472_v42, 4 }
 0x1ff   :  { %v2385_v7 = vrot.slane %v2384_v2, 1  ;;  %v2467_v51 = vadd.f32 %v2466_v63, %v2465_v14  ;;  %v2480_v17 = vrot.slane %v2479_v34, 4  ;;  %v2487_v31 = vrot.slane %v2486_v44, 4 }
 0x200   :  { %v2392_v23 = vrot.slane %v2391_v55, 1  ;;  %v2399_v3 = vrot.slane %v2398_v30, 1  ;;  %v2406_v62 = vrot.slane %v2405_v12, 1  ;;  %v2474_v39 = vadd.f32 %v2473_v54, %v2472_v42  ;;  %v4471_v42 = vld [vmem:[#allocation10_spill] sm:$0xff] }
 0x201   :  { %v2386_v4 = vadd.f32 %v2385_v7, %v2384_v2  ;;  %v2468_v43 = vrot.slane %v2467_v51, 2  ;;  %v2481_v25 = vadd.f32 %v2480_v17, %v2479_v34  ;;  %v2488_v5 = vadd.f32 %v2487_v31, %v2486_v44  ;;  %v2540_v7 = vpop.permute.xlu1 %2539 }
 0x202   :  { %v2393_v33 = vadd.f32 %v2392_v23, %v2391_v55  ;;  %v2400_v16 = vadd.f32 %v2399_v3, %v2398_v30  ;;  %v2407_v13 = vadd.f32 %v2406_v62, %v2405_v12  ;;  %v2475_v49 = vrot.slane %v2474_v39, 2  ;;  %v4472_v55 = vld [vmem:[#allocation2_spill] sm:$0xff]  ;;  %v4473_v12 = vld [vmem:[#allocation3_spill] sm:$0xff]  ;;  %v2535_v62 = vpop.permute.xlu0 %2534 }
 0x203   :  { %v2440_v48 = vadd.f32 %v2386_v4, %v3976_v29  ;;  %v2469_v24 = vadd.f32 %v2468_v43, %v2467_v51  ;;  %v2482_v8 = vrot.slane %v2481_v25, 2  ;;  %v2489_v60 = vrot.slane %v2488_v5, 2  ;;  %v4474_v51 = vld [vmem:[#allocation12_spill] sm:$0xff] }
 0x204   :  { %v2412_v22 = vcombine.low %v2386_v4, %v2393_v33  ;;  %v2413_v9 = vcombine.low %v2400_v16, %v2407_v13  ;;  %v2441_v11 = vadd.f32 %v2393_v33, %v3979_v1  ;;  %v2442_v6 = vadd.f32 %v2400_v16, %v3982_v32 }
 0x205   :  { %v2443_v52 = vadd.f32 %v2407_v13, %v3985_v15  ;;  %v2470_v53 = vrot.slane %v2469_v24, 1  ;;  %v2476_v46 = vadd.f32 %v2475_v49, %v2474_v39  ;;  %v2483_v58 = vadd.f32 %v2482_v8, %v2481_v25 }
 0x206   :  { %v2420_v19 = vrot.slane %v2412_v22, %v3318_v18  ;;  %v2427_v57 = vrot.slane %v2413_v9, %v3318_v18  ;;  %v2705_v40 = vcombine.low %v2440_v48, %v2441_v11  ;;  %v2490_v29 = vadd.f32 %v2489_v60, %v2488_v5 }
 0x207   :  { %v2706_v28 = vcombine.low %v2442_v6, %v2443_v52  ;;  %v2471_v50 = vadd.f32 %v2470_v53, %v2469_v24  ;;  %v2477_v14 = vrot.slane %v2476_v46, 1  ;;  %v2484_v59 = vrot.slane %v2483_v58, 1 }
 0x208   :  { %v2713_v21 = vrot.slane %v2705_v40, %v3318_v18  ;;  %v2491_v1 = vrot.slane %v2490_v29, 1  ;;  %v2428_v34 = vcombine.low %v2420_v19, %v2427_v57  ;;  %v2546_v31 = vsel %vm2325_vm11, %v2540_v7, 0.0  ;;  %v2625_v40 = vpop.permute.xlu1 %2624 }
 0x209   :  { %v2720_v32 = vrot.slane %v2706_v28, %v3318_v18  ;;  %v2478_v38 = vadd.f32 %v2477_v14, %v2476_v46  ;;  %v2485_v15 = vadd.f32 %v2484_v59, %v2483_v58  ;;  %v2525_v2 = vadd.f32 %v2471_v50, %v4471_v42 }
 0x20a   :  { %v2492_v63 = vadd.f32 %v2491_v1, %v2490_v29  ;;  %v2547_v23 = vsel %vm2326_vm12, %v2540_v7, 0.0  ;;  %v2548_v3 = vsel %vm2327_vm13, %v2540_v7, 0.0  ;;  %v2542_v25 = vsel %vm2321_vm15, %v2535_v62, 0.0 }
 0x20b   :  { %v2721_v44 = vcombine.low %v2713_v21, %v2720_v32  ;;  %v2526_v30 = vadd.f32 %v2478_v38, %v4472_v55  ;;  %v2527_v54 = vadd.f32 %v2485_v15, %v4473_v12  ;;  %v2497_v4 = vcombine.low %v2471_v50, %v2478_v38  ;;  %v2620_v38 = vpop.permute.xlu0 %2619 }
 0x20c   :  { %v2528_v17 = vadd.f32 %v2492_v63, %v4474_v51  ;;  %v2498_v5 = vcombine.low %v2485_v15, %v2492_v63  ;;  %v2549_v16 = vsel %vm2328_vm14, %v2540_v7, 0.0  ;;  %v2543_v13 = vsel %vm2322_vm1, %v2535_v62, 0.0 }
 0x20d   :  { %v2728_v39 = vrot.slane %v2721_v44, %v3318_v18  ;;  %v2735_v43 = vcombine.low %v2525_v2, %v2526_v30  ;;  %v2544_v48 = vsel %vm2323_vm2, %v2535_v62, 0.0  ;;  %v2545_v24 = vsel %vm2324_vm3, %v2535_v62, 0.0 }
 0x20e   :  { %v2736_v33 = vcombine.low %v2527_v54, %v2528_v17  ;;  %v2550_v8 = vadd.f32 %v2546_v31, %v2542_v25  ;;  %v2557_v22 = vadd.f32 %v2547_v23, %v2543_v13  ;;  %v2564_v9 = vadd.f32 %v2548_v3, %v2544_v48 }
 0x20f   :  { %2730 = vst.msk [vmem:[%s4402_s5] ss:$4 sm:$0xf] %vm3415_vm0, %v2728_v39  ;;  %v2743_v49 = vrot.slane %v2735_v43, %v3318_v18  ;;  %v4314_v11 = vrot.slane %v2428_v34, %v3318_v18  ;;  %v4317_v6 = vrot.slane %v2497_v4, %v3318_v18  ;;  %v2571_v53 = vadd.f32 %v2549_v16, %v2545_v24  ;;  %v4475_v24 = vld [vmem:[#allocation5_spill] sm:$0xff] }
 0x210   :  { %v2750_v60 = vrot.slane %v2736_v33, %v3318_v18  ;;  %v2551_v52 = vrot.slane %v2550_v8, 4  ;;  %v4320_v46 = vrot.slane %v2498_v5, %v3318_v18  ;;  %v2558_v19 = vrot.slane %v2557_v22, 4 }
 0x211   :  { %v2565_v57 = vrot.slane %v2564_v9, 4  ;;  %v2572_v28 = vrot.slane %v2571_v53, 4  ;;  %v2631_v50 = vsel %vm2325_vm11, %v2625_v40, 0.0  ;;  %v2632_v14 = vsel %vm2326_vm12, %v2625_v40, 0.0 }
 0x212   :  { %v2751_v58 = vcombine.low %v2743_v49, %v2750_v60  ;;  %v2552_v29 = vadd.f32 %v2551_v52, %v2550_v8  ;;  %v2559_v21 = vadd.f32 %v2558_v19, %v2557_v22  ;;  %v2633_v32 = vsel %vm2327_vm13, %v2625_v40, 0.0 }
 0x213   :  { %v2566_v1 = vadd.f32 %v2565_v57, %v2564_v9  ;;  %v2573_v42 = vadd.f32 %v2572_v28, %v2571_v53  ;;  %v2627_v2 = vsel %vm2321_vm15, %v2620_v38, 0.0  ;;  %v2628_v63 = vsel %vm2322_vm1, %v2620_v38, 0.0  ;;  %v4477_v53 = vld [vmem:[#allocation6_spill] sm:$0xff]  ;;  %v4478_v57 = vld [vmem:[#allocation16_spill] sm:$0xff] }
 0x214   :  { %v2758_v59 = vrot.slane %v2751_v58, %v3318_v18  ;;  %v2553_v15 = vrot.slane %v2552_v29, 2  ;;  %v2560_v34 = vrot.slane %v2559_v21, 2  ;;  %v2634_v55 = vsel %vm2328_vm14, %v2625_v40, 0.0 }
 0x215   :  { %v2567_v44 = vrot.slane %v2566_v1, 2  ;;  %v2629_v56 = vsel %vm2323_vm2, %v2620_v38, 0.0  ;;  %v2574_v12 = vrot.slane %v2573_v42, 2  ;;  %v2630_v20 = vsel %vm2324_vm3, %v2620_v38, 0.0 }
 0x216   :  { %2911 = vst.msk [vmem:[%s4402_s5 + $0x1] ss:$4 sm:$0xf] %vm3415_vm0, %v2758_v59  ;;  %v2554_v30 = vadd.f32 %v2553_v15, %v2552_v29  ;;  %v2635_v54 = vadd.f32 %v2631_v50, %v2627_v2  ;;  %v2513_v7 = vcombine.low %v4317_v6, %v4320_v46  ;;  %v2561_v51 = vadd.f32 %v2560_v34, %v2559_v21  ;;  %v4476_v6 = vld [vmem:[#allocation14_spill] sm:$0xff] }
 0x217   :  { %v2568_v17 = vadd.f32 %v2567_v44, %v2566_v1  ;;  %v2642_v31 = vadd.f32 %v2632_v14, %v2628_v63  ;;  %v2575_v36 = vadd.f32 %v2574_v12, %v2573_v42  ;;  %v2649_v62 = vadd.f32 %v2633_v32, %v2629_v56 }
 0x218   :  { %v2555_v23 = vrot.slane %v2554_v30, 1  ;;  %v2636_v3 = vrot.slane %v2635_v54, 4  ;;  %v2562_v39 = vrot.slane %v2561_v51, 1  ;;  %v2656_v43 = vadd.f32 %v2634_v55, %v2630_v20 }
 0x219   :  { %v2569_v47 = vrot.slane %v2568_v17, 1  ;;  %v2643_v4 = vrot.slane %v2642_v31, 4  ;;  %v2576_v5 = vrot.slane %v2575_v36, 1  ;;  %v2650_v35 = vrot.slane %v2649_v62, 4 }
 0x21a   :  { %v2556_v25 = vadd.f32 %v2555_v23, %v2554_v30  ;;  %v2637_v33 = vadd.f32 %v2636_v3, %v2635_v54  ;;  %v2563_v45 = vadd.f32 %v2562_v39, %v2561_v51  ;;  %v2657_v49 = vrot.slane %v2656_v43, 4  ;;  %v4479_v54 = vld [vmem:[#allocation4_spill] sm:$0xff] }
 0x21b   :  { %v2570_v16 = vadd.f32 %v2569_v47, %v2568_v17  ;;  %v2644_v13 = vadd.f32 %v2643_v4, %v2642_v31  ;;  %v2577_v48 = vadd.f32 %v2576_v5, %v2575_v36  ;;  %v2651_v22 = vadd.f32 %v2650_v35, %v2649_v62  ;;  %v4480_v36 = vld [vmem:[#allocation13_spill] sm:$0xff] }
 0x21c   :  { %v2610_v8 = vadd.f32 %v2556_v25, %v4475_v24  ;;  %v2638_v60 = vrot.slane %v2637_v33, 2  ;;  %v2582_v9 = vcombine.low %v2556_v25, %v2563_v45  ;;  %v2611_v52 = vadd.f32 %v2563_v45, %v4476_v6 }
 0x21d   :  { %v2612_v46 = vadd.f32 %v2570_v16, %v4477_v53  ;;  %v2645_v58 = vrot.slane %v2644_v13, 2  ;;  %v2583_v19 = vcombine.low %v2570_v16, %v2577_v48  ;;  %v2613_v40 = vadd.f32 %v2577_v48, %v4478_v57 }
 0x21e   :  { %v2639_v29 = vadd.f32 %v2638_v60, %v2637_v33  ;;  %v2652_v28 = vrot.slane %v2651_v22, 2  ;;  %v2590_v50 = vrot.slane %v2582_v9, %v3318_v18  ;;  %v2766_v14 = vcombine.low %v2610_v8, %v2611_v52 }
 0x21f   :  { %v2646_v59 = vadd.f32 %v2645_v58, %v2644_v13  ;;  %v2658_v21 = vadd.f32 %v2657_v49, %v2656_v43  ;;  %v2597_v1 = vrot.slane %v2583_v19, %v3318_v18  ;;  %v2767_v32 = vcombine.low %v2612_v46, %v2613_v40 }
 0x220   :  { %v2640_v38 = vrot.slane %v2639_v29, 1  ;;  %v2653_v15 = vadd.f32 %v2652_v28, %v2651_v22  ;;  %v2520_v42 = vrot.slane %v2513_v7, %v3318_v18  ;;  %v2774_v2 = vrot.slane %v2766_v14, %v3318_v18 }
 0x221   :  { %v2647_v63 = vrot.slane %v2646_v59, 1  ;;  %v2659_v34 = vrot.slane %v2658_v21, 2  ;;  %v2781_v44 = vrot.slane %v2767_v32, %v3318_v18  ;;  %v2598_v30 = vcombine.low %v2590_v50, %v2597_v1 }
 0x222   :  { %v2641_v55 = vadd.f32 %v2640_v38, %v2639_v29  ;;  %v2654_v56 = vrot.slane %v2653_v15, 1  ;;  %v2437_v51 = vsub.f32 %v4479_v54, %v4314_v11  ;;  %v2522_v7 = vsub.f32 %v4480_v36, %v2520_v42 }
 0x223   :  { %v2648_v12 = vadd.f32 %v2647_v63, %v2646_v59  ;;  %v2660_v20 = vadd.f32 %v2659_v34, %v2658_v21  ;;  %v2782_v17 = vcombine.low %v2774_v2, %v2781_v44  ;;  %v2605_v4 = vrot.slane %v2598_v30, %v3318_v18 }
 0x224   :  { %v2655_v31 = vadd.f32 %v2654_v56, %v2653_v15  ;;  %v2695_v23 = vadd.f32 %v2641_v55, %v4147_v37  ;;  %v2438_v33 = vmul.f32 %v2437_v51, %v2437_v51  ;;  %v2523_v37 = vmul.f32 %v2522_v7, %v2522_v7 }
 0x225   :  { %v2661_v3 = vrot.slane %v2660_v20, 1  ;;  %v2667_v62 = vcombine.low %v2641_v55, %v2648_v12  ;;  %v2696_v39 = vadd.f32 %v2648_v12, %v4151_v27  ;;  %v2789_v47 = vrot.slane %v2782_v17, %v3318_v18 }
 0x226   :  { %v2697_v25 = vadd.f32 %v2655_v31, %v4155_v10  ;;  %v2607_v45 = vsub.f32 %v4112_v61, %v2605_v4  ;;  %v2524_v49 = vadd.f32 %v2523_v37, %v2438_v33 }
 0x227   :  { %v2662_v43 = vadd.f32 %v2661_v3, %v2660_v20  ;;  %v2797_v5 = vcombine.low %v2695_v23, %v2696_v39  ;;  %2912 = vst.msk [vmem:[%s4402_s5 + $0x2] ss:$4 sm:$0xf] %vm3415_vm0, %v2789_v47  ;;  %v2675_v35 = vrot.slane %v2667_v62, %v3318_v18 }
 0x228   :  { %v2608_v8 = vmul.f32 %v2607_v45, %v2607_v45 }
 0x229   :  { %v2668_v11 = vcombine.low %v2655_v31, %v2662_v43  ;;  %v2698_v27 = vadd.f32 %v2662_v43, %v4158_v26  ;;  %v2805_v10 = vrot.slane %v2797_v5, %v3318_v18 }
 0x22a   :  { %v2609_v9 = vadd.f32 %v2608_v8, %v2524_v49 }
 0x22b   :  { %v2682_v16 = vrot.slane %v2668_v11, %v3318_v18  ;;  %v2798_v13 = vcombine.low %v2697_v25, %v2698_v27 }
 0x22d   :  { %v2683_v48 = vcombine.low %v2675_v35, %v2682_v16  ;;  %v2812_v24 = vrot.slane %v2798_v13, %v3318_v18 }
 0x22f   :  { %v2690_v60 = vrot.slane %v2683_v48, %v3318_v18  ;;  %v2813_v22 = vcombine.low %v2805_v10, %v2812_v24 }
 0x231   :  { %v2692_v6 = vsub.f32 %v4143_v0, %v2690_v60  ;;  %v2820_v26 = vrot.slane %v2813_v22, %v3318_v18 }
 0x233   :  { %v2693_v52 = vmul.f32 %v2692_v6, %v2692_v6  ;;  %2913 = vst.msk [vmem:[%s4402_s5 + $0x3] ss:$4 sm:$0xf] %vm3415_vm0, %v2820_v26 }
 0x235   :  { %v2694_v61 = vadd.f32 %v2693_v52, %v2609_v9 }
 0x237   :  { %2910 = vst.msk [vmem:[%s4401_s7 + $0x3] ss:$4 sm:$0xf] %vm3415_vm0, %v2694_v61 }

</bundles_post_ra>
